<compile_context>
chip_gen: v7x
topology: tpu7x:2x2x1
jax: 0.10.0
libtpu: 0.0.40
codegen_flags: <defaults>
</compile_context>

<pallas_src>
import functools
import math

import jax
import jax.numpy as jnp
from jax.experimental import pallas as pl
from jax.experimental.pallas import tpu as pltpu


def _round_up(x, m):
    return (x + m - 1) // m * m


_VMEM_LIMIT = None


def _vmem_limit_bytes():
    """~75% of physical VMEM: ~96 MiB on v5e/v6e (128 MiB), ~48 MiB on v7x (64 MiB)."""
    global _VMEM_LIMIT
    if _VMEM_LIMIT is None:
        try:
            cap = int(pltpu.get_tpu_info().vmem_capacity_bytes)
        except Exception:
            cap = 64 * 1024 * 1024
        _VMEM_LIMIT = max(32 * 1024 * 1024, (cap * 3) // 4)
    return _VMEM_LIMIT


_TM_CAP, _TK_CAP, _TN_CAP = 512, 512, 1024


def _pick_tile(dim, cap, mult):
    """Full-dim tile when it fits (no padding); otherwise the largest multiple
    of `mult` <= cap that divides `dim`; otherwise cap (pad fallback)."""
    if dim <= cap:
        return dim
    t = (cap // mult) * mult
    while t >= mult:
        if dim % t == 0:
            return t
        t -= mult
    return (cap // mult) * mult


# --------------------------- tiled linear (MXU) ----------------------------

def _linear_kernel(x_ref, w_ref, *rest, relu, has_bias, has_residual,
                   fuse_ln, ln_eps):
    idx = 0
    g_ref = be_ref = b_ref = r_ref = None
    if fuse_ln:
        g_ref = rest[idx]; idx += 1
        be_ref = rest[idx]; idx += 1
    if has_bias:
        b_ref = rest[idx]; idx += 1
    if has_residual:
        r_ref = rest[idx]; idx += 1
    o_ref = rest[idx]
    acc_ref = rest[idx + 1]

    k = pl.program_id(2)

    @pl.when(k == 0)
    def _():
        acc_ref[...] = jnp.zeros_like(acc_ref)

    x = x_ref[...]
    if fuse_ln:
        # LayerNorm fused into the matmul prologue (single K block guaranteed).
        xf = x.astype(jnp.float32)
        mu = jnp.mean(xf, axis=-1, keepdims=True)
        var = jnp.mean((xf - mu) * (xf - mu), axis=-1, keepdims=True)
        x = (xf - mu) * jax.lax.rsqrt(var + ln_eps) * g_ref[...] + be_ref[...]

    # bf16 operands on the MXU, f32 accumulation.
    acc_ref[...] += jnp.dot(x.astype(jnp.bfloat16),
                            w_ref[...].astype(jnp.bfloat16),
                            preferred_element_type=jnp.float32)

    @pl.when(k == pl.num_programs(2) - 1)
    def _():
        y = acc_ref[...]
        if has_bias:
            y = y + b_ref[...]
        if relu:
            y = jnp.maximum(y, 0.0)
        if has_residual:
            y = y + r_ref[...].astype(jnp.float32)
        o_ref[...] = y.astype(o_ref.dtype)


def linear(x, w, b=None, relu=False, residual=None, ln=None, ln_eps=1e-5):
    """y = relu?(LN?(x) @ w + b) [+ residual].  x: (..., K), w: (K, N), b: (N,).
    ln = (gamma, beta) fuses a row LayerNorm into the matmul prologue."""
    orig_shape = x.shape
    K = orig_shape[-1]
    N = w.shape[1]
    x2 = x.reshape(-1, K)
    M = x2.shape[0]

    tk = _pick_tile(K, _TK_CAP, 128)
    if ln is not None and tk != K:
        # LN needs whole rows; K does not fit one tile -> standalone LN kernel.
        x2 = layernorm(x2, ln[0], ln[1], eps=ln_eps)
        ln = None
    tn = _pick_tile(N, _TN_CAP, 128)
    tm = min(_TM_CAP, _round_up(M, 8))
    Mp, Kp, Np = _round_up(M, tm), _round_up(K, tk), _round_up(N, tn)

    xp = x2 if (Mp == M and Kp == K) else jnp.pad(x2, ((0, Mp - M), (0, Kp - K)))
    # Weight tiles are full dims or exact divisors, so this pad is normally a
    # no-op.  TODO(synk): pre-pad weights once at init for configs whose dims
    # don't divide the tile caps (avoids a per-call HBM copy of the weight).
    wp = w if (Kp == K and Np == N) else jnp.pad(w, ((0, Kp - K), (0, Np - N)))

    inputs = [xp, wp]
    in_specs = [
        pl.BlockSpec((tm, tk), lambda i, j, k: (i, k)),
        pl.BlockSpec((tk, tn), lambda i, j, k: (k, j)),
    ]
    fuse_ln = ln is not None
    if fuse_ln:
        inputs.append(ln[0].reshape(1, K).astype(jnp.float32))
        inputs.append(ln[1].reshape(1, K).astype(jnp.float32))
        in_specs.append(pl.BlockSpec((1, tk), lambda i, j, k: (0, k)))
        in_specs.append(pl.BlockSpec((1, tk), lambda i, j, k: (0, k)))
    has_bias = b is not None
    if has_bias:
        bp = b.reshape(1, N).astype(jnp.float32)
        if Np != N:
            bp = jnp.pad(bp, ((0, 0), (0, Np - N)))
        inputs.append(bp)
        in_specs.append(pl.BlockSpec((1, tn), lambda i, j, k: (0, j)))
    has_residual = residual is not None
    if has_residual:
        r2 = residual.reshape(-1, N)
        if Mp != M or Np != N:
            r2 = jnp.pad(r2, ((0, Mp - M), (0, Np - N)))
        inputs.append(r2)
        in_specs.append(pl.BlockSpec((tm, tn), lambda i, j, k: (i, j)))

    out = pl.pallas_call(
        functools.partial(_linear_kernel, relu=relu, has_bias=has_bias,
                          has_residual=has_residual, fuse_ln=fuse_ln,
                          ln_eps=ln_eps),
        out_shape=jax.ShapeDtypeStruct((Mp, Np), x.dtype),
        grid=(Mp // tm, Np // tn, Kp // tk),
        in_specs=in_specs,
        out_specs=pl.BlockSpec((tm, tn), lambda i, j, k: (i, j)),
        scratch_shapes=[pltpu.VMEM((tm, tn), jnp.float32)],
        compiler_params=pltpu.CompilerParams(
            dimension_semantics=("parallel", "parallel", "arbitrary"),
            vmem_limit_bytes=_vmem_limit_bytes()),
    )(*inputs)
    out = out[:M, :N]
    return out.reshape(orig_shape[:-1] + (N,))


# ----------------------- LayerNorm (fallback kernel) ------------------------

def _layernorm_kernel(x_ref, g_ref, b_ref, o_ref, *, eps):
    x = x_ref[...].astype(jnp.float32)
    mu = jnp.mean(x, axis=-1, keepdims=True)
    var = jnp.mean((x - mu) * (x - mu), axis=-1, keepdims=True)
    o_ref[...] = ((x - mu) * jax.lax.rsqrt(var + eps) * g_ref[...]
                  + b_ref[...]).astype(o_ref.dtype)


def layernorm(x, gamma, beta, eps=1e-5):
    shape = x.shape
    D = shape[-1]
    x2 = x.reshape(-1, D)
    M = x2.shape[0]
    tm = min(256, _round_up(M, 8))
    Mp = _round_up(M, tm)
    xp = x2 if Mp == M else jnp.pad(x2, ((0, Mp - M), (0, 0)))
    out = pl.pallas_call(
        functools.partial(_layernorm_kernel, eps=eps),
        out_shape=jax.ShapeDtypeStruct((Mp, D), x.dtype),
        grid=(Mp // tm,),
        in_specs=[
            pl.BlockSpec((tm, D), lambda i: (i, 0)),
            pl.BlockSpec((1, D), lambda i: (0, 0)),
            pl.BlockSpec((1, D), lambda i: (0, 0)),
        ],
        out_specs=pl.BlockSpec((tm, D), lambda i: (i, 0)),
        compiler_params=pltpu.CompilerParams(
            dimension_semantics=("parallel",),
            vmem_limit_bytes=_vmem_limit_bytes()),
    )(xp, gamma.reshape(1, D), beta.reshape(1, D))
    return out[:M].reshape(shape)


# ------------------------- attention head grouping --------------------------

def _num_head_groups(num_heads, lane_per_head):
    """Split heads across the grid (bounds the score tensor's VMEM per step and
    feeds both v7x TensorCores) only when per-group blocks stay layout-legal:
    heads_per_group % 8 == 0 (sublane) and lane width % 128 == 0 (lane-dense
    output store).  Falls back to a single group for small configs."""
    for g in (8, 4, 2):
        if num_heads % g == 0:
            hpg = num_heads // g
            if hpg % 8 == 0 and (hpg * lane_per_head) % 128 == 0:
                return g
    return 1


# ------------------- differential attention (per B, head-group) -------------

def _diff_attn_kernel(q_ref, k_ref, v_ref, m_ref, w_ref, lam_ref, o_ref, *,
                      scaling, lambda_init, eps):
    lam = lam_ref[0, 0]                                    # SMEM scalar
    q = q_ref[0].astype(jnp.bfloat16)                      # (T, 2Hg, hd)
    k = k_ref[0].astype(jnp.bfloat16)                      # (S, 2Hg, hd)
    v = v_ref[0].astype(jnp.bfloat16)                      # (S, Hg, 2hd)

    # All component heads of this group in one batched MXU call (f32 accum);
    # K is consumed directly (no materialized K^T), scaling folded once.
    s = jnp.einsum('tnd,snd->nts', q, k, preferred_element_type=jnp.float32)
    s = s * scaling + m_ref[...]                           # additive causal mask (T,S)
    # TODO(synk): torch.nan_to_num on raw scores is skipped (inputs are finite).
    mx = jnp.max(s, axis=-1, keepdims=True)
    e = jnp.exp(s - mx)
    # Exact division here: the two component softmaxes get subtracted, so an
    # approx-reciprocal error would be amplified where p1 ~ lam * p2.
    p = e / jnp.sum(e, axis=-1, keepdims=True)

    n2, T, S = p.shape
    p = p.reshape(n2 // 2, 2, T, S)
    a = (p[:, 0] - lam * p[:, 1]).astype(jnp.bfloat16)     # (Hg, T, S)

    attn = jnp.einsum('hts,she->hte', a, v,
                      preferred_element_type=jnp.float32)  # (Hg, T, 2hd)
    # sub-layer RMSNorm (eps=1e-5, affine) then (1 - lambda_init) scale
    ms = jnp.mean(attn * attn, axis=-1, keepdims=True)
    attn = attn * jax.lax.rsqrt(ms + eps) * w_ref[...]
    attn = attn * (1.0 - lambda_init)

    # Single lane-dense store: (Hg,T,e2) -> (T,Hg,e2) -> (T, Hg*e2).
    attn = jnp.transpose(attn, (1, 0, 2))
    o_ref[0] = attn.reshape(T, -1).astype(o_ref.dtype)


def diff_attention_core(q, k, v, mask_add, subln_w, lam, *, scaling, lambda_init):
    """q: (B,T,2H,hd)  k: (B,S,2H,hd)  v: (B,S,H,2hd)  -> (B, T, H*2hd)."""
    B, T, H2, hd = q.shape
    H = H2 // 2
    S = k.shape[1]
    e2 = 2 * hd
    D = H * e2
    HG = _num_head_groups(H, e2)
    Hg = H // HG
    # TODO(synk): for very long S add a KV grid axis with online softmax
    # (flash-style) to bound the (2Hg, T, S) score tensor's VMEM footprint.
    return pl.pallas_call(
        functools.partial(_diff_attn_kernel, scaling=scaling,
                          lambda_init=lambda_init, eps=1e-5),
        out_shape=jax.ShapeDtypeStruct((B, T, D), q.dtype),
        grid=(B, HG),
        in_specs=[
            pl.BlockSpec((1, T, 2 * Hg, hd), lambda b, g: (b, 0, g, 0)),
            pl.BlockSpec((1, S, 2 * Hg, hd), lambda b, g: (b, 0, g, 0)),
            pl.BlockSpec((1, S, Hg, e2), lambda b, g: (b, 0, g, 0)),
            pl.BlockSpec((T, S), lambda b, g: (0, 0)),
            pl.BlockSpec((1, e2), lambda b, g: (0, 0)),
            pl.BlockSpec(memory_space=pltpu.MemorySpace.SMEM),   # lambda_full
        ],
        out_specs=pl.BlockSpec((1, T, Hg * e2), lambda b, g: (b, 0, g)),
        compiler_params=pltpu.CompilerParams(
            dimension_semantics=("parallel", "parallel"),
            vmem_limit_bytes=_vmem_limit_bytes()),
    )(q, k, v, mask_add, subln_w.reshape(1, e2), lam)


# ------------------------ cross MHA (per B, head-group) ---------------------

def _mha_kernel(q_ref, k_ref, v_ref, m_ref, o_ref, *, inv_scale):
    q = q_ref[0].astype(jnp.bfloat16)                      # (T, Hg, hd)
    k = k_ref[0].astype(jnp.bfloat16)                      # (S, Hg, hd)
    v = v_ref[0].astype(jnp.bfloat16)                      # (S, Hg, hd)
    s = jnp.einsum('tnd,snd->nts', q, k, preferred_element_type=jnp.float32)
    s = s * inv_scale + m_ref[...]                         # additive 0 / -1e10 mask
    mx = jnp.max(s, axis=-1, keepdims=True)
    e = jnp.exp(s - mx)
    p = (e * pl.reciprocal(jnp.sum(e, axis=-1, keepdims=True),
                           approx=True)).astype(jnp.bfloat16)
    out = jnp.einsum('nts,sne->nte', p, v,
                     preferred_element_type=jnp.float32)   # (Hg, T, hd)
    T = out.shape[1]
    out = jnp.transpose(out, (1, 0, 2))                    # (T, Hg, hd)
    o_ref[0] = out.reshape(T, -1).astype(o_ref.dtype)      # single lane-dense store


def mha_attention_core(q, k, v, mask_add, scale):
    """q: (B,T,H,hd)  k,v: (B,S,H,hd) -> (B, T, H*hd)."""
    B, T, H, hd = q.shape
    S = k.shape[1]
    D = H * hd
    HG = _num_head_groups(H, hd)
    Hg = H // HG
    return pl.pallas_call(
        functools.partial(_mha_kernel, inv_scale=1.0 / scale),
        out_shape=jax.ShapeDtypeStruct((B, T, D), q.dtype),
        grid=(B, HG),
        in_specs=[
            pl.BlockSpec((1, T, Hg, hd), lambda b, g: (b, 0, g, 0)),
            pl.BlockSpec((1, S, Hg, hd), lambda b, g: (b, 0, g, 0)),
            pl.BlockSpec((1, S, Hg, hd), lambda b, g: (b, 0, g, 0)),
            pl.BlockSpec((T, S), lambda b, g: (0, 0)),
        ],
        out_specs=pl.BlockSpec((1, T, Hg * hd), lambda b, g: (b, 0, g)),
        compiler_params=pltpu.CompilerParams(
            dimension_semantics=("parallel", "parallel"),
            vmem_limit_bytes=_vmem_limit_bytes()),
    )(q, k, v, mask_add)


# ----------------------------- JAX glue ------------------------------------

def rotary_tables(seq_len, head_dim):
    half = head_dim // 2
    inv_freq = 1.0 / (10000.0 ** (jnp.arange(half, dtype=jnp.float32) / half))
    t = jnp.arange(seq_len, dtype=jnp.float32)
    freqs = jnp.einsum("i,j->ij", t, inv_freq)             # (T, half)
    return jnp.cos(freqs), jnp.sin(freqs)


def apply_rotary_interleaved(x, cos, sin):
    """x: (B, T, H, Dh); cos/sin: (T, Dh//2).  Interleaved (adjacent-pair) rotary."""
    B, T, H, Dh = x.shape
    xp = x.reshape(B, T, H, Dh // 2, 2)
    x0, x1 = xp[..., 0], xp[..., 1]
    c = cos[None, :, None, :]
    s = sin[None, :, None, :]
    o0 = x0 * c - x1 * s
    o1 = x0 * s + x1 * c
    return jnp.stack([o0, o1], axis=-1).reshape(B, T, H, Dh)


def diff_attn_forward(x, p, cfg, depth, attn_mask_add, ln):
    B, T, D = x.shape
    H = cfg["n_heads"]
    hd = D // H // 2                                # diff-attention half head dim
    qkv = linear(x, p["wqkv"], ln=ln)               # fused LN + Q|K|V projection
    q = qkv[..., :D].reshape(B, T, 2 * H, hd)
    k = qkv[..., D:2 * D].reshape(B, T, 2 * H, hd)  # n_rep == 1
    v = qkv[..., 2 * D:].reshape(B, T, H, 2 * hd)
    cos, sin = rotary_tables(T, hd)
    q = apply_rotary_interleaved(q, cos, sin)
    k = apply_rotary_interleaved(k, cos, sin)
    # seq-major layouts go straight into the attention kernel (no transposes).
    lambda_init = 0.8 - 0.6 * math.exp(-0.3 * depth)
    lam = (jnp.exp(jnp.sum(p["lq1"] * p["lk1"]))
           - jnp.exp(jnp.sum(p["lq2"] * p["lk2"])) + lambda_init)
    lam = lam.astype(jnp.float32).reshape(1, 1)     # traced scalar, read from SMEM
    return diff_attention_core(q, k, v, attn_mask_add, p["subln_w"], lam,
                               scaling=hd ** (-0.5), lambda_init=lambda_init)


def mha_forward(x, enc_out, p, n_heads, mask_add, residual, ln):
    B, T, D = x.shape
    S = enc_out.shape[1]
    hd = D // n_heads
    Q = linear(x, p["wq"], p["bq"], ln=ln).reshape(B, T, n_heads, hd)
    KV = linear(enc_out, p["wkv"], p["bkv"])        # fused K|V (both from enc_out)
    K = KV[..., :D].reshape(B, S, n_heads, hd)
    V = KV[..., D:].reshape(B, S, n_heads, hd)
    out = mha_attention_core(Q, K, V, mask_add, float(math.sqrt(hd)))  # (B,T,D)
    return linear(out, p["wo"], p["bo"], residual=residual)


def ff_forward(x, p, residual, ln):
    h = linear(x, p["w1"], p["b1"], relu=True, ln=ln)
    # drop_p = 0.0 -> Dropout is identity
    return linear(h, p["w2"], p["b2"], residual=residual)


def decoder_forward(params, trg, enc_out, dec_mask_add, enc_dec_mask_add, cfg):
    B, T = trg.shape
    d_model = cfg["d_model"]
    x = (math.sqrt(d_model) * jnp.take(params["emb"], trg, axis=0)
         + params["pos_emb"][None, :T, :])
    # dropout with drop_p = 0.0 is identity
    for depth, lp in enumerate(params["layers"]):
        ln = (lp["ln_g"], lp["ln_b"])               # one LayerNorm reused 3x/layer
        attn = diff_attn_forward(x, lp["diff"], cfg, depth, dec_mask_add, ln)
        x = linear(attn, lp["diff"]["wo"], residual=x)        # out-proj + residual
        x = mha_forward(x, enc_out, lp["cross"], cfg["n_heads"],
                        enc_dec_mask_add, residual=x, ln=ln)
        x = ff_forward(x, lp["ff"], residual=x, ln=ln)
    # final LN fused into fc_out's prologue
    return linear(x, params["w_out"], params["b_out"],
                  ln=(params["ln_g"], params["ln_b"]))


# ----------------------------- parameter init -------------------------------

def init_params(key, cfg):
    d = cfg["d_model"]
    H = cfg["n_heads"]
    hd = d // H // 2
    keys = iter(jax.random.split(key, 256))

    def w(shape, std=0.02):
        return jax.random.normal(next(keys), shape, jnp.float32) * std

    params = {
        "emb": w((cfg["vocab_size"], d)),
        "pos_emb": w((cfg["max_len"], d)),
        "ln_g": jnp.ones((d,), jnp.float32),
        "ln_b": jnp.zeros((d,), jnp.float32),
        "w_out": w((d, cfg["vocab_size"])),
        "b_out": jnp.zeros((cfg["vocab_size"],), jnp.float32),
        "layers": [],
    }
    for _ in range(cfg["n_layers"]):
        lp = {
            "diff": {
                # fused [Wq | Wk | Wv] so x is projected once (no bias)
                "wqkv": w((d, 3 * d)),
                "wo": w((d, d)),
                "lq1": w((hd,), std=0.1), "lk1": w((hd,), std=0.1),
                "lq2": w((hd,), std=0.1), "lk2": w((hd,), std=0.1),
                "subln_w": jnp.ones((2 * hd,), jnp.float32),
            },
            "cross": {
                "wq": w((d, d)), "bq": jnp.zeros((d,), jnp.float32),
                # fused [Wk | Wv] (K and V both project enc_out)
                "wkv": w((d, 2 * d)), "bkv": jnp.zeros((2 * d,), jnp.float32),
                "wo": w((d, d)), "bo": jnp.zeros((d,), jnp.float32),
            },
            "ff": {
                "w1": w((d, cfg["d_ff"])),
                "b1": jnp.zeros((cfg["d_ff"],), jnp.float32),
                "w2": w((cfg["d_ff"], d)),
                "b2": jnp.zeros((d,), jnp.float32),
            },
            # the reference reuses a single nn.LayerNorm at all three pre-norm
            # sites within a layer, so one gamma/beta pair per layer is correct
            "ln_g": jnp.ones((d,), jnp.float32),
            "ln_b": jnp.zeros((d,), jnp.float32),
        }
        params["layers"].append(lp)
    return params


# ----------------------------- main -----------------------------------------

if __name__ == "__main__":
    cfg = dict(vocab_size=50, max_len=16, d_model=32, n_heads=4,
               n_layers=2, d_ff=64)
    B, T, S = 2, 8, 8

    key = jax.random.PRNGKey(0)
    k_trg, k_enc, k_par = jax.random.split(key, 3)
    trg = jax.random.randint(k_trg, (B, T), 0, cfg["vocab_size"])
    enc_out = jax.random.normal(k_enc, (B, S, cfg["d_model"]), jnp.float32)
    params = init_params(k_par, cfg)

    # causal additive mask for differential self-attention (0 / -inf; the
    # diagonal is always unmasked so no fully-masked rows can occur)
    idx = jnp.arange(T)
    dec_mask = jnp.where(idx[None, :] > idx[:, None],
                         -jnp.inf, 0.0).astype(jnp.float32)
    # enc_dec_mask = None in the reference -> no masking (additive zeros)
    enc_dec_mask = jnp.zeros((T, S), jnp.float32)

    fwd = jax.jit(functools.partial(decoder_forward, cfg=cfg))
    logits = fwd(params, trg, enc_out, dec_mask, enc_dec_mask)
    jax.block_until_ready(logits)
    assert logits.shape == (B, T, cfg["vocab_size"])
    assert bool(jnp.all(jnp.isfinite(logits)))
    print("KERNEL_OK")
</pallas_src>

<mosaic_0001>
module attributes {stable_mosaic.version = 11 : i64} {
  func.func @_linear_kernel(%arg0: i32, %arg1: i32, %arg2: i32, %arg3: memref<16x32xf32, #tpu.memory_space<vmem>>, %arg4: memref<32x96xf32, #tpu.memory_space<vmem>>, %arg5: memref<1x32xf32, #tpu.memory_space<vmem>>, %arg6: memref<1x32xf32, #tpu.memory_space<vmem>>, %arg7: memref<16x96xf32, #tpu.memory_space<vmem>>, %arg8: memref<16x96xf32, #tpu.memory_space<vmem>>) attributes {dimension_semantics = [#tpu.dimension_semantics<parallel>, #tpu.dimension_semantics<parallel>, #tpu.dimension_semantics<arbitrary>], iteration_bounds = array<i64: 1, 1, 1>, scalar_prefetch = 0 : i64, scratch_operands = 1 : i64, tpu.core_type = #tpu.core_type<tc>, window_params = [{transform_indices = @transform_0, window_bounds = array<i64: 16, 32>}, {transform_indices = @transform_1, window_bounds = array<i64: 32, 96>}, {transform_indices = @transform_2, window_bounds = array<i64: 1, 32>}, {transform_indices = @transform_3, window_bounds = array<i64: 1, 32>}, {transform_indices = @transform_4, window_bounds = array<i64: 16, 96>}]} {
    %c0_i32 = arith.constant 0 : i32
    %0 = arith.cmpi eq, %arg2, %c0_i32 : i32
    %1 = arith.extui %0 : i1 to i32
    %c0_i32_0 = arith.constant 0 : i32
    %2 = arith.cmpi ne, %1, %c0_i32_0 : i32
    scf.if %2 {
      %cst_19 = arith.constant 0.000000e+00 : f32
      %40 = vector.broadcast %cst_19 : f32 to vector<16x96xf32>
      %c0_20 = arith.constant 0 : index
      %c0_21 = arith.constant 0 : index
      %41 = vector.load %arg8[%c0_20, %c0_21] : memref<16x96xf32, #tpu.memory_space<vmem>>, vector<16x96xf32>
      tpu.vector_store %arg8[%c0_20, %c0_21], %40 {strides = array<i32>} : memref<16x96xf32, #tpu.memory_space<vmem>>, vector<16x96xf32>,
    } else {
    }
    %c0 = arith.constant 0 : index
    %c0_1 = arith.constant 0 : index
    %3 = vector.load %arg3[%c0, %c0_1] : memref<16x32xf32, #tpu.memory_space<vmem>>, vector<16x32xf32>
    %cst = arith.constant dense<0.000000e+00> : vector<16xf32>
    %4 = vector.multi_reduction <add>, %3, %cst [1] : vector<16x32xf32> to vector<16xf32>
    %5 = vector.shape_cast %4 : vector<16xf32> to vector<16x1xf32>
    %cst_2 = arith.constant 3.200000e+01 : f32
    %6 = vector.broadcast %cst_2 : f32 to vector<16x1xf32>
    %7 = arith.divf %5, %6 : vector<16x1xf32>
    %8 = vector.broadcast %7 : vector<16x1xf32> to vector<16x32xf32>
    %9 = arith.subf %3, %8 : vector<16x32xf32>
    %10 = vector.broadcast %7 : vector<16x1xf32> to vector<16x32xf32>
    %11 = arith.subf %3, %10 : vector<16x32xf32>
    %12 = arith.mulf %9, %11 : vector<16x32xf32>
    %cst_3 = arith.constant dense<0.000000e+00> : vector<16xf32>
    %13 = vector.multi_reduction <add>, %12, %cst_3 [1] : vector<16x32xf32> to vector<16xf32>
    %14 = vector.shape_cast %13 : vector<16xf32> to vector<16x1xf32>
    %cst_4 = arith.constant 3.200000e+01 : f32
    %15 = vector.broadcast %cst_4 : f32 to vector<16x1xf32>
    %16 = arith.divf %14, %15 : vector<16x1xf32>
    %17 = vector.broadcast %7 : vector<16x1xf32> to vector<16x32xf32>
    %18 = arith.subf %3, %17 : vector<16x32xf32>
    %cst_5 = arith.constant 9.99999974E-6 : f32
    %19 = vector.broadcast %cst_5 : f32 to vector<16x1xf32>
    %20 = arith.addf %16, %19 : vector<16x1xf32>
    %21 = math.rsqrt %20 : vector<16x1xf32>
    %22 = vector.broadcast %21 : vector<16x1xf32> to vector<16x32xf32>
    %23 = arith.mulf %18, %22 : vector<16x32xf32>
    %c0_6 = arith.constant 0 : index
    %c0_7 = arith.constant 0 : index
    %24 = vector.load %arg5[%c0_6, %c0_7] : memref<1x32xf32, #tpu.memory_space<vmem>>, vector<1x32xf32>
    %25 = vector.broadcast %24 : vector<1x32xf32> to vector<16x32xf32>
    %26 = arith.mulf %23, %25 : vector<16x32xf32>
    %c0_8 = arith.constant 0 : index
    %c0_9 = arith.constant 0 : index
    %27 = vector.load %arg6[%c0_8, %c0_9] : memref<1x32xf32, #tpu.memory_space<vmem>>, vector<1x32xf32>
    %28 = vector.broadcast %27 : vector<1x32xf32> to vector<16x32xf32>
    %29 = arith.addf %26, %28 : vector<16x32xf32>
    %c0_10 = arith.constant 0 : index
    %c0_11 = arith.constant 0 : index
    %30 = vector.load %arg8[%c0_10, %c0_11] : memref<16x96xf32, #tpu.memory_space<vmem>>, vector<16x96xf32>
    %31 = arith.truncf %29 : vector<16x32xf32> to vector<16x32xbf16>
    %c0_12 = arith.constant 0 : index
    %c0_13 = arith.constant 0 : index
    %32 = vector.load %arg4[%c0_12, %c0_13] : memref<32x96xf32, #tpu.memory_space<vmem>>, vector<32x96xf32>
    %33 = arith.truncf %32 : vector<32x96xf32> to vector<32x96xbf16>
    %cst_14 = arith.constant dense<0.000000e+00> : vector<16x96xf32>
    %34 = tpu.matmul %31, %33, %cst_14 {dimension_numbers = #tpu.dot_dimension_numbers<[1], [0], [0], [1], [0, 0, 1, 1], [], []>} : vector<16x32xbf16>, vector<32x96xbf16>, vector<16x96xf32> -> vector<16x96xf32>
    %35 = arith.addf %30, %34 : vector<16x96xf32>
    %c0_15 = arith.constant 0 : index
    %c0_16 = arith.constant 0 : index
    %36 = vector.load %arg8[%c0_15, %c0_16] : memref<16x96xf32, #tpu.memory_space<vmem>>, vector<16x96xf32>
    tpu.vector_store %arg8[%c0_15, %c0_16], %35 {strides = array<i32>} : memref<16x96xf32, #tpu.memory_space<vmem>>, vector<16x96xf32>,
    %c0_i32_17 = arith.constant 0 : i32
    %37 = arith.cmpi eq, %arg2, %c0_i32_17 : i32
    %38 = arith.extui %37 : i1 to i32
    %c0_i32_18 = arith.constant 0 : i32
    %39 = arith.cmpi ne, %38, %c0_i32_18 : i32
    scf.if %39 {
      %c0_19 = arith.constant 0 : index
      %c0_20 = arith.constant 0 : index
      %40 = vector.load %arg8[%c0_19, %c0_20] : memref<16x96xf32, #tpu.memory_space<vmem>>, vector<16x96xf32>
      %c0_21 = arith.constant 0 : index
      %c0_22 = arith.constant 0 : index
      %41 = vector.load %arg7[%c0_21, %c0_22] : memref<16x96xf32, #tpu.memory_space<vmem>>, vector<16x96xf32>
      tpu.vector_store %arg7[%c0_21, %c0_22], %40 {strides = array<i32>} : memref<16x96xf32, #tpu.memory_space<vmem>>, vector<16x96xf32>,
    } else {
    }
    return
  }
  func.func @transform_0(%arg0: i32, %arg1: i32, %arg2: i32) -> (i32, i32) {
    %c0_i32 = arith.constant 0 : i32
    return %arg0, %arg2 : i32, i32
  }
  func.func @transform_1(%arg0: i32, %arg1: i32, %arg2: i32) -> (i32, i32) {
    %c0_i32 = arith.constant 0 : i32
    return %arg2, %arg1 : i32, i32
  }
  func.func @transform_2(%arg0: i32, %arg1: i32, %arg2: i32) -> (i32, i32) {
    %c0_i32 = arith.constant 0 : i32
    %c0_i32_0 = arith.constant 0 : i32
    return %c0_i32, %arg2 : i32, i32
  }
  func.func @transform_3(%arg0: i32, %arg1: i32, %arg2: i32) -> (i32, i32) {
    %c0_i32 = arith.constant 0 : i32
    %c0_i32_0 = arith.constant 0 : i32
    return %c0_i32, %arg2 : i32, i32
  }
  func.func @transform_4(%arg0: i32, %arg1: i32, %arg2: i32) -> (i32, i32) {
    %c0_i32 = arith.constant 0 : i32
    return %arg0, %arg1 : i32, i32
  }
}

module attributes {stable_mosaic.version = 11 : i64} {
  func.func @_diff_attn_kernel(%arg0: i32, %arg1: i32, %arg2: memref<1x8x8x4xf32, #tpu.memory_space<vmem>>, %arg3: memref<1x8x8x4xf32, #tpu.memory_space<vmem>>, %arg4: memref<1x8x4x8xf32, #tpu.memory_space<vmem>>, %arg5: memref<8x8xf32, #tpu.memory_space<vmem>>, %arg6: memref<1x8xf32, #tpu.memory_space<vmem>>, %arg7: memref<1x1xf32, #tpu.memory_space<smem>>, %arg8: memref<1x8x32xf32, #tpu.memory_space<vmem>>) attributes {dimension_semantics = [#tpu.dimension_semantics<parallel>, #tpu.dimension_semantics<parallel>], iteration_bounds = array<i64: 2, 1>, scalar_prefetch = 0 : i64, scratch_operands = 0 : i64, tpu.core_type = #tpu.core_type<tc>, window_params = [{transform_indices = @transform_0, window_bounds = array<i64: 1, 8, 8, 4>}, {transform_indices = @transform_1, window_bounds = array<i64: 1, 8, 8, 4>}, {transform_indices = @transform_2, window_bounds = array<i64: 1, 8, 4, 8>}, {pipeline_mode = #tpu.pipeline_mode<synchronous>, transform_indices = @transform_3, window_bounds = array<i64: 8, 8>}, {pipeline_mode = #tpu.pipeline_mode<synchronous>, transform_indices = @transform_4, window_bounds = array<i64: 1, 8>}, {transform_indices = @transform_5, window_bounds = array<i64: 1, 1>}, {transform_indices = @transform_6, window_bounds = array<i64: 1, 8, 32>}]} {
    %c0 = arith.constant 0 : index
    %c0_0 = arith.constant 0 : index
    %0 = memref.load %arg7[%c0, %c0_0] : memref<1x1xf32, #tpu.memory_space<smem>>
    %c0_1 = arith.constant 0 : index
    %c0_2 = arith.constant 0 : index
    %c0_3 = arith.constant 0 : index
    %c0_4 = arith.constant 0 : index
    %1 = vector.load %arg2[%c0_1, %c0_2, %c0_3, %c0_4] : memref<1x8x8x4xf32, #tpu.memory_space<vmem>>, vector<1x8x8x4xf32>
    %2 = vector.shape_cast %1 : vector<1x8x8x4xf32> to vector<8x8x4xf32>
    %3 = arith.truncf %2 : vector<8x8x4xf32> to vector<8x8x4xbf16>
    %c0_5 = arith.constant 0 : index
    %c0_6 = arith.constant 0 : index
    %c0_7 = arith.constant 0 : index
    %c0_8 = arith.constant 0 : index
    %4 = vector.load %arg3[%c0_5, %c0_6, %c0_7, %c0_8] : memref<1x8x8x4xf32, #tpu.memory_space<vmem>>, vector<1x8x8x4xf32>
    %5 = vector.shape_cast %4 : vector<1x8x8x4xf32> to vector<8x8x4xf32>
    %6 = arith.truncf %5 : vector<8x8x4xf32> to vector<8x8x4xbf16>
    %c0_9 = arith.constant 0 : index
    %c0_10 = arith.constant 0 : index
    %c0_11 = arith.constant 0 : index
    %c0_12 = arith.constant 0 : index
    %7 = vector.load %arg4[%c0_9, %c0_10, %c0_11, %c0_12] : memref<1x8x4x8xf32, #tpu.memory_space<vmem>>, vector<1x8x4x8xf32>
    %8 = vector.shape_cast %7 : vector<1x8x4x8xf32> to vector<8x4x8xf32>
    %9 = arith.truncf %8 : vector<8x4x8xf32> to vector<8x4x8xbf16>
    "tpu.trace_start"() <{level = 10 : i32, message = "tnd,snd->nts"}> : () -> ()
    %cst = arith.constant dense<0.000000e+00> : vector<8x8x8xf32>
    %10 = tpu.matmul %3, %6, %cst {dimension_numbers = #tpu.dot_dimension_numbers<[2], [2], [0], [0], [0, 1, 0, 0, 1, 0], [1], [1]>} : vector<8x8x4xbf16>, vector<8x8x4xbf16>, vector<8x8x8xf32> -> vector<8x8x8xf32>
    "tpu.trace_stop"() : () -> ()
    %cst_13 = arith.constant 5.000000e-01 : f32
    %11 = vector.broadcast %cst_13 : f32 to vector<8x8x8xf32>
    %12 = arith.mulf %10, %11 : vector<8x8x8xf32>
    %c0_14 = arith.constant 0 : index
    %c0_15 = arith.constant 0 : index
    %13 = vector.load %arg5[%c0_14, %c0_15] : memref<8x8xf32, #tpu.memory_space<vmem>>, vector<8x8xf32>
    %14 = vector.shape_cast %13 : vector<8x8xf32> to vector<1x8x8xf32>
    %15 = vector.broadcast %14 : vector<1x8x8xf32> to vector<8x8x8xf32>
    %16 = arith.addf %12, %15 : vector<8x8x8xf32>
    %cst_16 = arith.constant dense<0xFF800000> : vector<8x8xf32>
    %17 = vector.multi_reduction <maximumf>, %16, %cst_16 [2] : vector<8x8x8xf32> to vector<8x8xf32>
    %18 = vector.shape_cast %17 : vector<8x8xf32> to vector<8x8x1xf32>
    %19 = vector.broadcast %18 : vector<8x8x1xf32> to vector<8x8x8xf32>
    %20 = arith.subf %16, %19 : vector<8x8x8xf32>
    %21 = math.exp %20 : vector<8x8x8xf32>
    %cst_17 = arith.constant dense<0.000000e+00> : vector<8x8xf32>
    %22 = vector.multi_reduction <add>, %21, %cst_17 [2] : vector<8x8x8xf32> to vector<8x8xf32>
    %23 = vector.shape_cast %22 : vector<8x8xf32> to vector<8x8x1xf32>
    %24 = vector.broadcast %23 : vector<8x8x1xf32> to vector<8x8x8xf32>
    %25 = arith.divf %21, %24 : vector<8x8x8xf32>
    %26 = vector.shape_cast %25 : vector<8x8x8xf32> to vector<4x2x8x8xf32>
    %27 = vector.extract_strided_slice %26 {offsets = [0, 0, 0, 0], sizes = [4, 1, 8, 8], strides = [1, 1, 1, 1]} : vector<4x2x8x8xf32> to vector<4x1x8x8xf32>
    %28 = vector.shape_cast %27 : vector<4x1x8x8xf32> to vector<4x8x8xf32>
    %29 = vector.extract_strided_slice %26 {offsets = [0, 1, 0, 0], sizes = [4, 1, 8, 8], strides = [1, 1, 1, 1]} : vector<4x2x8x8xf32> to vector<4x1x8x8xf32>
    %30 = vector.shape_cast %29 : vector<4x1x8x8xf32> to vector<4x8x8xf32>
    %31 = vector.broadcast %0 : f32 to vector<4x8x8xf32>
    %32 = arith.mulf %31, %30 : vector<4x8x8xf32>
    %33 = arith.subf %28, %32 : vector<4x8x8xf32>
    %34 = arith.truncf %33 : vector<4x8x8xf32> to vector<4x8x8xbf16>
    "tpu.trace_start"() <{level = 10 : i32, message = "hts,she->hte"}> : () -> ()
    %cst_18 = arith.constant dense<0.000000e+00> : vector<4x8x8xf32>
    %35 = tpu.matmul %34, %9, %cst_18 {dimension_numbers = #tpu.dot_dimension_numbers<[2], [0], [1], [2], [0, 0, 0, 1, 1, 2], [0], [1]>} : vector<4x8x8xbf16>, vector<8x4x8xbf16>, vector<4x8x8xf32> -> vector<4x8x8xf32>
    "tpu.trace_stop"() : () -> ()
    %36 = arith.mulf %35, %35 : vector<4x8x8xf32>
    %cst_19 = arith.constant dense<0.000000e+00> : vector<4x8xf32>
    %37 = vector.multi_reduction <add>, %36, %cst_19 [2] : vector<4x8x8xf32> to vector<4x8xf32>
    %38 = vector.shape_cast %37 : vector<4x8xf32> to vector<4x8x1xf32>
    %cst_20 = arith.constant 8.000000e+00 : f32
    %39 = vector.broadcast %cst_20 : f32 to vector<4x8x1xf32>
    %40 = arith.divf %38, %39 : vector<4x8x1xf32>
    %cst_21 = arith.constant 9.99999974E-6 : f32
    %41 = vector.broadcast %cst_21 : f32 to vector<4x8x1xf32>
    %42 = arith.addf %40, %41 : vector<4x8x1xf32>
    %43 = math.rsqrt %42 : vector<4x8x1xf32>
    %44 = vector.broadcast %43 : vector<4x8x1xf32> to vector<4x8x8xf32>
    %45 = arith.mulf %35, %44 : vector<4x8x8xf32>
    %c0_22 = arith.constant 0 : index
    %c0_23 = arith.constant 0 : index
    %46 = vector.load %arg6[%c0_22, %c0_23] : memref<1x8xf32, #tpu.memory_space<vmem>>, vector<1x8xf32>
    %47 = vector.shape_cast %46 : vector<1x8xf32> to vector<1x1x8xf32>
    %48 = vector.broadcast %47 : vector<1x1x8xf32> to vector<4x8x8xf32>
    %49 = arith.mulf %45, %48 : vector<4x8x8xf32>
    %cst_24 = arith.constant 8.000000e-01 : f32
    %50 = vector.broadcast %cst_24 : f32 to vector<4x8x8xf32>
    %51 = arith.mulf %49, %50 : vector<4x8x8xf32>
    %52 = tpu.transpose %51, [1, 0, 2] : vector<4x8x8xf32> -> vector<8x4x8xf32>
    %53 = vector.shape_cast %52 : vector<8x4x8xf32> to vector<8x32xf32>
    %c0_25 = arith.constant 0 : index
    %c0_26 = arith.constant 0 : index
    %c0_27 = arith.constant 0 : index
    %54 = vector.load %arg8[%c0_25, %c0_26, %c0_27] : memref<1x8x32xf32, #tpu.memory_space<vmem>>, vector<1x8x32xf32>
    %55 = vector.shape_cast %54 : vector<1x8x32xf32> to vector<8x32xf32>
    %56 = vector.shape_cast %53 : vector<8x32xf32> to vector<1x8x32xf32>
    tpu.vector_store %arg8[%c0_25, %c0_26, %c0_27], %56 {strides = array<i32>} : memref<1x8x32xf32, #tpu.memory_space<vmem>>, vector<1x8x32xf32>,
    return
  }
  func.func @transform_0(%arg0: i32, %arg1: i32) -> (i32, i32, i32, i32) {
    %c0_i32 = arith.constant 0 : i32
    %c0_i32_0 = arith.constant 0 : i32
    %c0_i32_1 = arith.constant 0 : i32
    return %arg0, %c0_i32, %arg1, %c0_i32_0 : i32, i32, i32, i32
  }
  func.func @transform_1(%arg0: i32, %arg1: i32) -> (i32, i32, i32, i32) {
    %c0_i32 = arith.constant 0 : i32
    %c0_i32_0 = arith.constant 0 : i32
    %c0_i32_1 = arith.constant 0 : i32
    return %arg0, %c0_i32, %arg1, %c0_i32_0 : i32, i32, i32, i32
  }
  func.func @transform_2(%arg0: i32, %arg1: i32) -> (i32, i32, i32, i32) {
    %c0_i32 = arith.constant 0 : i32
    %c0_i32_0 = arith.constant 0 : i32
    %c0_i32_1 = arith.constant 0 : i32
    return %arg0, %c0_i32, %arg1, %c0_i32_0 : i32, i32, i32, i32
  }
  func.func @transform_3(%arg0: i32, %arg1: i32) -> (i32, i32) {
    %c0_i32 = arith.constant 0 : i32
    %c0_i32_0 = arith.constant 0 : i32
    %c0_i32_1 = arith.constant 0 : i32
    return %c0_i32, %c0_i32_0 : i32, i32
  }
  func.func @transform_4(%arg0: i32, %arg1: i32) -> (i32, i32) {
    %c0_i32 = arith.constant 0 : i32
    %c0_i32_0 = arith.constant 0 : i32
    %c0_i32_1 = arith.constant 0 : i32
    return %c0_i32, %c0_i32_0 : i32, i32
  }
  func.func @transform_5(%arg0: i32, %arg1: i32) -> (i32, i32) {
    %c0_i32 = arith.constant 0 : i32
    %c0_i32_0 = arith.constant 0 : i32
    %c0_i32_1 = arith.constant 0 : i32
    return %c0_i32, %c0_i32_0 : i32, i32
  }
  func.func @transform_6(%arg0: i32, %arg1: i32) -> (i32, i32, i32) {
    %c0_i32 = arith.constant 0 : i32
    %c0_i32_0 = arith.constant 0 : i32
    return %arg0, %c0_i32, %arg1 : i32, i32, i32
  }
}

module attributes {stable_mosaic.version = 11 : i64} {
  func.func @_linear_kernel(%arg0: i32, %arg1: i32, %arg2: i32, %arg3: memref<16x32xf32, #tpu.memory_space<vmem>>, %arg4: memref<32x32xf32, #tpu.memory_space<vmem>>, %arg5: memref<16x32xf32, #tpu.memory_space<vmem>>, %arg6: memref<16x32xf32, #tpu.memory_space<vmem>>, %arg7: memref<16x32xf32, #tpu.memory_space<vmem>>) attributes {dimension_semantics = [#tpu.dimension_semantics<parallel>, #tpu.dimension_semantics<parallel>, #tpu.dimension_semantics<arbitrary>], iteration_bounds = array<i64: 1, 1, 1>, scalar_prefetch = 0 : i64, scratch_operands = 1 : i64, tpu.core_type = #tpu.core_type<tc>, window_params = [{transform_indices = @transform_0, window_bounds = array<i64: 16, 32>}, {transform_indices = @transform_1, window_bounds = array<i64: 32, 32>}, {transform_indices = @transform_2, window_bounds = array<i64: 16, 32>}, {transform_indices = @transform_3, window_bounds = array<i64: 16, 32>}]} {
    %c0_i32 = arith.constant 0 : i32
    %0 = arith.cmpi eq, %arg2, %c0_i32 : i32
    %1 = arith.extui %0 : i1 to i32
    %c0_i32_0 = arith.constant 0 : i32
    %2 = arith.cmpi ne, %1, %c0_i32_0 : i32
    scf.if %2 {
      %cst_10 = arith.constant 0.000000e+00 : f32
      %14 = vector.broadcast %cst_10 : f32 to vector<16x32xf32>
      %c0_11 = arith.constant 0 : index
      %c0_12 = arith.constant 0 : index
      %15 = vector.load %arg7[%c0_11, %c0_12] : memref<16x32xf32, #tpu.memory_space<vmem>>, vector<16x32xf32>
      tpu.vector_store %arg7[%c0_11, %c0_12], %14 {strides = array<i32>} : memref<16x32xf32, #tpu.memory_space<vmem>>, vector<16x32xf32>,
    } else {
    }
    %c0 = arith.constant 0 : index
    %c0_1 = arith.constant 0 : index
    %3 = vector.load %arg3[%c0, %c0_1] : memref<16x32xf32, #tpu.memory_space<vmem>>, vector<16x32xf32>
    %c0_2 = arith.constant 0 : index
    %c0_3 = arith.constant 0 : index
    %4 = vector.load %arg7[%c0_2, %c0_3] : memref<16x32xf32, #tpu.memory_space<vmem>>, vector<16x32xf32>
    %5 = arith.truncf %3 : vector<16x32xf32> to vector<16x32xbf16>
    %c0_4 = arith.constant 0 : index
    %c0_5 = arith.constant 0 : index
    %6 = vector.load %arg4[%c0_4, %c0_5] : memref<32x32xf32, #tpu.memory_space<vmem>>, vector<32x32xf32>
    %7 = arith.truncf %6 : vector<32x32xf32> to vector<32x32xbf16>
    %cst = arith.constant dense<0.000000e+00> : vector<16x32xf32>
    %8 = tpu.matmul %5, %7, %cst {dimension_numbers = #tpu.dot_dimension_numbers<[1], [0], [0], [1], [0, 0, 1, 1], [], []>} : vector<16x32xbf16>, vector<32x32xbf16>, vector<16x32xf32> -> vector<16x32xf32>
    %9 = arith.addf %4, %8 : vector<16x32xf32>
    %c0_6 = arith.constant 0 : index
    %c0_7 = arith.constant 0 : index
    %10 = vector.load %arg7[%c0_6, %c0_7] : memref<16x32xf32, #tpu.memory_space<vmem>>, vector<16x32xf32>
    tpu.vector_store %arg7[%c0_6, %c0_7], %9 {strides = array<i32>} : memref<16x32xf32, #tpu.memory_space<vmem>>, vector<16x32xf32>,
    %c0_i32_8 = arith.constant 0 : i32
    %11 = arith.cmpi eq, %arg2, %c0_i32_8 : i32
    %12 = arith.extui %11 : i1 to i32
    %c0_i32_9 = arith.constant 0 : i32
    %13 = arith.cmpi ne, %12, %c0_i32_9 : i32
    scf.if %13 {
      %c0_10 = arith.constant 0 : index
      %c0_11 = arith.constant 0 : index
      %14 = vector.load %arg7[%c0_10, %c0_11] : memref<16x32xf32, #tpu.memory_space<vmem>>, vector<16x32xf32>
      %c0_12 = arith.constant 0 : index
      %c0_13 = arith.constant 0 : index
      %15 = vector.load %arg5[%c0_12, %c0_13] : memref<16x32xf32, #tpu.memory_space<vmem>>, vector<16x32xf32>
      %16 = arith.addf %14, %15 : vector<16x32xf32>
      %c0_14 = arith.constant 0 : index
      %c0_15 = arith.constant 0 : index
      %17 = vector.load %arg6[%c0_14, %c0_15] : memref<16x32xf32, #tpu.memory_space<vmem>>, vector<16x32xf32>
      tpu.vector_store %arg6[%c0_14, %c0_15], %16 {strides = array<i32>} : memref<16x32xf32, #tpu.memory_space<vmem>>, vector<16x32xf32>,
    } else {
    }
    return
  }
  func.func @transform_0(%arg0: i32, %arg1: i32, %arg2: i32) -> (i32, i32) {
    %c0_i32 = arith.constant 0 : i32
    return %arg0, %arg2 : i32, i32
  }
  func.func @transform_1(%arg0: i32, %arg1: i32, %arg2: i32) -> (i32, i32) {
    %c0_i32 = arith.constant 0 : i32
    return %arg2, %arg1 : i32, i32
  }
  func.func @transform_2(%arg0: i32, %arg1: i32, %arg2: i32) -> (i32, i32) {
    %c0_i32 = arith.constant 0 : i32
    return %arg0, %arg1 : i32, i32
  }
  func.func @transform_3(%arg0: i32, %arg1: i32, %arg2: i32) -> (i32, i32) {
    %c0_i32 = arith.constant 0 : i32
    return %arg0, %arg1 : i32, i32
  }
}

module attributes {stable_mosaic.version = 11 : i64} {
  func.func @_linear_kernel(%arg0: i32, %arg1: i32, %arg2: i32, %arg3: memref<16x32xf32, #tpu.memory_space<vmem>>, %arg4: memref<32x32xf32, #tpu.memory_space<vmem>>, %arg5: memref<1x32xf32, #tpu.memory_space<vmem>>, %arg6: memref<1x32xf32, #tpu.memory_space<vmem>>, %arg7: memref<1x32xf32, #tpu.memory_space<vmem>>, %arg8: memref<16x32xf32, #tpu.memory_space<vmem>>, %arg9: memref<16x32xf32, #tpu.memory_space<vmem>>) attributes {dimension_semantics = [#tpu.dimension_semantics<parallel>, #tpu.dimension_semantics<parallel>, #tpu.dimension_semantics<arbitrary>], iteration_bounds = array<i64: 1, 1, 1>, scalar_prefetch = 0 : i64, scratch_operands = 1 : i64, tpu.core_type = #tpu.core_type<tc>, window_params = [{transform_indices = @transform_0, window_bounds = array<i64: 16, 32>}, {transform_indices = @transform_1, window_bounds = array<i64: 32, 32>}, {transform_indices = @transform_2, window_bounds = array<i64: 1, 32>}, {transform_indices = @transform_3, window_bounds = array<i64: 1, 32>}, {transform_indices = @transform_4, window_bounds = array<i64: 1, 32>}, {transform_indices = @transform_5, window_bounds = array<i64: 16, 32>}]} {
    %c0_i32 = arith.constant 0 : i32
    %0 = arith.cmpi eq, %arg2, %c0_i32 : i32
    %1 = arith.extui %0 : i1 to i32
    %c0_i32_0 = arith.constant 0 : i32
    %2 = arith.cmpi ne, %1, %c0_i32_0 : i32
    scf.if %2 {
      %cst_19 = arith.constant 0.000000e+00 : f32
      %40 = vector.broadcast %cst_19 : f32 to vector<16x32xf32>
      %c0_20 = arith.constant 0 : index
      %c0_21 = arith.constant 0 : index
      %41 = vector.load %arg9[%c0_20, %c0_21] : memref<16x32xf32, #tpu.memory_space<vmem>>, vector<16x32xf32>
      tpu.vector_store %arg9[%c0_20, %c0_21], %40 {strides = array<i32>} : memref<16x32xf32, #tpu.memory_space<vmem>>, vector<16x32xf32>,
    } else {
    }
    %c0 = arith.constant 0 : index
    %c0_1 = arith.constant 0 : index
    %3 = vector.load %arg3[%c0, %c0_1] : memref<16x32xf32, #tpu.memory_space<vmem>>, vector<16x32xf32>
    %cst = arith.constant dense<0.000000e+00> : vector<16xf32>
    %4 = vector.multi_reduction <add>, %3, %cst [1] : vector<16x32xf32> to vector<16xf32>
    %5 = vector.shape_cast %4 : vector<16xf32> to vector<16x1xf32>
    %cst_2 = arith.constant 3.200000e+01 : f32
    %6 = vector.broadcast %cst_2 : f32 to vector<16x1xf32>
    %7 = arith.divf %5, %6 : vector<16x1xf32>
    %8 = vector.broadcast %7 : vector<16x1xf32> to vector<16x32xf32>
    %9 = arith.subf %3, %8 : vector<16x32xf32>
    %10 = vector.broadcast %7 : vector<16x1xf32> to vector<16x32xf32>
    %11 = arith.subf %3, %10 : vector<16x32xf32>
    %12 = arith.mulf %9, %11 : vector<16x32xf32>
    %cst_3 = arith.constant dense<0.000000e+00> : vector<16xf32>
    %13 = vector.multi_reduction <add>, %12, %cst_3 [1] : vector<16x32xf32> to vector<16xf32>
    %14 = vector.shape_cast %13 : vector<16xf32> to vector<16x1xf32>
    %cst_4 = arith.constant 3.200000e+01 : f32
    %15 = vector.broadcast %cst_4 : f32 to vector<16x1xf32>
    %16 = arith.divf %14, %15 : vector<16x1xf32>
    %17 = vector.broadcast %7 : vector<16x1xf32> to vector<16x32xf32>
    %18 = arith.subf %3, %17 : vector<16x32xf32>
    %cst_5 = arith.constant 9.99999974E-6 : f32
    %19 = vector.broadcast %cst_5 : f32 to vector<16x1xf32>
    %20 = arith.addf %16, %19 : vector<16x1xf32>
    %21 = math.rsqrt %20 : vector<16x1xf32>
    %22 = vector.broadcast %21 : vector<16x1xf32> to vector<16x32xf32>
    %23 = arith.mulf %18, %22 : vector<16x32xf32>
    %c0_6 = arith.constant 0 : index
    %c0_7 = arith.constant 0 : index
    %24 = vector.load %arg5[%c0_6, %c0_7] : memref<1x32xf32, #tpu.memory_space<vmem>>, vector<1x32xf32>
    %25 = vector.broadcast %24 : vector<1x32xf32> to vector<16x32xf32>
    %26 = arith.mulf %23, %25 : vector<16x32xf32>
    %c0_8 = arith.constant 0 : index
    %c0_9 = arith.constant 0 : index
    %27 = vector.load %arg6[%c0_8, %c0_9] : memref<1x32xf32, #tpu.memory_space<vmem>>, vector<1x32xf32>
    %28 = vector.broadcast %27 : vector<1x32xf32> to vector<16x32xf32>
    %29 = arith.addf %26, %28 : vector<16x32xf32>
    %c0_10 = arith.constant 0 : index
    %c0_11 = arith.constant 0 : index
    %30 = vector.load %arg9[%c0_10, %c0_11] : memref<16x32xf32, #tpu.memory_space<vmem>>, vector<16x32xf32>
    %31 = arith.truncf %29 : vector<16x32xf32> to vector<16x32xbf16>
    %c0_12 = arith.constant 0 : index
    %c0_13 = arith.constant 0 : index
    %32 = vector.load %arg4[%c0_12, %c0_13] : memref<32x32xf32, #tpu.memory_space<vmem>>, vector<32x32xf32>
    %33 = arith.truncf %32 : vector<32x32xf32> to vector<32x32xbf16>
    %cst_14 = arith.constant dense<0.000000e+00> : vector<16x32xf32>
    %34 = tpu.matmul %31, %33, %cst_14 {dimension_numbers = #tpu.dot_dimension_numbers<[1], [0], [0], [1], [0, 0, 1, 1], [], []>} : vector<16x32xbf16>, vector<32x32xbf16>, vector<16x32xf32> -> vector<16x32xf32>
    %35 = arith.addf %30, %34 : vector<16x32xf32>
    %c0_15 = arith.constant 0 : index
    %c0_16 = arith.constant 0 : index
    %36 = vector.load %arg9[%c0_15, %c0_16] : memref<16x32xf32, #tpu.memory_space<vmem>>, vector<16x32xf32>
    tpu.vector_store %arg9[%c0_15, %c0_16], %35 {strides = array<i32>} : memref<16x32xf32, #tpu.memory_space<vmem>>, vector<16x32xf32>,
    %c0_i32_17 = arith.constant 0 : i32
    %37 = arith.cmpi eq, %arg2, %c0_i32_17 : i32
    %38 = arith.extui %37 : i1 to i32
    %c0_i32_18 = arith.constant 0 : i32
    %39 = arith.cmpi ne, %38, %c0_i32_18 : i32
    scf.if %39 {
      %c0_19 = arith.constant 0 : index
      %c0_20 = arith.constant 0 : index
      %40 = vector.load %arg9[%c0_19, %c0_20] : memref<16x32xf32, #tpu.memory_space<vmem>>, vector<16x32xf32>
      %c0_21 = arith.constant 0 : index
      %c0_22 = arith.constant 0 : index
      %41 = vector.load %arg7[%c0_21, %c0_22] : memref<1x32xf32, #tpu.memory_space<vmem>>, vector<1x32xf32>
      %42 = vector.broadcast %41 : vector<1x32xf32> to vector<16x32xf32>
      %43 = arith.addf %40, %42 : vector<16x32xf32>
      %c0_23 = arith.constant 0 : index
      %c0_24 = arith.constant 0 : index
      %44 = vector.load %arg8[%c0_23, %c0_24] : memref<16x32xf32, #tpu.memory_space<vmem>>, vector<16x32xf32>
      tpu.vector_store %arg8[%c0_23, %c0_24], %43 {strides = array<i32>} : memref<16x32xf32, #tpu.memory_space<vmem>>, vector<16x32xf32>,
    } else {
    }
    return
  }
  func.func @transform_0(%arg0: i32, %arg1: i32, %arg2: i32) -> (i32, i32) {
    %c0_i32 = arith.constant 0 : i32
    return %arg0, %arg2 : i32, i32
  }
  func.func @transform_1(%arg0: i32, %arg1: i32, %arg2: i32) -> (i32, i32) {
    %c0_i32 = arith.constant 0 : i32
    return %arg2, %arg1 : i32, i32
  }
  func.func @transform_2(%arg0: i32, %arg1: i32, %arg2: i32) -> (i32, i32) {
    %c0_i32 = arith.constant 0 : i32
    %c0_i32_0 = arith.constant 0 : i32
    return %c0_i32, %arg2 : i32, i32
  }
  func.func @transform_3(%arg0: i32, %arg1: i32, %arg2: i32) -> (i32, i32) {
    %c0_i32 = arith.constant 0 : i32
    %c0_i32_0 = arith.constant 0 : i32
    return %c0_i32, %arg2 : i32, i32
  }
  func.func @transform_4(%arg0: i32, %arg1: i32, %arg2: i32) -> (i32, i32) {
    %c0_i32 = arith.constant 0 : i32
    %c0_i32_0 = arith.constant 0 : i32
    return %c0_i32, %arg1 : i32, i32
  }
  func.func @transform_5(%arg0: i32, %arg1: i32, %arg2: i32) -> (i32, i32) {
    %c0_i32 = arith.constant 0 : i32
    return %arg0, %arg1 : i32, i32
  }
}

module attributes {stable_mosaic.version = 11 : i64} {
  func.func @_mha_kernel(%arg0: i32, %arg1: i32, %arg2: memref<1x8x4x8xf32, #tpu.memory_space<vmem>>, %arg3: memref<1x8x4x8xf32, #tpu.memory_space<vmem>>, %arg4: memref<1x8x4x8xf32, #tpu.memory_space<vmem>>, %arg5: memref<8x8xf32, #tpu.memory_space<vmem>>, %arg6: memref<1x8x32xf32, #tpu.memory_space<vmem>>) attributes {dimension_semantics = [#tpu.dimension_semantics<parallel>, #tpu.dimension_semantics<parallel>], iteration_bounds = array<i64: 2, 1>, scalar_prefetch = 0 : i64, scratch_operands = 0 : i64, tpu.core_type = #tpu.core_type<tc>, window_params = [{transform_indices = @transform_0, window_bounds = array<i64: 1, 8, 4, 8>}, {transform_indices = @transform_1, window_bounds = array<i64: 1, 8, 4, 8>}, {transform_indices = @transform_2, window_bounds = array<i64: 1, 8, 4, 8>}, {pipeline_mode = #tpu.pipeline_mode<synchronous>, transform_indices = @transform_3, window_bounds = array<i64: 8, 8>}, {transform_indices = @transform_4, window_bounds = array<i64: 1, 8, 32>}]} {
    %c0 = arith.constant 0 : index
    %c0_0 = arith.constant 0 : index
    %c0_1 = arith.constant 0 : index
    %c0_2 = arith.constant 0 : index
    %0 = vector.load %arg2[%c0, %c0_0, %c0_1, %c0_2] : memref<1x8x4x8xf32, #tpu.memory_space<vmem>>, vector<1x8x4x8xf32>
    %1 = vector.shape_cast %0 : vector<1x8x4x8xf32> to vector<8x4x8xf32>
    %2 = arith.truncf %1 : vector<8x4x8xf32> to vector<8x4x8xbf16>
    %c0_3 = arith.constant 0 : index
    %c0_4 = arith.constant 0 : index
    %c0_5 = arith.constant 0 : index
    %c0_6 = arith.constant 0 : index
    %3 = vector.load %arg3[%c0_3, %c0_4, %c0_5, %c0_6] : memref<1x8x4x8xf32, #tpu.memory_space<vmem>>, vector<1x8x4x8xf32>
    %4 = vector.shape_cast %3 : vector<1x8x4x8xf32> to vector<8x4x8xf32>
    %5 = arith.truncf %4 : vector<8x4x8xf32> to vector<8x4x8xbf16>
    %c0_7 = arith.constant 0 : index
    %c0_8 = arith.constant 0 : index
    %c0_9 = arith.constant 0 : index
    %c0_10 = arith.constant 0 : index
    %6 = vector.load %arg4[%c0_7, %c0_8, %c0_9, %c0_10] : memref<1x8x4x8xf32, #tpu.memory_space<vmem>>, vector<1x8x4x8xf32>
    %7 = vector.shape_cast %6 : vector<1x8x4x8xf32> to vector<8x4x8xf32>
    %8 = arith.truncf %7 : vector<8x4x8xf32> to vector<8x4x8xbf16>
    "tpu.trace_start"() <{level = 10 : i32, message = "tnd,snd->nts"}> : () -> ()
    %cst = arith.constant dense<0.000000e+00> : vector<4x8x8xf32>
    %9 = tpu.matmul %2, %5, %cst {dimension_numbers = #tpu.dot_dimension_numbers<[2], [2], [0], [0], [0, 1, 0, 0, 1, 0], [1], [1]>} : vector<8x4x8xbf16>, vector<8x4x8xbf16>, vector<4x8x8xf32> -> vector<4x8x8xf32>
    "tpu.trace_stop"() : () -> ()
    %cst_11 = arith.constant 0.353553385 : f32
    %10 = vector.broadcast %cst_11 : f32 to vector<4x8x8xf32>
    %11 = arith.mulf %9, %10 : vector<4x8x8xf32>
    %c0_12 = arith.constant 0 : index
    %c0_13 = arith.constant 0 : index
    %12 = vector.load %arg5[%c0_12, %c0_13] : memref<8x8xf32, #tpu.memory_space<vmem>>, vector<8x8xf32>
    %13 = vector.shape_cast %12 : vector<8x8xf32> to vector<1x8x8xf32>
    %14 = vector.broadcast %13 : vector<1x8x8xf32> to vector<4x8x8xf32>
    %15 = arith.addf %11, %14 : vector<4x8x8xf32>
    %cst_14 = arith.constant dense<0xFF800000> : vector<4x8xf32>
    %16 = vector.multi_reduction <maximumf>, %15, %cst_14 [2] : vector<4x8x8xf32> to vector<4x8xf32>
    %17 = vector.shape_cast %16 : vector<4x8xf32> to vector<4x8x1xf32>
    %18 = vector.broadcast %17 : vector<4x8x1xf32> to vector<4x8x8xf32>
    %19 = arith.subf %15, %18 : vector<4x8x8xf32>
    %20 = math.exp %19 : vector<4x8x8xf32>
    %cst_15 = arith.constant dense<0.000000e+00> : vector<4x8xf32>
    %21 = vector.multi_reduction <add>, %20, %cst_15 [2] : vector<4x8x8xf32> to vector<4x8xf32>
    %22 = vector.shape_cast %21 : vector<4x8xf32> to vector<4x8x1xf32>
    %23 = tpu.reciprocal %22 {approx = true} : vector<4x8x1xf32> -> vector<4x8x1xf32>
    %24 = vector.broadcast %23 : vector<4x8x1xf32> to vector<4x8x8xf32>
    %25 = arith.mulf %20, %24 : vector<4x8x8xf32>
    %26 = arith.truncf %25 : vector<4x8x8xf32> to vector<4x8x8xbf16>
    "tpu.trace_start"() <{level = 10 : i32, message = "nts,sne->nte"}> : () -> ()
    %cst_16 = arith.constant dense<0.000000e+00> : vector<4x8x8xf32>
    %27 = tpu.matmul %26, %8, %cst_16 {dimension_numbers = #tpu.dot_dimension_numbers<[2], [0], [1], [2], [0, 0, 0, 1, 1, 2], [0], [1]>} : vector<4x8x8xbf16>, vector<8x4x8xbf16>, vector<4x8x8xf32> -> vector<4x8x8xf32>
    "tpu.trace_stop"() : () -> ()
    %28 = tpu.transpose %27, [1, 0, 2] : vector<4x8x8xf32> -> vector<8x4x8xf32>
    %29 = vector.shape_cast %28 : vector<8x4x8xf32> to vector<8x32xf32>
    %c0_17 = arith.constant 0 : index
    %c0_18 = arith.constant 0 : index
    %c0_19 = arith.constant 0 : index
    %30 = vector.load %arg6[%c0_17, %c0_18, %c0_19] : memref<1x8x32xf32, #tpu.memory_space<vmem>>, vector<1x8x32xf32>
    %31 = vector.shape_cast %30 : vector<1x8x32xf32> to vector<8x32xf32>
    %32 = vector.shape_cast %29 : vector<8x32xf32> to vector<1x8x32xf32>
    tpu.vector_store %arg6[%c0_17, %c0_18, %c0_19], %32 {strides = array<i32>} : memref<1x8x32xf32, #tpu.memory_space<vmem>>, vector<1x8x32xf32>,
    return
  }
  func.func @transform_0(%arg0: i32, %arg1: i32) -> (i32, i32, i32, i32) {
    %c0_i32 = arith.constant 0 : i32
    %c0_i32_0 = arith.constant 0 : i32
    %c0_i32_1 = arith.constant 0 : i32
    return %arg0, %c0_i32, %arg1, %c0_i32_0 : i32, i32, i32, i32
  }
  func.func @transform_1(%arg0: i32, %arg1: i32) -> (i32, i32, i32, i32) {
    %c0_i32 = arith.constant 0 : i32
    %c0_i32_0 = arith.constant 0 : i32
    %c0_i32_1 = arith.constant 0 : i32
    return %arg0, %c0_i32, %arg1, %c0_i32_0 : i32, i32, i32, i32
  }
  func.func @transform_2(%arg0: i32, %arg1: i32) -> (i32, i32, i32, i32) {
    %c0_i32 = arith.constant 0 : i32
    %c0_i32_0 = arith.constant 0 : i32
    %c0_i32_1 = arith.constant 0 : i32
    return %arg0, %c0_i32, %arg1, %c0_i32_0 : i32, i32, i32, i32
  }
  func.func @transform_3(%arg0: i32, %arg1: i32) -> (i32, i32) {
    %c0_i32 = arith.constant 0 : i32
    %c0_i32_0 = arith.constant 0 : i32
    %c0_i32_1 = arith.constant 0 : i32
    return %c0_i32, %c0_i32_0 : i32, i32
  }
  func.func @transform_4(%arg0: i32, %arg1: i32) -> (i32, i32, i32) {
    %c0_i32 = arith.constant 0 : i32
    %c0_i32_0 = arith.constant 0 : i32
    return %arg0, %c0_i32, %arg1 : i32, i32, i32
  }
}

module attributes {stable_mosaic.version = 11 : i64} {
  func.func @_linear_kernel(%arg0: i32, %arg1: i32, %arg2: i32, %arg3: memref<16x32xf32, #tpu.memory_space<vmem>>, %arg4: memref<32x32xf32, #tpu.memory_space<vmem>>, %arg5: memref<1x32xf32, #tpu.memory_space<vmem>>, %arg6: memref<16x32xf32, #tpu.memory_space<vmem>>, %arg7: memref<16x32xf32, #tpu.memory_space<vmem>>, %arg8: memref<16x32xf32, #tpu.memory_space<vmem>>) attributes {dimension_semantics = [#tpu.dimension_semantics<parallel>, #tpu.dimension_semantics<parallel>, #tpu.dimension_semantics<arbitrary>], iteration_bounds = array<i64: 1, 1, 1>, scalar_prefetch = 0 : i64, scratch_operands = 1 : i64, tpu.core_type = #tpu.core_type<tc>, window_params = [{transform_indices = @transform_0, window_bounds = array<i64: 16, 32>}, {transform_indices = @transform_1, window_bounds = array<i64: 32, 32>}, {transform_indices = @transform_2, window_bounds = array<i64: 1, 32>}, {transform_indices = @transform_3, window_bounds = array<i64: 16, 32>}, {transform_indices = @transform_4, window_bounds = array<i64: 16, 32>}]} {
    %c0_i32 = arith.constant 0 : i32
    %0 = arith.cmpi eq, %arg2, %c0_i32 : i32
    %1 = arith.extui %0 : i1 to i32
    %c0_i32_0 = arith.constant 0 : i32
    %2 = arith.cmpi ne, %1, %c0_i32_0 : i32
    scf.if %2 {
      %cst_10 = arith.constant 0.000000e+00 : f32
      %14 = vector.broadcast %cst_10 : f32 to vector<16x32xf32>
      %c0_11 = arith.constant 0 : index
      %c0_12 = arith.constant 0 : index
      %15 = vector.load %arg8[%c0_11, %c0_12] : memref<16x32xf32, #tpu.memory_space<vmem>>, vector<16x32xf32>
      tpu.vector_store %arg8[%c0_11, %c0_12], %14 {strides = array<i32>} : memref<16x32xf32, #tpu.memory_space<vmem>>, vector<16x32xf32>,
    } else {
    }
    %c0 = arith.constant 0 : index
    %c0_1 = arith.constant 0 : index
    %3 = vector.load %arg3[%c0, %c0_1] : memref<16x32xf32, #tpu.memory_space<vmem>>, vector<16x32xf32>
    %c0_2 = arith.constant 0 : index
    %c0_3 = arith.constant 0 : index
    %4 = vector.load %arg8[%c0_2, %c0_3] : memref<16x32xf32, #tpu.memory_space<vmem>>, vector<16x32xf32>
    %5 = arith.truncf %3 : vector<16x32xf32> to vector<16x32xbf16>
    %c0_4 = arith.constant 0 : index
    %c0_5 = arith.constant 0 : index
    %6 = vector.load %arg4[%c0_4, %c0_5] : memref<32x32xf32, #tpu.memory_space<vmem>>, vector<32x32xf32>
    %7 = arith.truncf %6 : vector<32x32xf32> to vector<32x32xbf16>
    %cst = arith.constant dense<0.000000e+00> : vector<16x32xf32>
    %8 = tpu.matmul %5, %7, %cst {dimension_numbers = #tpu.dot_dimension_numbers<[1], [0], [0], [1], [0, 0, 1, 1], [], []>} : vector<16x32xbf16>, vector<32x32xbf16>, vector<16x32xf32> -> vector<16x32xf32>
    %9 = arith.addf %4, %8 : vector<16x32xf32>
    %c0_6 = arith.constant 0 : index
    %c0_7 = arith.constant 0 : index
    %10 = vector.load %arg8[%c0_6, %c0_7] : memref<16x32xf32, #tpu.memory_space<vmem>>, vector<16x32xf32>
    tpu.vector_store %arg8[%c0_6, %c0_7], %9 {strides = array<i32>} : memref<16x32xf32, #tpu.memory_space<vmem>>, vector<16x32xf32>,
    %c0_i32_8 = arith.constant 0 : i32
    %11 = arith.cmpi eq, %arg2, %c0_i32_8 : i32
    %12 = arith.extui %11 : i1 to i32
    %c0_i32_9 = arith.constant 0 : i32
    %13 = arith.cmpi ne, %12, %c0_i32_9 : i32
    scf.if %13 {
      %c0_10 = arith.constant 0 : index
      %c0_11 = arith.constant 0 : index
      %14 = vector.load %arg8[%c0_10, %c0_11] : memref<16x32xf32, #tpu.memory_space<vmem>>, vector<16x32xf32>
      %c0_12 = arith.constant 0 : index
      %c0_13 = arith.constant 0 : index
      %15 = vector.load %arg5[%c0_12, %c0_13] : memref<1x32xf32, #tpu.memory_space<vmem>>, vector<1x32xf32>
      %16 = vector.broadcast %15 : vector<1x32xf32> to vector<16x32xf32>
      %17 = arith.addf %14, %16 : vector<16x32xf32>
      %c0_14 = arith.constant 0 : index
      %c0_15 = arith.constant 0 : index
      %18 = vector.load %arg6[%c0_14, %c0_15] : memref<16x32xf32, #tpu.memory_space<vmem>>, vector<16x32xf32>
      %19 = arith.addf %17, %18 : vector<16x32xf32>
      %c0_16 = arith.constant 0 : index
      %c0_17 = arith.constant 0 : index
      %20 = vector.load %arg7[%c0_16, %c0_17] : memref<16x32xf32, #tpu.memory_space<vmem>>, vector<16x32xf32>
      tpu.vector_store %arg7[%c0_16, %c0_17], %19 {strides = array<i32>} : memref<16x32xf32, #tpu.memory_space<vmem>>, vector<16x32xf32>,
    } else {
    }
    return
  }
  func.func @transform_0(%arg0: i32, %arg1: i32, %arg2: i32) -> (i32, i32) {
    %c0_i32 = arith.constant 0 : i32
    return %arg0, %arg2 : i32, i32
  }
  func.func @transform_1(%arg0: i32, %arg1: i32, %arg2: i32) -> (i32, i32) {
    %c0_i32 = arith.constant 0 : i32
    return %arg2, %arg1 : i32, i32
  }
  func.func @transform_2(%arg0: i32, %arg1: i32, %arg2: i32) -> (i32, i32) {
    %c0_i32 = arith.constant 0 : i32
    %c0_i32_0 = arith.constant 0 : i32
    return %c0_i32, %arg1 : i32, i32
  }
  func.func @transform_3(%arg0: i32, %arg1: i32, %arg2: i32) -> (i32, i32) {
    %c0_i32 = arith.constant 0 : i32
    return %arg0, %arg1 : i32, i32
  }
  func.func @transform_4(%arg0: i32, %arg1: i32, %arg2: i32) -> (i32, i32) {
    %c0_i32 = arith.constant 0 : i32
    return %arg0, %arg1 : i32, i32
  }
}

module attributes {stable_mosaic.version = 11 : i64} {
  func.func @_linear_kernel(%arg0: i32, %arg1: i32, %arg2: i32, %arg3: memref<16x32xf32, #tpu.memory_space<vmem>>, %arg4: memref<32x64xf32, #tpu.memory_space<vmem>>, %arg5: memref<1x64xf32, #tpu.memory_space<vmem>>, %arg6: memref<16x64xf32, #tpu.memory_space<vmem>>, %arg7: memref<16x64xf32, #tpu.memory_space<vmem>>) attributes {dimension_semantics = [#tpu.dimension_semantics<parallel>, #tpu.dimension_semantics<parallel>, #tpu.dimension_semantics<arbitrary>], iteration_bounds = array<i64: 1, 1, 1>, scalar_prefetch = 0 : i64, scratch_operands = 1 : i64, tpu.core_type = #tpu.core_type<tc>, window_params = [{transform_indices = @transform_0, window_bounds = array<i64: 16, 32>}, {transform_indices = @transform_1, window_bounds = array<i64: 32, 64>}, {transform_indices = @transform_2, window_bounds = array<i64: 1, 64>}, {transform_indices = @transform_3, window_bounds = array<i64: 16, 64>}]} {
    %c0_i32 = arith.constant 0 : i32
    %0 = arith.cmpi eq, %arg2, %c0_i32 : i32
    %1 = arith.extui %0 : i1 to i32
    %c0_i32_0 = arith.constant 0 : i32
    %2 = arith.cmpi ne, %1, %c0_i32_0 : i32
    scf.if %2 {
      %cst_10 = arith.constant 0.000000e+00 : f32
      %14 = vector.broadcast %cst_10 : f32 to vector<16x64xf32>
      %c0_11 = arith.constant 0 : index
      %c0_12 = arith.constant 0 : index
      %15 = vector.load %arg7[%c0_11, %c0_12] : memref<16x64xf32, #tpu.memory_space<vmem>>, vector<16x64xf32>
      tpu.vector_store %arg7[%c0_11, %c0_12], %14 {strides = array<i32>} : memref<16x64xf32, #tpu.memory_space<vmem>>, vector<16x64xf32>,
    } else {
    }
    %c0 = arith.constant 0 : index
    %c0_1 = arith.constant 0 : index
    %3 = vector.load %arg3[%c0, %c0_1] : memref<16x32xf32, #tpu.memory_space<vmem>>, vector<16x32xf32>
    %c0_2 = arith.constant 0 : index
    %c0_3 = arith.constant 0 : index
    %4 = vector.load %arg7[%c0_2, %c0_3] : memref<16x64xf32, #tpu.memory_space<vmem>>, vector<16x64xf32>
    %5 = arith.truncf %3 : vector<16x32xf32> to vector<16x32xbf16>
    %c0_4 = arith.constant 0 : index
    %c0_5 = arith.constant 0 : index
    %6 = vector.load %arg4[%c0_4, %c0_5] : memref<32x64xf32, #tpu.memory_space<vmem>>, vector<32x64xf32>
    %7 = arith.truncf %6 : vector<32x64xf32> to vector<32x64xbf16>
    %cst = arith.constant dense<0.000000e+00> : vector<16x64xf32>
    %8 = tpu.matmul %5, %7, %cst {dimension_numbers = #tpu.dot_dimension_numbers<[1], [0], [0], [1], [0, 0, 1, 1], [], []>} : vector<16x32xbf16>, vector<32x64xbf16>, vector<16x64xf32> -> vector<16x64xf32>
    %9 = arith.addf %4, %8 : vector<16x64xf32>
    %c0_6 = arith.constant 0 : index
    %c0_7 = arith.constant 0 : index
    %10 = vector.load %arg7[%c0_6, %c0_7] : memref<16x64xf32, #tpu.memory_space<vmem>>, vector<16x64xf32>
    tpu.vector_store %arg7[%c0_6, %c0_7], %9 {strides = array<i32>} : memref<16x64xf32, #tpu.memory_space<vmem>>, vector<16x64xf32>,
    %c0_i32_8 = arith.constant 0 : i32
    %11 = arith.cmpi eq, %arg2, %c0_i32_8 : i32
    %12 = arith.extui %11 : i1 to i32
    %c0_i32_9 = arith.constant 0 : i32
    %13 = arith.cmpi ne, %12, %c0_i32_9 : i32
    scf.if %13 {
      %c0_10 = arith.constant 0 : index
      %c0_11 = arith.constant 0 : index
      %14 = vector.load %arg7[%c0_10, %c0_11] : memref<16x64xf32, #tpu.memory_space<vmem>>, vector<16x64xf32>
      %c0_12 = arith.constant 0 : index
      %c0_13 = arith.constant 0 : index
      %15 = vector.load %arg5[%c0_12, %c0_13] : memref<1x64xf32, #tpu.memory_space<vmem>>, vector<1x64xf32>
      %16 = vector.broadcast %15 : vector<1x64xf32> to vector<16x64xf32>
      %17 = arith.addf %14, %16 : vector<16x64xf32>
      %c0_14 = arith.constant 0 : index
      %c0_15 = arith.constant 0 : index
      %18 = vector.load %arg6[%c0_14, %c0_15] : memref<16x64xf32, #tpu.memory_space<vmem>>, vector<16x64xf32>
      tpu.vector_store %arg6[%c0_14, %c0_15], %17 {strides = array<i32>} : memref<16x64xf32, #tpu.memory_space<vmem>>, vector<16x64xf32>,
    } else {
    }
    return
  }
  func.func @transform_0(%arg0: i32, %arg1: i32, %arg2: i32) -> (i32, i32) {
    %c0_i32 = arith.constant 0 : i32
    return %arg0, %arg2 : i32, i32
  }
  func.func @transform_1(%arg0: i32, %arg1: i32, %arg2: i32) -> (i32, i32) {
    %c0_i32 = arith.constant 0 : i32
    return %arg2, %arg1 : i32, i32
  }
  func.func @transform_2(%arg0: i32, %arg1: i32, %arg2: i32) -> (i32, i32) {
    %c0_i32 = arith.constant 0 : i32
    %c0_i32_0 = arith.constant 0 : i32
    return %c0_i32, %arg1 : i32, i32
  }
  func.func @transform_3(%arg0: i32, %arg1: i32, %arg2: i32) -> (i32, i32) {
    %c0_i32 = arith.constant 0 : i32
    return %arg0, %arg1 : i32, i32
  }
}

module attributes {stable_mosaic.version = 11 : i64} {
  func.func @_linear_kernel(%arg0: i32, %arg1: i32, %arg2: i32, %arg3: memref<16x32xf32, #tpu.memory_space<vmem>>, %arg4: memref<32x64xf32, #tpu.memory_space<vmem>>, %arg5: memref<1x32xf32, #tpu.memory_space<vmem>>, %arg6: memref<1x32xf32, #tpu.memory_space<vmem>>, %arg7: memref<1x64xf32, #tpu.memory_space<vmem>>, %arg8: memref<16x64xf32, #tpu.memory_space<vmem>>, %arg9: memref<16x64xf32, #tpu.memory_space<vmem>>) attributes {dimension_semantics = [#tpu.dimension_semantics<parallel>, #tpu.dimension_semantics<parallel>, #tpu.dimension_semantics<arbitrary>], iteration_bounds = array<i64: 1, 1, 1>, scalar_prefetch = 0 : i64, scratch_operands = 1 : i64, tpu.core_type = #tpu.core_type<tc>, window_params = [{transform_indices = @transform_0, window_bounds = array<i64: 16, 32>}, {transform_indices = @transform_1, window_bounds = array<i64: 32, 64>}, {transform_indices = @transform_2, window_bounds = array<i64: 1, 32>}, {transform_indices = @transform_3, window_bounds = array<i64: 1, 32>}, {transform_indices = @transform_4, window_bounds = array<i64: 1, 64>}, {transform_indices = @transform_5, window_bounds = array<i64: 16, 64>}]} {
    %c0_i32 = arith.constant 0 : i32
    %0 = arith.cmpi eq, %arg2, %c0_i32 : i32
    %1 = arith.extui %0 : i1 to i32
    %c0_i32_0 = arith.constant 0 : i32
    %2 = arith.cmpi ne, %1, %c0_i32_0 : i32
    scf.if %2 {
      %cst_19 = arith.constant 0.000000e+00 : f32
      %40 = vector.broadcast %cst_19 : f32 to vector<16x64xf32>
      %c0_20 = arith.constant 0 : index
      %c0_21 = arith.constant 0 : index
      %41 = vector.load %arg9[%c0_20, %c0_21] : memref<16x64xf32, #tpu.memory_space<vmem>>, vector<16x64xf32>
      tpu.vector_store %arg9[%c0_20, %c0_21], %40 {strides = array<i32>} : memref<16x64xf32, #tpu.memory_space<vmem>>, vector<16x64xf32>,
    } else {
    }
    %c0 = arith.constant 0 : index
    %c0_1 = arith.constant 0 : index
    %3 = vector.load %arg3[%c0, %c0_1] : memref<16x32xf32, #tpu.memory_space<vmem>>, vector<16x32xf32>
    %cst = arith.constant dense<0.000000e+00> : vector<16xf32>
    %4 = vector.multi_reduction <add>, %3, %cst [1] : vector<16x32xf32> to vector<16xf32>
    %5 = vector.shape_cast %4 : vector<16xf32> to vector<16x1xf32>
    %cst_2 = arith.constant 3.200000e+01 : f32
    %6 = vector.broadcast %cst_2 : f32 to vector<16x1xf32>
    %7 = arith.divf %5, %6 : vector<16x1xf32>
    %8 = vector.broadcast %7 : vector<16x1xf32> to vector<16x32xf32>
    %9 = arith.subf %3, %8 : vector<16x32xf32>
    %10 = vector.broadcast %7 : vector<16x1xf32> to vector<16x32xf32>
    %11 = arith.subf %3, %10 : vector<16x32xf32>
    %12 = arith.mulf %9, %11 : vector<16x32xf32>
    %cst_3 = arith.constant dense<0.000000e+00> : vector<16xf32>
    %13 = vector.multi_reduction <add>, %12, %cst_3 [1] : vector<16x32xf32> to vector<16xf32>
    %14 = vector.shape_cast %13 : vector<16xf32> to vector<16x1xf32>
    %cst_4 = arith.constant 3.200000e+01 : f32
    %15 = vector.broadcast %cst_4 : f32 to vector<16x1xf32>
    %16 = arith.divf %14, %15 : vector<16x1xf32>
    %17 = vector.broadcast %7 : vector<16x1xf32> to vector<16x32xf32>
    %18 = arith.subf %3, %17 : vector<16x32xf32>
    %cst_5 = arith.constant 9.99999974E-6 : f32
    %19 = vector.broadcast %cst_5 : f32 to vector<16x1xf32>
    %20 = arith.addf %16, %19 : vector<16x1xf32>
    %21 = math.rsqrt %20 : vector<16x1xf32>
    %22 = vector.broadcast %21 : vector<16x1xf32> to vector<16x32xf32>
    %23 = arith.mulf %18, %22 : vector<16x32xf32>
    %c0_6 = arith.constant 0 : index
    %c0_7 = arith.constant 0 : index
    %24 = vector.load %arg5[%c0_6, %c0_7] : memref<1x32xf32, #tpu.memory_space<vmem>>, vector<1x32xf32>
    %25 = vector.broadcast %24 : vector<1x32xf32> to vector<16x32xf32>
    %26 = arith.mulf %23, %25 : vector<16x32xf32>
    %c0_8 = arith.constant 0 : index
    %c0_9 = arith.constant 0 : index
    %27 = vector.load %arg6[%c0_8, %c0_9] : memref<1x32xf32, #tpu.memory_space<vmem>>, vector<1x32xf32>
    %28 = vector.broadcast %27 : vector<1x32xf32> to vector<16x32xf32>
    %29 = arith.addf %26, %28 : vector<16x32xf32>
    %c0_10 = arith.constant 0 : index
    %c0_11 = arith.constant 0 : index
    %30 = vector.load %arg9[%c0_10, %c0_11] : memref<16x64xf32, #tpu.memory_space<vmem>>, vector<16x64xf32>
    %31 = arith.truncf %29 : vector<16x32xf32> to vector<16x32xbf16>
    %c0_12 = arith.constant 0 : index
    %c0_13 = arith.constant 0 : index
    %32 = vector.load %arg4[%c0_12, %c0_13] : memref<32x64xf32, #tpu.memory_space<vmem>>, vector<32x64xf32>
    %33 = arith.truncf %32 : vector<32x64xf32> to vector<32x64xbf16>
    %cst_14 = arith.constant dense<0.000000e+00> : vector<16x64xf32>
    %34 = tpu.matmul %31, %33, %cst_14 {dimension_numbers = #tpu.dot_dimension_numbers<[1], [0], [0], [1], [0, 0, 1, 1], [], []>} : vector<16x32xbf16>, vector<32x64xbf16>, vector<16x64xf32> -> vector<16x64xf32>
    %35 = arith.addf %30, %34 : vector<16x64xf32>
    %c0_15 = arith.constant 0 : index
    %c0_16 = arith.constant 0 : index
    %36 = vector.load %arg9[%c0_15, %c0_16] : memref<16x64xf32, #tpu.memory_space<vmem>>, vector<16x64xf32>
    tpu.vector_store %arg9[%c0_15, %c0_16], %35 {strides = array<i32>} : memref<16x64xf32, #tpu.memory_space<vmem>>, vector<16x64xf32>,
    %c0_i32_17 = arith.constant 0 : i32
    %37 = arith.cmpi eq, %arg2, %c0_i32_17 : i32
    %38 = arith.extui %37 : i1 to i32
    %c0_i32_18 = arith.constant 0 : i32
    %39 = arith.cmpi ne, %38, %c0_i32_18 : i32
    scf.if %39 {
      %c0_19 = arith.constant 0 : index
      %c0_20 = arith.constant 0 : index
      %40 = vector.load %arg9[%c0_19, %c0_20] : memref<16x64xf32, #tpu.memory_space<vmem>>, vector<16x64xf32>
      %c0_21 = arith.constant 0 : index
      %c0_22 = arith.constant 0 : index
      %41 = vector.load %arg7[%c0_21, %c0_22] : memref<1x64xf32, #tpu.memory_space<vmem>>, vector<1x64xf32>
      %42 = vector.broadcast %41 : vector<1x64xf32> to vector<16x64xf32>
      %43 = arith.addf %40, %42 : vector<16x64xf32>
      %cst_23 = arith.constant 0.000000e+00 : f32
      %44 = vector.broadcast %cst_23 : f32 to vector<16x64xf32>
      %45 = arith.maximumf %43, %44 : vector<16x64xf32>
      %c0_24 = arith.constant 0 : index
      %c0_25 = arith.constant 0 : index
      %46 = vector.load %arg8[%c0_24, %c0_25] : memref<16x64xf32, #tpu.memory_space<vmem>>, vector<16x64xf32>
      tpu.vector_store %arg8[%c0_24, %c0_25], %45 {strides = array<i32>} : memref<16x64xf32, #tpu.memory_space<vmem>>, vector<16x64xf32>,
    } else {
    }
    return
  }
  func.func @transform_0(%arg0: i32, %arg1: i32, %arg2: i32) -> (i32, i32) {
    %c0_i32 = arith.constant 0 : i32
    return %arg0, %arg2 : i32, i32
  }
  func.func @transform_1(%arg0: i32, %arg1: i32, %arg2: i32) -> (i32, i32) {
    %c0_i32 = arith.constant 0 : i32
    return %arg2, %arg1 : i32, i32
  }
  func.func @transform_2(%arg0: i32, %arg1: i32, %arg2: i32) -> (i32, i32) {
    %c0_i32 = arith.constant 0 : i32
    %c0_i32_0 = arith.constant 0 : i32
    return %c0_i32, %arg2 : i32, i32
  }
  func.func @transform_3(%arg0: i32, %arg1: i32, %arg2: i32) -> (i32, i32) {
    %c0_i32 = arith.constant 0 : i32
    %c0_i32_0 = arith.constant 0 : i32
    return %c0_i32, %arg2 : i32, i32
  }
  func.func @transform_4(%arg0: i32, %arg1: i32, %arg2: i32) -> (i32, i32) {
    %c0_i32 = arith.constant 0 : i32
    %c0_i32_0 = arith.constant 0 : i32
    return %c0_i32, %arg1 : i32, i32
  }
  func.func @transform_5(%arg0: i32, %arg1: i32, %arg2: i32) -> (i32, i32) {
    %c0_i32 = arith.constant 0 : i32
    return %arg0, %arg1 : i32, i32
  }
}

module attributes {stable_mosaic.version = 11 : i64} {
  func.func @_linear_kernel(%arg0: i32, %arg1: i32, %arg2: i32, %arg3: memref<16x64xf32, #tpu.memory_space<vmem>>, %arg4: memref<64x32xf32, #tpu.memory_space<vmem>>, %arg5: memref<1x32xf32, #tpu.memory_space<vmem>>, %arg6: memref<16x32xf32, #tpu.memory_space<vmem>>, %arg7: memref<16x32xf32, #tpu.memory_space<vmem>>, %arg8: memref<16x32xf32, #tpu.memory_space<vmem>>) attributes {dimension_semantics = [#tpu.dimension_semantics<parallel>, #tpu.dimension_semantics<parallel>, #tpu.dimension_semantics<arbitrary>], iteration_bounds = array<i64: 1, 1, 1>, scalar_prefetch = 0 : i64, scratch_operands = 1 : i64, tpu.core_type = #tpu.core_type<tc>, window_params = [{transform_indices = @transform_0, window_bounds = array<i64: 16, 64>}, {transform_indices = @transform_1, window_bounds = array<i64: 64, 32>}, {transform_indices = @transform_2, window_bounds = array<i64: 1, 32>}, {transform_indices = @transform_3, window_bounds = array<i64: 16, 32>}, {transform_indices = @transform_4, window_bounds = array<i64: 16, 32>}]} {
    %c0_i32 = arith.constant 0 : i32
    %0 = arith.cmpi eq, %arg2, %c0_i32 : i32
    %1 = arith.extui %0 : i1 to i32
    %c0_i32_0 = arith.constant 0 : i32
    %2 = arith.cmpi ne, %1, %c0_i32_0 : i32
    scf.if %2 {
      %cst_10 = arith.constant 0.000000e+00 : f32
      %14 = vector.broadcast %cst_10 : f32 to vector<16x32xf32>
      %c0_11 = arith.constant 0 : index
      %c0_12 = arith.constant 0 : index
      %15 = vector.load %arg8[%c0_11, %c0_12] : memref<16x32xf32, #tpu.memory_space<vmem>>, vector<16x32xf32>
      tpu.vector_store %arg8[%c0_11, %c0_12], %14 {strides = array<i32>} : memref<16x32xf32, #tpu.memory_space<vmem>>, vector<16x32xf32>,
    } else {
    }
    %c0 = arith.constant 0 : index
    %c0_1 = arith.constant 0 : index
    %3 = vector.load %arg3[%c0, %c0_1] : memref<16x64xf32, #tpu.memory_space<vmem>>, vector<16x64xf32>
    %c0_2 = arith.constant 0 : index
    %c0_3 = arith.constant 0 : index
    %4 = vector.load %arg8[%c0_2, %c0_3] : memref<16x32xf32, #tpu.memory_space<vmem>>, vector<16x32xf32>
    %5 = arith.truncf %3 : vector<16x64xf32> to vector<16x64xbf16>
    %c0_4 = arith.constant 0 : index
    %c0_5 = arith.constant 0 : index
    %6 = vector.load %arg4[%c0_4, %c0_5] : memref<64x32xf32, #tpu.memory_space<vmem>>, vector<64x32xf32>
    %7 = arith.truncf %6 : vector<64x32xf32> to vector<64x32xbf16>
    %cst = arith.constant dense<0.000000e+00> : vector<16x32xf32>
    %8 = tpu.matmul %5, %7, %cst {dimension_numbers = #tpu.dot_dimension_numbers<[1], [0], [0], [1], [0, 0, 1, 1], [], []>} : vector<16x64xbf16>, vector<64x32xbf16>, vector<16x32xf32> -> vector<16x32xf32>
    %9 = arith.addf %4, %8 : vector<16x32xf32>
    %c0_6 = arith.constant 0 : index
    %c0_7 = arith.constant 0 : index
    %10 = vector.load %arg8[%c0_6, %c0_7] : memref<16x32xf32, #tpu.memory_space<vmem>>, vector<16x32xf32>
    tpu.vector_store %arg8[%c0_6, %c0_7], %9 {strides = array<i32>} : memref<16x32xf32, #tpu.memory_space<vmem>>, vector<16x32xf32>,
    %c0_i32_8 = arith.constant 0 : i32
    %11 = arith.cmpi eq, %arg2, %c0_i32_8 : i32
    %12 = arith.extui %11 : i1 to i32
    %c0_i32_9 = arith.constant 0 : i32
    %13 = arith.cmpi ne, %12, %c0_i32_9 : i32
    scf.if %13 {
      %c0_10 = arith.constant 0 : index
      %c0_11 = arith.constant 0 : index
      %14 = vector.load %arg8[%c0_10, %c0_11] : memref<16x32xf32, #tpu.memory_space<vmem>>, vector<16x32xf32>
      %c0_12 = arith.constant 0 : index
      %c0_13 = arith.constant 0 : index
      %15 = vector.load %arg5[%c0_12, %c0_13] : memref<1x32xf32, #tpu.memory_space<vmem>>, vector<1x32xf32>
      %16 = vector.broadcast %15 : vector<1x32xf32> to vector<16x32xf32>
      %17 = arith.addf %14, %16 : vector<16x32xf32>
      %c0_14 = arith.constant 0 : index
      %c0_15 = arith.constant 0 : index
      %18 = vector.load %arg6[%c0_14, %c0_15] : memref<16x32xf32, #tpu.memory_space<vmem>>, vector<16x32xf32>
      %19 = arith.addf %17, %18 : vector<16x32xf32>
      %c0_16 = arith.constant 0 : index
      %c0_17 = arith.constant 0 : index
      %20 = vector.load %arg7[%c0_16, %c0_17] : memref<16x32xf32, #tpu.memory_space<vmem>>, vector<16x32xf32>
      tpu.vector_store %arg7[%c0_16, %c0_17], %19 {strides = array<i32>} : memref<16x32xf32, #tpu.memory_space<vmem>>, vector<16x32xf32>,
    } else {
    }
    return
  }
  func.func @transform_0(%arg0: i32, %arg1: i32, %arg2: i32) -> (i32, i32) {
    %c0_i32 = arith.constant 0 : i32
    return %arg0, %arg2 : i32, i32
  }
  func.func @transform_1(%arg0: i32, %arg1: i32, %arg2: i32) -> (i32, i32) {
    %c0_i32 = arith.constant 0 : i32
    return %arg2, %arg1 : i32, i32
  }
  func.func @transform_2(%arg0: i32, %arg1: i32, %arg2: i32) -> (i32, i32) {
    %c0_i32 = arith.constant 0 : i32
    %c0_i32_0 = arith.constant 0 : i32
    return %c0_i32, %arg1 : i32, i32
  }
  func.func @transform_3(%arg0: i32, %arg1: i32, %arg2: i32) -> (i32, i32) {
    %c0_i32 = arith.constant 0 : i32
    return %arg0, %arg1 : i32, i32
  }
  func.func @transform_4(%arg0: i32, %arg1: i32, %arg2: i32) -> (i32, i32) {
    %c0_i32 = arith.constant 0 : i32
    return %arg0, %arg1 : i32, i32
  }
}

module attributes {stable_mosaic.version = 11 : i64} {
  func.func @_diff_attn_kernel(%arg0: i32, %arg1: i32, %arg2: memref<1x8x8x4xf32, #tpu.memory_space<vmem>>, %arg3: memref<1x8x8x4xf32, #tpu.memory_space<vmem>>, %arg4: memref<1x8x4x8xf32, #tpu.memory_space<vmem>>, %arg5: memref<8x8xf32, #tpu.memory_space<vmem>>, %arg6: memref<1x8xf32, #tpu.memory_space<vmem>>, %arg7: memref<1x1xf32, #tpu.memory_space<smem>>, %arg8: memref<1x8x32xf32, #tpu.memory_space<vmem>>) attributes {dimension_semantics = [#tpu.dimension_semantics<parallel>, #tpu.dimension_semantics<parallel>], iteration_bounds = array<i64: 2, 1>, scalar_prefetch = 0 : i64, scratch_operands = 0 : i64, tpu.core_type = #tpu.core_type<tc>, window_params = [{transform_indices = @transform_0, window_bounds = array<i64: 1, 8, 8, 4>}, {transform_indices = @transform_1, window_bounds = array<i64: 1, 8, 8, 4>}, {transform_indices = @transform_2, window_bounds = array<i64: 1, 8, 4, 8>}, {pipeline_mode = #tpu.pipeline_mode<synchronous>, transform_indices = @transform_3, window_bounds = array<i64: 8, 8>}, {pipeline_mode = #tpu.pipeline_mode<synchronous>, transform_indices = @transform_4, window_bounds = array<i64: 1, 8>}, {transform_indices = @transform_5, window_bounds = array<i64: 1, 1>}, {transform_indices = @transform_6, window_bounds = array<i64: 1, 8, 32>}]} {
    %c0 = arith.constant 0 : index
    %c0_0 = arith.constant 0 : index
    %0 = memref.load %arg7[%c0, %c0_0] : memref<1x1xf32, #tpu.memory_space<smem>>
    %c0_1 = arith.constant 0 : index
    %c0_2 = arith.constant 0 : index
    %c0_3 = arith.constant 0 : index
    %c0_4 = arith.constant 0 : index
    %1 = vector.load %arg2[%c0_1, %c0_2, %c0_3, %c0_4] : memref<1x8x8x4xf32, #tpu.memory_space<vmem>>, vector<1x8x8x4xf32>
    %2 = vector.shape_cast %1 : vector<1x8x8x4xf32> to vector<8x8x4xf32>
    %3 = arith.truncf %2 : vector<8x8x4xf32> to vector<8x8x4xbf16>
    %c0_5 = arith.constant 0 : index
    %c0_6 = arith.constant 0 : index
    %c0_7 = arith.constant 0 : index
    %c0_8 = arith.constant 0 : index
    %4 = vector.load %arg3[%c0_5, %c0_6, %c0_7, %c0_8] : memref<1x8x8x4xf32, #tpu.memory_space<vmem>>, vector<1x8x8x4xf32>
    %5 = vector.shape_cast %4 : vector<1x8x8x4xf32> to vector<8x8x4xf32>
    %6 = arith.truncf %5 : vector<8x8x4xf32> to vector<8x8x4xbf16>
    %c0_9 = arith.constant 0 : index
    %c0_10 = arith.constant 0 : index
    %c0_11 = arith.constant 0 : index
    %c0_12 = arith.constant 0 : index
    %7 = vector.load %arg4[%c0_9, %c0_10, %c0_11, %c0_12] : memref<1x8x4x8xf32, #tpu.memory_space<vmem>>, vector<1x8x4x8xf32>
    %8 = vector.shape_cast %7 : vector<1x8x4x8xf32> to vector<8x4x8xf32>
    %9 = arith.truncf %8 : vector<8x4x8xf32> to vector<8x4x8xbf16>
    "tpu.trace_start"() <{level = 10 : i32, message = "tnd,snd->nts"}> : () -> ()
    %cst = arith.constant dense<0.000000e+00> : vector<8x8x8xf32>
    %10 = tpu.matmul %3, %6, %cst {dimension_numbers = #tpu.dot_dimension_numbers<[2], [2], [0], [0], [0, 1, 0, 0, 1, 0], [1], [1]>} : vector<8x8x4xbf16>, vector<8x8x4xbf16>, vector<8x8x8xf32> -> vector<8x8x8xf32>
    "tpu.trace_stop"() : () -> ()
    %cst_13 = arith.constant 5.000000e-01 : f32
    %11 = vector.broadcast %cst_13 : f32 to vector<8x8x8xf32>
    %12 = arith.mulf %10, %11 : vector<8x8x8xf32>
    %c0_14 = arith.constant 0 : index
    %c0_15 = arith.constant 0 : index
    %13 = vector.load %arg5[%c0_14, %c0_15] : memref<8x8xf32, #tpu.memory_space<vmem>>, vector<8x8xf32>
    %14 = vector.shape_cast %13 : vector<8x8xf32> to vector<1x8x8xf32>
    %15 = vector.broadcast %14 : vector<1x8x8xf32> to vector<8x8x8xf32>
    %16 = arith.addf %12, %15 : vector<8x8x8xf32>
    %cst_16 = arith.constant dense<0xFF800000> : vector<8x8xf32>
    %17 = vector.multi_reduction <maximumf>, %16, %cst_16 [2] : vector<8x8x8xf32> to vector<8x8xf32>
    %18 = vector.shape_cast %17 : vector<8x8xf32> to vector<8x8x1xf32>
    %19 = vector.broadcast %18 : vector<8x8x1xf32> to vector<8x8x8xf32>
    %20 = arith.subf %16, %19 : vector<8x8x8xf32>
    %21 = math.exp %20 : vector<8x8x8xf32>
    %cst_17 = arith.constant dense<0.000000e+00> : vector<8x8xf32>
    %22 = vector.multi_reduction <add>, %21, %cst_17 [2] : vector<8x8x8xf32> to vector<8x8xf32>
    %23 = vector.shape_cast %22 : vector<8x8xf32> to vector<8x8x1xf32>
    %24 = vector.broadcast %23 : vector<8x8x1xf32> to vector<8x8x8xf32>
    %25 = arith.divf %21, %24 : vector<8x8x8xf32>
    %26 = vector.shape_cast %25 : vector<8x8x8xf32> to vector<4x2x8x8xf32>
    %27 = vector.extract_strided_slice %26 {offsets = [0, 0, 0, 0], sizes = [4, 1, 8, 8], strides = [1, 1, 1, 1]} : vector<4x2x8x8xf32> to vector<4x1x8x8xf32>
    %28 = vector.shape_cast %27 : vector<4x1x8x8xf32> to vector<4x8x8xf32>
    %29 = vector.extract_strided_slice %26 {offsets = [0, 1, 0, 0], sizes = [4, 1, 8, 8], strides = [1, 1, 1, 1]} : vector<4x2x8x8xf32> to vector<4x1x8x8xf32>
    %30 = vector.shape_cast %29 : vector<4x1x8x8xf32> to vector<4x8x8xf32>
    %31 = vector.broadcast %0 : f32 to vector<4x8x8xf32>
    %32 = arith.mulf %31, %30 : vector<4x8x8xf32>
    %33 = arith.subf %28, %32 : vector<4x8x8xf32>
    %34 = arith.truncf %33 : vector<4x8x8xf32> to vector<4x8x8xbf16>
    "tpu.trace_start"() <{level = 10 : i32, message = "hts,she->hte"}> : () -> ()
    %cst_18 = arith.constant dense<0.000000e+00> : vector<4x8x8xf32>
    %35 = tpu.matmul %34, %9, %cst_18 {dimension_numbers = #tpu.dot_dimension_numbers<[2], [0], [1], [2], [0, 0, 0, 1, 1, 2], [0], [1]>} : vector<4x8x8xbf16>, vector<8x4x8xbf16>, vector<4x8x8xf32> -> vector<4x8x8xf32>
    "tpu.trace_stop"() : () -> ()
    %36 = arith.mulf %35, %35 : vector<4x8x8xf32>
    %cst_19 = arith.constant dense<0.000000e+00> : vector<4x8xf32>
    %37 = vector.multi_reduction <add>, %36, %cst_19 [2] : vector<4x8x8xf32> to vector<4x8xf32>
    %38 = vector.shape_cast %37 : vector<4x8xf32> to vector<4x8x1xf32>
    %cst_20 = arith.constant 8.000000e+00 : f32
    %39 = vector.broadcast %cst_20 : f32 to vector<4x8x1xf32>
    %40 = arith.divf %38, %39 : vector<4x8x1xf32>
    %cst_21 = arith.constant 9.99999974E-6 : f32
    %41 = vector.broadcast %cst_21 : f32 to vector<4x8x1xf32>
    %42 = arith.addf %40, %41 : vector<4x8x1xf32>
    %43 = math.rsqrt %42 : vector<4x8x1xf32>
    %44 = vector.broadcast %43 : vector<4x8x1xf32> to vector<4x8x8xf32>
    %45 = arith.mulf %35, %44 : vector<4x8x8xf32>
    %c0_22 = arith.constant 0 : index
    %c0_23 = arith.constant 0 : index
    %46 = vector.load %arg6[%c0_22, %c0_23] : memref<1x8xf32, #tpu.memory_space<vmem>>, vector<1x8xf32>
    %47 = vector.shape_cast %46 : vector<1x8xf32> to vector<1x1x8xf32>
    %48 = vector.broadcast %47 : vector<1x1x8xf32> to vector<4x8x8xf32>
    %49 = arith.mulf %45, %48 : vector<4x8x8xf32>
    %cst_24 = arith.constant 0.644490957 : f32
    %50 = vector.broadcast %cst_24 : f32 to vector<4x8x8xf32>
    %51 = arith.mulf %49, %50 : vector<4x8x8xf32>
    %52 = tpu.transpose %51, [1, 0, 2] : vector<4x8x8xf32> -> vector<8x4x8xf32>
    %53 = vector.shape_cast %52 : vector<8x4x8xf32> to vector<8x32xf32>
    %c0_25 = arith.constant 0 : index
    %c0_26 = arith.constant 0 : index
    %c0_27 = arith.constant 0 : index
    %54 = vector.load %arg8[%c0_25, %c0_26, %c0_27] : memref<1x8x32xf32, #tpu.memory_space<vmem>>, vector<1x8x32xf32>
    %55 = vector.shape_cast %54 : vector<1x8x32xf32> to vector<8x32xf32>
    %56 = vector.shape_cast %53 : vector<8x32xf32> to vector<1x8x32xf32>
    tpu.vector_store %arg8[%c0_25, %c0_26, %c0_27], %56 {strides = array<i32>} : memref<1x8x32xf32, #tpu.memory_space<vmem>>, vector<1x8x32xf32>,
    return
  }
  func.func @transform_0(%arg0: i32, %arg1: i32) -> (i32, i32, i32, i32) {
    %c0_i32 = arith.constant 0 : i32
    %c0_i32_0 = arith.constant 0 : i32
    %c0_i32_1 = arith.constant 0 : i32
    return %arg0, %c0_i32, %arg1, %c0_i32_0 : i32, i32, i32, i32
  }
  func.func @transform_1(%arg0: i32, %arg1: i32) -> (i32, i32, i32, i32) {
    %c0_i32 = arith.constant 0 : i32
    %c0_i32_0 = arith.constant 0 : i32
    %c0_i32_1 = arith.constant 0 : i32
    return %arg0, %c0_i32, %arg1, %c0_i32_0 : i32, i32, i32, i32
  }
  func.func @transform_2(%arg0: i32, %arg1: i32) -> (i32, i32, i32, i32) {
    %c0_i32 = arith.constant 0 : i32
    %c0_i32_0 = arith.constant 0 : i32
    %c0_i32_1 = arith.constant 0 : i32
    return %arg0, %c0_i32, %arg1, %c0_i32_0 : i32, i32, i32, i32
  }
  func.func @transform_3(%arg0: i32, %arg1: i32) -> (i32, i32) {
    %c0_i32 = arith.constant 0 : i32
    %c0_i32_0 = arith.constant 0 : i32
    %c0_i32_1 = arith.constant 0 : i32
    return %c0_i32, %c0_i32_0 : i32, i32
  }
  func.func @transform_4(%arg0: i32, %arg1: i32) -> (i32, i32) {
    %c0_i32 = arith.constant 0 : i32
    %c0_i32_0 = arith.constant 0 : i32
    %c0_i32_1 = arith.constant 0 : i32
    return %c0_i32, %c0_i32_0 : i32, i32
  }
  func.func @transform_5(%arg0: i32, %arg1: i32) -> (i32, i32) {
    %c0_i32 = arith.constant 0 : i32
    %c0_i32_0 = arith.constant 0 : i32
    %c0_i32_1 = arith.constant 0 : i32
    return %c0_i32, %c0_i32_0 : i32, i32
  }
  func.func @transform_6(%arg0: i32, %arg1: i32) -> (i32, i32, i32) {
    %c0_i32 = arith.constant 0 : i32
    %c0_i32_0 = arith.constant 0 : i32
    return %arg0, %c0_i32, %arg1 : i32, i32, i32
  }
}

module attributes {stable_mosaic.version = 11 : i64} {
  func.func @_linear_kernel(%arg0: i32, %arg1: i32, %arg2: i32, %arg3: memref<16x32xf32, #tpu.memory_space<vmem>>, %arg4: memref<32x50xf32, #tpu.memory_space<vmem>>, %arg5: memref<1x32xf32, #tpu.memory_space<vmem>>, %arg6: memref<1x32xf32, #tpu.memory_space<vmem>>, %arg7: memref<1x50xf32, #tpu.memory_space<vmem>>, %arg8: memref<16x50xf32, #tpu.memory_space<vmem>>, %arg9: memref<16x50xf32, #tpu.memory_space<vmem>>) attributes {dimension_semantics = [#tpu.dimension_semantics<parallel>, #tpu.dimension_semantics<parallel>, #tpu.dimension_semantics<arbitrary>], iteration_bounds = array<i64: 1, 1, 1>, scalar_prefetch = 0 : i64, scratch_operands = 1 : i64, tpu.core_type = #tpu.core_type<tc>, window_params = [{transform_indices = @transform_0, window_bounds = array<i64: 16, 32>}, {transform_indices = @transform_1, window_bounds = array<i64: 32, 50>}, {transform_indices = @transform_2, window_bounds = array<i64: 1, 32>}, {transform_indices = @transform_3, window_bounds = array<i64: 1, 32>}, {transform_indices = @transform_4, window_bounds = array<i64: 1, 50>}, {transform_indices = @transform_5, window_bounds = array<i64: 16, 50>}]} {
    %c0_i32 = arith.constant 0 : i32
    %0 = arith.cmpi eq, %arg2, %c0_i32 : i32
    %1 = arith.extui %0 : i1 to i32
    %c0_i32_0 = arith.constant 0 : i32
    %2 = arith.cmpi ne, %1, %c0_i32_0 : i32
    scf.if %2 {
      %cst_19 = arith.constant 0.000000e+00 : f32
      %40 = vector.broadcast %cst_19 : f32 to vector<16x50xf32>
      %c0_20 = arith.constant 0 : index
      %c0_21 = arith.constant 0 : index
      %41 = vector.load %arg9[%c0_20, %c0_21] : memref<16x50xf32, #tpu.memory_space<vmem>>, vector<16x50xf32>
      tpu.vector_store %arg9[%c0_20, %c0_21], %40 {strides = array<i32>} : memref<16x50xf32, #tpu.memory_space<vmem>>, vector<16x50xf32>,
    } else {
    }
    %c0 = arith.constant 0 : index
    %c0_1 = arith.constant 0 : index
    %3 = vector.load %arg3[%c0, %c0_1] : memref<16x32xf32, #tpu.memory_space<vmem>>, vector<16x32xf32>
    %cst = arith.constant dense<0.000000e+00> : vector<16xf32>
    %4 = vector.multi_reduction <add>, %3, %cst [1] : vector<16x32xf32> to vector<16xf32>
    %5 = vector.shape_cast %4 : vector<16xf32> to vector<16x1xf32>
    %cst_2 = arith.constant 3.200000e+01 : f32
    %6 = vector.broadcast %cst_2 : f32 to vector<16x1xf32>
    %7 = arith.divf %5, %6 : vector<16x1xf32>
    %8 = vector.broadcast %7 : vector<16x1xf32> to vector<16x32xf32>
    %9 = arith.subf %3, %8 : vector<16x32xf32>
    %10 = vector.broadcast %7 : vector<16x1xf32> to vector<16x32xf32>
    %11 = arith.subf %3, %10 : vector<16x32xf32>
    %12 = arith.mulf %9, %11 : vector<16x32xf32>
    %cst_3 = arith.constant dense<0.000000e+00> : vector<16xf32>
    %13 = vector.multi_reduction <add>, %12, %cst_3 [1] : vector<16x32xf32> to vector<16xf32>
    %14 = vector.shape_cast %13 : vector<16xf32> to vector<16x1xf32>
    %cst_4 = arith.constant 3.200000e+01 : f32
    %15 = vector.broadcast %cst_4 : f32 to vector<16x1xf32>
    %16 = arith.divf %14, %15 : vector<16x1xf32>
    %17 = vector.broadcast %7 : vector<16x1xf32> to vector<16x32xf32>
    %18 = arith.subf %3, %17 : vector<16x32xf32>
    %cst_5 = arith.constant 9.99999974E-6 : f32
    %19 = vector.broadcast %cst_5 : f32 to vector<16x1xf32>
    %20 = arith.addf %16, %19 : vector<16x1xf32>
    %21 = math.rsqrt %20 : vector<16x1xf32>
    %22 = vector.broadcast %21 : vector<16x1xf32> to vector<16x32xf32>
    %23 = arith.mulf %18, %22 : vector<16x32xf32>
    %c0_6 = arith.constant 0 : index
    %c0_7 = arith.constant 0 : index
    %24 = vector.load %arg5[%c0_6, %c0_7] : memref<1x32xf32, #tpu.memory_space<vmem>>, vector<1x32xf32>
    %25 = vector.broadcast %24 : vector<1x32xf32> to vector<16x32xf32>
    %26 = arith.mulf %23, %25 : vector<16x32xf32>
    %c0_8 = arith.constant 0 : index
    %c0_9 = arith.constant 0 : index
    %27 = vector.load %arg6[%c0_8, %c0_9] : memref<1x32xf32, #tpu.memory_space<vmem>>, vector<1x32xf32>
    %28 = vector.broadcast %27 : vector<1x32xf32> to vector<16x32xf32>
    %29 = arith.addf %26, %28 : vector<16x32xf32>
    %c0_10 = arith.constant 0 : index
    %c0_11 = arith.constant 0 : index
    %30 = vector.load %arg9[%c0_10, %c0_11] : memref<16x50xf32, #tpu.memory_space<vmem>>, vector<16x50xf32>
    %31 = arith.truncf %29 : vector<16x32xf32> to vector<16x32xbf16>
    %c0_12 = arith.constant 0 : index
    %c0_13 = arith.constant 0 : index
    %32 = vector.load %arg4[%c0_12, %c0_13] : memref<32x50xf32, #tpu.memory_space<vmem>>, vector<32x50xf32>
    %33 = arith.truncf %32 : vector<32x50xf32> to vector<32x50xbf16>
    %cst_14 = arith.constant dense<0.000000e+00> : vector<16x50xf32>
    %34 = tpu.matmul %31, %33, %cst_14 {dimension_numbers = #tpu.dot_dimension_numbers<[1], [0], [0], [1], [0, 0, 1, 1], [], []>} : vector<16x32xbf16>, vector<32x50xbf16>, vector<16x50xf32> -> vector<16x50xf32>
    %35 = arith.addf %30, %34 : vector<16x50xf32>
    %c0_15 = arith.constant 0 : index
    %c0_16 = arith.constant 0 : index
    %36 = vector.load %arg9[%c0_15, %c0_16] : memref<16x50xf32, #tpu.memory_space<vmem>>, vector<16x50xf32>
    tpu.vector_store %arg9[%c0_15, %c0_16], %35 {strides = array<i32>} : memref<16x50xf32, #tpu.memory_space<vmem>>, vector<16x50xf32>,
    %c0_i32_17 = arith.constant 0 : i32
    %37 = arith.cmpi eq, %arg2, %c0_i32_17 : i32
    %38 = arith.extui %37 : i1 to i32
    %c0_i32_18 = arith.constant 0 : i32
    %39 = arith.cmpi ne, %38, %c0_i32_18 : i32
    scf.if %39 {
      %c0_19 = arith.constant 0 : index
      %c0_20 = arith.constant 0 : index
      %40 = vector.load %arg9[%c0_19, %c0_20] : memref<16x50xf32, #tpu.memory_space<vmem>>, vector<16x50xf32>
      %c0_21 = arith.constant 0 : index
      %c0_22 = arith.constant 0 : index
      %41 = vector.load %arg7[%c0_21, %c0_22] : memref<1x50xf32, #tpu.memory_space<vmem>>, vector<1x50xf32>
      %42 = vector.broadcast %41 : vector<1x50xf32> to vector<16x50xf32>
      %43 = arith.addf %40, %42 : vector<16x50xf32>
      %c0_23 = arith.constant 0 : index
      %c0_24 = arith.constant 0 : index
      %44 = vector.load %arg8[%c0_23, %c0_24] : memref<16x50xf32, #tpu.memory_space<vmem>>, vector<16x50xf32>
      tpu.vector_store %arg8[%c0_23, %c0_24], %43 {strides = array<i32>} : memref<16x50xf32, #tpu.memory_space<vmem>>, vector<16x50xf32>,
    } else {
    }
    return
  }
  func.func @transform_0(%arg0: i32, %arg1: i32, %arg2: i32) -> (i32, i32) {
    %c0_i32 = arith.constant 0 : i32
    return %arg0, %arg2 : i32, i32
  }
  func.func @transform_1(%arg0: i32, %arg1: i32, %arg2: i32) -> (i32, i32) {
    %c0_i32 = arith.constant 0 : i32
    return %arg2, %arg1 : i32, i32
  }
  func.func @transform_2(%arg0: i32, %arg1: i32, %arg2: i32) -> (i32, i32) {
    %c0_i32 = arith.constant 0 : i32
    %c0_i32_0 = arith.constant 0 : i32
    return %c0_i32, %arg2 : i32, i32
  }
  func.func @transform_3(%arg0: i32, %arg1: i32, %arg2: i32) -> (i32, i32) {
    %c0_i32 = arith.constant 0 : i32
    %c0_i32_0 = arith.constant 0 : i32
    return %c0_i32, %arg2 : i32, i32
  }
  func.func @transform_4(%arg0: i32, %arg1: i32, %arg2: i32) -> (i32, i32) {
    %c0_i32 = arith.constant 0 : i32
    %c0_i32_0 = arith.constant 0 : i32
    return %c0_i32, %arg1 : i32, i32
  }
  func.func @transform_5(%arg0: i32, %arg1: i32, %arg2: i32) -> (i32, i32) {
    %c0_i32 = arith.constant 0 : i32
    return %arg0, %arg1 : i32, i32
  }
}

</mosaic_0001>

<bundles_post_ra>
// kernel: decoder_forward.19
= control target key start
LH: loop header
LB: loop body
LE: loop exit
PB: predicated region body
PF: predicated region fallthrough
CT: control target
= control target key end

     0   :  { %vm27_vm0 = vcmask 261120   ;;  %v162_v17 = vmov 0.0   ;;  %vm163_vm1 = vmmov 0   ;;  %vm22_vm2 = vcmask 785408   ;;  %s230_s0 = inlined_call_operand.vmem [shape: f32[16,32], index: 0, kind: input, shape index: {}]   ;;  %s231_s1 = inlined_call_operand.vmem [shape: f32[32,96], index: 1, kind: input, shape index: {}]   ;;  %s232_s2 = inlined_call_operand.vmem [shape: f32[1,32], index: 2, kind: input, shape index: {}]   ;;  %s233_s3 = inlined_call_operand.vmem [shape: f32[1,32], index: 3, kind: input, shape index: {}]   ;;  %s234_s4 = inlined_call_operand.vmem [shape: f32[16,96], index: 4, kind: output, shape index: {}]  }
   0x1   :  { %v25_v0 = vld [vmem:[%s230_s0] sm:$0xff]  ;;  %v26_v1 = vld [vmem:[%s230_s0 + $0x8] sm:$0xff]  ;;  %148 = vmatprep.subr.bf16.mxu0 %v162_v17  ;;  %v78_v18 = vld [vmem:[%s231_s1 + $0x10] sm:$0xff]  ;;  %152 = vmatprep.mubr.msk.bf16.mxu0 %vm163_vm1, %v162_v17  ;;  %23 = vst.msk [vmem:[#allocation2] sm:$0xff] %vm22_vm2, %v162_v17 }
   0x2   :  { %v28_v2 = vsel %vm27_vm0, %v25_v0, 0.0  ;;  %v31_v3 = vsel %vm27_vm0, %v26_v1, 0.0  ;;  %v76_v14 = vld [vmem:[%s231_s1] sm:$0xff]  ;;  %v77_v15 = vld [vmem:[%s231_s1 + $0x8] sm:$0xff]  ;;  %v79_v19 = vld [vmem:[%s231_s1 + $0x18] sm:$0xff]  ;;  %24 = vst.msk [vmem:[#allocation2 + $0x8] sm:$0xff] %vm22_vm2, %v162_v17 }
   0x3   :  { %29 = vadd.xlane.f32.xlu0 %v28_v2  ;;  %v80_v16 = vpack.c.bf16 %v77_v15, %v76_v14  ;;  %v81_v20 = vpack.c.bf16 %v79_v19, %v78_v18  ;;  %v142_v29 = vld [vmem:[%s232_s2] ss:$0 sm:$0xff] }
   0x4   :  { %v143_v33 = vld [vmem:[%s233_s3] ss:$0 sm:$0xff] }
   0x5   :  { %149 = vmatpush3.bf16.msra.mxu0 %v80_v16 }
   0x6   :  { %150 = vmatprep.subr.bf16.mxu0 %v162_v17 }
   0x7   :  { %32 = vadd.xlane.f32.xlu0 %v31_v3 }
   0x8   :  { %v73_v38 = vld [vmem:[#allocation2] sm:$0xff] }
   0x9   :  { %151 = vmatpush3.bf16.msra.mxu0 %v81_v20  ;;  %v74_v40 = vld [vmem:[#allocation2 + $0x8] sm:$0xff] }
  0x90   :  { %v30_v4 = vpop.xlane.xlu0 %29 }
  0x91   :  { %v35_v5 = vmul.f32 0.03125, %v30_v4 }
  0x93   :  { %v37_v6 = vsub.f32 %v25_v0, %v35_v5 }
  0x94   :  { %v33_v7 = vpop.xlane.xlu0 %32 }
  0x95   :  { %v36_v8 = vmul.f32 0.03125, %v33_v7  ;;  %v39_v9 = vmul.f32 %v37_v6, %v37_v6 }
  0x97   :  { %v38_v10 = vsub.f32 %v26_v1, %v36_v8  ;;  %v41_v11 = vsel %vm27_vm0, %v39_v9, 0.0 }
  0x98   :  { %42 = vadd.xlane.f32.xlu1 %v41_v11 }
  0x99   :  { %v40_v12 = vmul.f32 %v38_v10, %v38_v10 }
  0x9b   :  { %v44_v13 = vsel %vm27_vm0, %v40_v12, 0.0 }
  0x9c   :  { %45 = vadd.xlane.f32.xlu1 %v44_v13 }
 0x125   :  { %v43_v21 = vpop.xlane.xlu1 %42 }
 0x126   :  { %v47_v22 = vmul.f32 0.03125, %v43_v21 }
 0x128   :  { %v49_v23 = vadd.f32 1e-05, %v47_v22 }
 0x129   :  { %v46_v24 = vpop.xlane.xlu1 %45 }
 0x12a   :  { %158 = vrsqrt.f32 %v49_v23  ;;  %v48_v25 = vmul.f32 0.03125, %v46_v24 }
 0x12c   :  { %v50_v26 = vadd.f32 1e-05, %v48_v25 }
 0x12e   :  { %160 = vrsqrt.f32 %v50_v26 }
 0x134   :  { %v159_v27 = vpop.eup %158 }
 0x135   :  { %v53_v28 = vmul.f32 %v159_v27, %v37_v6 }
 0x137   :  { %v62_v32 = vmul.f32 %v142_v29, %v53_v28 }
 0x138   :  { %v161_v30 = vpop.eup %160 }
 0x139   :  { %v54_v31 = vmul.f32 %v161_v30, %v38_v10  ;;  %v71_v35 = vadd.f32 %v143_v33, %v62_v32 }
 0x13b   :  { %v63_v34 = vmul.f32 %v142_v29, %v54_v31 }
 0x13d   :  { %v72_v36 = vadd.f32 %v143_v33, %v63_v34 }
 0x13f   :  { %v75_v37 = vpack.c.bf16 %v72_v36, %v71_v35 }
 0x141   :  { %153 = vmatmul.mubr.msk.bf16.vlgmr.msra.gmra.mrb[0].mxu0 %vm27_vm0, %v75_v37 }
 0x214   :  { %v119_v39 = vpop.f32.mrb[0].mxu0 }
 0x215   :  { %v126_v41 = vadd.f32 %v119_v39, %v73_v38  ;;  %v154_v42 = vpop.f32.mrb[1].mxu0 }
 0x216   :  { %v122_v43 = vpop.f32.mrb[2].mxu0 }
 0x217   :  { %129 = vst.msk [vmem:[#allocation2] sm:$0xff] %vm22_vm2, %v126_v41  ;;  %v127_v44 = vadd.f32 %v122_v43, %v74_v40  ;;  %v155_v45 = vpop.f32.mrb[3].mxu0 }
 0x219   :  { %130 = vst.msk [vmem:[#allocation2 + $0x8] sm:$0xff] %vm22_vm2, %v127_v44 }
 0x21e   :  { %v134_v46 = vld [vmem:[#allocation2] sm:$0xff] }
 0x21f   :  { %136 = vst.msk [vmem:[%s234_s4] sm:$0xff] %vm22_vm2, %v134_v46 }
 0x220   :  { %v135_v47 = vld [vmem:[#allocation2 + $0x8] sm:$0xff] }
 0x221   :  { %137 = vst.msk [vmem:[%s234_s4 + $0x8] sm:$0xff] %vm22_vm2, %v135_v47 }

// kernel: decoder_forward.21
= control target key start
LH: loop header
LB: loop body
LE: loop exit
PB: predicated region body
PF: predicated region fallthrough
CT: control target
= control target key end

     0   :  { %vm19_vm0 = vcmask 261120   ;;  %v111_v0 = vmov 0.0   ;;  %vm112_vm1 = vmmov 0   ;;  %s170_s1 = inlined_call_operand.vmem [shape: f32[32,32], index: 1, kind: input, shape index: {}]   ;;  %s171_s0 = inlined_call_operand.vmem [shape: f32[16,32], index: 0, kind: input, shape index: {}]   ;;  %s172_s2 = inlined_call_operand.vmem [shape: f32[16,32], index: 2, kind: input, shape index: {}]   ;;  %s173_s3 = inlined_call_operand.vmem [shape: f32[16,32], index: 3, kind: output, shape index: {}]  }
   0x1   :  { %101 = vmatprep.subr.bf16.mxu0 %v111_v0  ;;  %v27_v1 = vld [vmem:[%s170_s1] sm:$0xff]  ;;  %v28_v2 = vld [vmem:[%s170_s1 + $0x8] sm:$0xff]  ;;  %v29_v3 = vld [vmem:[%s170_s1 + $0x10] sm:$0xff]  ;;  %105 = vmatprep.mubr.msk.bf16.mxu0 %vm112_vm1, %v111_v0  ;;  %20 = vst.msk [vmem:[#allocation2] sm:$0xff] %vm19_vm0, %v111_v0 }
   0x2   :  { %21 = vst.msk [vmem:[#allocation2 + $0x8] sm:$0xff] %vm19_vm0, %v111_v0  ;;  %v31_v4 = vpack.c.bf16 %v28_v2, %v27_v1  ;;  %v30_v5 = vld [vmem:[%s170_s1 + $0x18] sm:$0xff]  ;;  %v22_v7 = vld [vmem:[%s171_s0] sm:$0xff]  ;;  %v23_v8 = vld [vmem:[%s171_s0 + $0x8] sm:$0xff] }
   0x3   :  { %v32_v6 = vpack.c.bf16 %v30_v5, %v29_v3  ;;  %v26_v9 = vpack.c.bf16 %v23_v8, %v22_v7  ;;  %v87_v18 = vld [vmem:[%s172_s2] sm:$0xff]  ;;  %v88_v20 = vld [vmem:[%s172_s2 + $0x8] sm:$0xff] }
   0x4   :  { %102 = vmatpush3.bf16.msra.mxu0 %v31_v4 }
   0x5   :  { %103 = vmatprep.subr.bf16.mxu0 %v111_v0 }
   0x8   :  { %104 = vmatpush3.bf16.msra.mxu0 %v32_v6  ;;  %v24_v10 = vld [vmem:[#allocation2] sm:$0xff] }
   0x9   :  { %v25_v12 = vld [vmem:[#allocation2 + $0x8] sm:$0xff] }
   0xb   :  { %106 = vmatmul.mubr.msk.bf16.vlgmr.msra.gmra.mrb[0].mxu0 %vm19_vm0, %v26_v9 }
  0xde   :  { %v71_v11 = vpop.f32.mrb[0].mxu0 }
  0xdf   :  { %v78_v13 = vadd.f32 %v71_v11, %v24_v10  ;;  %v107_v14 = vpop.f32.mrb[1].mxu0 }
  0xe0   :  { %v74_v15 = vpop.f32.mrb[2].mxu0 }
  0xe1   :  { %80 = vst.msk [vmem:[#allocation2] sm:$0xff] %vm19_vm0, %v78_v13  ;;  %v79_v16 = vadd.f32 %v74_v15, %v25_v12  ;;  %v108_v17 = vpop.f32.mrb[3].mxu0 }
  0xe3   :  { %81 = vst.msk [vmem:[#allocation2 + $0x8] sm:$0xff] %vm19_vm0, %v79_v16 }
  0xe8   :  { %v85_v19 = vld [vmem:[#allocation2] sm:$0xff] }
  0xe9   :  { %v89_v21 = vadd.f32 %v87_v18, %v85_v19 }
  0xea   :  { %v86_v22 = vld [vmem:[#allocation2 + $0x8] sm:$0xff] }
  0xeb   :  { %91 = vst.msk [vmem:[%s173_s3] sm:$0xff] %vm19_vm0, %v89_v21  ;;  %v90_v23 = vadd.f32 %v88_v20, %v86_v22 }
  0xed   :  { %92 = vst.msk [vmem:[%s173_s3 + $0x8] sm:$0xff] %vm19_vm0, %v90_v23 }

// kernel: decoder_forward.22
= control target key start
LH: loop header
LB: loop body
LE: loop exit
PB: predicated region body
PF: predicated region fallthrough
CT: control target
= control target key end

     0   :  { %vm25_vm0 = vcmask 261120   ;;  %v174_v17 = vmov 0.0   ;;  %vm175_vm1 = vmmov 0   ;;  %s250_s0 = inlined_call_operand.vmem [shape: f32[16,32], index: 0, kind: input, shape index: {}]   ;;  %s251_s1 = inlined_call_operand.vmem [shape: f32[32,32], index: 1, kind: input, shape index: {}]   ;;  %s252_s2 = inlined_call_operand.vmem [shape: f32[1,32], index: 2, kind: input, shape index: {}]   ;;  %s253_s3 = inlined_call_operand.vmem [shape: f32[1,32], index: 3, kind: input, shape index: {}]   ;;  %s254_s4 = inlined_call_operand.vmem [shape: f32[1,32], index: 4, kind: input, shape index: {}]   ;;  %s255_s5 = inlined_call_operand.vmem [shape: f32[16,32], index: 5, kind: output, shape index: {}]  }
   0x1   :  { %v28_v0 = vld [vmem:[%s250_s0] sm:$0xff]  ;;  %v29_v1 = vld [vmem:[%s250_s0 + $0x8] sm:$0xff]  ;;  %160 = vmatprep.subr.bf16.mxu0 %v174_v17  ;;  %26 = vst.msk [vmem:[#allocation2] sm:$0xff] %vm25_vm0, %v174_v17  ;;  %27 = vst.msk [vmem:[#allocation2 + $0x8] sm:$0xff] %vm25_vm0, %v174_v17  ;;  %164 = vmatprep.mubr.msk.bf16.mxu0 %vm175_vm1, %v174_v17 }
   0x2   :  { %v31_v2 = vsel %vm25_vm0, %v28_v0, 0.0  ;;  %v34_v3 = vsel %vm25_vm0, %v29_v1, 0.0  ;;  %v79_v14 = vld [vmem:[%s251_s1] sm:$0xff]  ;;  %v80_v15 = vld [vmem:[%s251_s1 + $0x8] sm:$0xff]  ;;  %v81_v18 = vld [vmem:[%s251_s1 + $0x10] sm:$0xff] }
   0x3   :  { %32 = vadd.xlane.f32.xlu0 %v31_v2  ;;  %v83_v16 = vpack.c.bf16 %v80_v15, %v79_v14  ;;  %v82_v19 = vld [vmem:[%s251_s1 + $0x18] sm:$0xff]  ;;  %v153_v29 = vld [vmem:[%s252_s2] ss:$0 sm:$0xff] }
   0x4   :  { %v84_v20 = vpack.c.bf16 %v82_v19, %v81_v18  ;;  %v154_v33 = vld [vmem:[%s253_s3] ss:$0 sm:$0xff] }
   0x5   :  { %161 = vmatpush3.bf16.msra.mxu0 %v83_v16  ;;  %v156_v46 = vld [vmem:[%s254_s4] ss:$0 sm:$0xff] }
   0x6   :  { %162 = vmatprep.subr.bf16.mxu0 %v174_v17 }
   0x7   :  { %35 = vadd.xlane.f32.xlu0 %v34_v3 }
   0x8   :  { %v76_v38 = vld [vmem:[#allocation2] sm:$0xff]  ;;  %v77_v40 = vld [vmem:[#allocation2 + $0x8] sm:$0xff] }
   0x9   :  { %163 = vmatpush3.bf16.msra.mxu0 %v84_v20 }
  0x90   :  { %v33_v4 = vpop.xlane.xlu0 %32 }
  0x91   :  { %v38_v5 = vmul.f32 0.03125, %v33_v4 }
  0x93   :  { %v40_v6 = vsub.f32 %v28_v0, %v38_v5 }
  0x94   :  { %v36_v7 = vpop.xlane.xlu0 %35 }
  0x95   :  { %v39_v8 = vmul.f32 0.03125, %v36_v7  ;;  %v42_v9 = vmul.f32 %v40_v6, %v40_v6 }
  0x97   :  { %v41_v10 = vsub.f32 %v29_v1, %v39_v8  ;;  %v44_v11 = vsel %vm25_vm0, %v42_v9, 0.0 }
  0x98   :  { %45 = vadd.xlane.f32.xlu1 %v44_v11 }
  0x99   :  { %v43_v12 = vmul.f32 %v41_v10, %v41_v10 }
  0x9b   :  { %v47_v13 = vsel %vm25_vm0, %v43_v12, 0.0 }
  0x9c   :  { %48 = vadd.xlane.f32.xlu1 %v47_v13 }
 0x125   :  { %v46_v21 = vpop.xlane.xlu1 %45 }
 0x126   :  { %v50_v22 = vmul.f32 0.03125, %v46_v21 }
 0x128   :  { %v52_v23 = vadd.f32 1e-05, %v50_v22 }
 0x129   :  { %v49_v24 = vpop.xlane.xlu1 %48 }
 0x12a   :  { %170 = vrsqrt.f32 %v52_v23  ;;  %v51_v25 = vmul.f32 0.03125, %v49_v24 }
 0x12c   :  { %v53_v26 = vadd.f32 1e-05, %v51_v25 }
 0x12e   :  { %172 = vrsqrt.f32 %v53_v26 }
 0x134   :  { %v171_v27 = vpop.eup %170 }
 0x135   :  { %v56_v28 = vmul.f32 %v171_v27, %v40_v6 }
 0x137   :  { %v65_v32 = vmul.f32 %v153_v29, %v56_v28 }
 0x138   :  { %v173_v30 = vpop.eup %172 }
 0x139   :  { %v57_v31 = vmul.f32 %v173_v30, %v41_v10  ;;  %v74_v35 = vadd.f32 %v154_v33, %v65_v32 }
 0x13b   :  { %v66_v34 = vmul.f32 %v153_v29, %v57_v31 }
 0x13d   :  { %v75_v36 = vadd.f32 %v154_v33, %v66_v34 }
 0x13f   :  { %v78_v37 = vpack.c.bf16 %v75_v36, %v74_v35 }
 0x141   :  { %165 = vmatmul.mubr.msk.bf16.vlgmr.msra.gmra.mrb[0].mxu0 %vm25_vm0, %v78_v37 }
 0x214   :  { %v122_v39 = vpop.f32.mrb[0].mxu0 }
 0x215   :  { %v129_v41 = vadd.f32 %v122_v39, %v76_v38  ;;  %v166_v42 = vpop.f32.mrb[1].mxu0 }
 0x216   :  { %v125_v43 = vpop.f32.mrb[2].mxu0 }
 0x217   :  { %131 = vst.msk [vmem:[#allocation2] sm:$0xff] %vm25_vm0, %v129_v41  ;;  %v130_v44 = vadd.f32 %v125_v43, %v77_v40  ;;  %v167_v45 = vpop.f32.mrb[3].mxu0 }
 0x219   :  { %132 = vst.msk [vmem:[#allocation2 + $0x8] sm:$0xff] %vm25_vm0, %v130_v44 }
 0x21e   :  { %v136_v47 = vld [vmem:[#allocation2] sm:$0xff] }
 0x21f   :  { %v145_v48 = vadd.f32 %v156_v46, %v136_v47 }
 0x220   :  { %v137_v49 = vld [vmem:[#allocation2 + $0x8] sm:$0xff] }
 0x221   :  { %147 = vst.msk [vmem:[%s255_s5] sm:$0xff] %vm25_vm0, %v145_v48  ;;  %v146_v50 = vadd.f32 %v156_v46, %v137_v49 }
 0x223   :  { %148 = vst.msk [vmem:[%s255_s5 + $0x8] sm:$0xff] %vm25_vm0, %v146_v50 }

// kernel: decoder_forward.20
= control target key start
LH: loop header
LB: loop body
LE: loop exit
PB: predicated region body
PF: predicated region fallthrough
CT: control target
= control target key end

     0   :  { %s2162_s23 = smov 0   ;;  %s2164_s24 = smov 0   ;;  %s2405_s0 = inlined_call_operand.vmem [shape: f32[2,8,8,4], index: 0, kind: input, shape index: {}]   ;;  %s2406_s1 = inlined_call_operand.vmem [shape: f32[2,8,8,4], index: 1, kind: input, shape index: {}]   ;;  %s2407_s2 = inlined_call_operand.vmem [shape: f32[2,8,4,8], index: 2, kind: input, shape index: {}]   ;;  %s2408_s3 = inlined_call_operand.vmem [shape: f32[8,8], index: 3, kind: input, shape index: {}]   ;;  %s2409_s4 = inlined_call_operand.vmem [shape: f32[1,8], index: 4, kind: input, shape index: {}]   ;;  %s2410_s5 = inlined_call_operand.<no memory space> [shape: f32[1,1], index: 5, kind: input, shape index: {}]   ;;  %s2411_s6 = inlined_call_operand.vmem [shape: f32[2,8,32], index: 6, kind: output, shape index: {}]  }
   0x1   :  { %11 = sst [smem:[#allocation2]] %s2410_s5  ;;  %s2166_s25 = smov 0  }
   0x2 LB: > { %s29_s5 = sadd.s32 1, %s2110_s24  ;;  %p1888_p0 = scmp.ge.s32.totalorder %s2114_s25, 1  ;;  %s2114_s25 = sphi %s2166_s25, %s17_s25   ;;  %s2110_s24 = sphi %s2164_s24, %s2413_s24   ;;  %s2106_s23 = sphi %s2162_s23, %s2412_s23  }
   0x3   : > { %p31_p1 = scmp.ge.s32.totalorder %s29_s5, 2  ;;  %p262_p2 = scmp.lt.s32.totalorder %s2114_s25, 3 }
   0x5   : > { %s2415_s5 = smov (%p31_p1, %s29_s5), 0  ;;  %p263_p3 = pnand %p1888_p0, %p262_p2 }
   0x6   : > { %p313_p4 = scmp.lt.s32.totalorder (!%p263_p3), %s2106_s23, 1  ;;  %v2116_v18 = vmov (!%p263_p3), 1983009808   ;;  %v398_v20 = vlaneseq (!%p263_p3)  ;;  %v2117_v23 = vmov (!%p263_p3), 1934713408   ;;  %v2118_v29 = vmov (!%p263_p3), 0.0  }
   0x7   : > { %266 = sbr.rel (%p263_p3) target bundleno = 1347 (0x543), region = 44  ;;  %v396_v19 = vunpack.c.l.s4 (!%p263_p3), %v2116_v18  ;;  %v413_v24 = vunpack.c.l.s4 (!%p263_p3), %v2117_v23  ;;  %1948 = vmatprep.subr.bf16.mxu0 (!%p263_p3), %v2118_v29  ;;  %1954 = vmatprep.subr.bf16.mxu1 (!%p263_p3), %v2118_v29  ;;  %vm2119_vm0 = vmmov (!%p263_p3), 0   ;;  %v2120_v50 = vmov (!%p263_p3), 0   ;;  %s345_s15 = sld [smem:[#allocation2]] (!%p263_p3) }
   0x8   : > { %v399_v26 = vshrl.u32 (!%p263_p3), %v398_v20, 7  ;;  %1950 = vmatprep.mubr.msk.bf16.mxu0 (!%p263_p3), %vm2119_vm0, %v2118_v29  ;;  %1956 = vmatprep.mubr.msk.bf16.mxu1 (!%p263_p3), %vm2119_vm0, %v2118_v29  ;;  %vm836_vm1 = vcmask (!%p263_p3), 1041408   ;;  %vm832_vm2 = vcmask (!%p263_p3), 31744   ;;  %vm1219_vm3 = vcmask (!%p263_p3), 64512   ;;  %s2121_s18 = smov (!%p263_p3), 16   ;;  %s2122_s19 = smov (!%p263_p3), 8  }
   0x9   : > { %v397_v25 = vunpack.c.0.s8 (!%p263_p3), %v396_v19  ;;  %v414_v30 = vunpack.c.0.s8 (!%p263_p3), %v413_v24  ;;  %vm1386_vm4 = vcmask (!%p263_p3), 1043456   ;;  %s2123_s20 = smov (!%p263_p3), 24   ;;  %vm1765_vm5 = vcmask (!%p263_p3), 130048  }
   0xa   : > { %vm1767_vm6 = vcmask (!%p263_p3), 195584   ;;  %vm1769_vm7 = vcmask (!%p263_p3), 261120  }
   0xb   : > { %v2190_v31 = vsub.s32 (!%p263_p3), %v397_v25, %v399_v26  ;;  %v2192_v38 = vsub.s32 (!%p263_p3), %v414_v30, %v399_v26 }
   0xe   : > { %s2417_s23 = smov (!%p313_p4, %s2106_s23), 1 }
   0xf   : > { %s1921_s26 = sshll.u32 %s2417_s23, 6  ;;  %s1923_s11 = sshll.u32 %s2417_s23, 5 }
  0x10   : > { %s328_s29 = scalar_lea.vmem %s2406_s1, %s1921_s26  ;;  %s320_s8 = scalar_lea.vmem %s2405_s0, %s1921_s26 }
  0x11   : > { %v364_v0 = vld [vmem:[%s328_s29 + $0x10] sm:$0xff]  ;;  %v362_v1 = vld [vmem:[%s328_s29] sm:$0xff]  ;;  %v365_v2 = vld [vmem:[%s328_s29 + $0x18] sm:$0xff]  ;;  %s336_s14 = scalar_lea.vmem %s2407_s2, %s1923_s11  ;;  %s1895_s21 = sshll.u32 %s2417_s23, 3 }
  0x12   : > { %v372_v3 = vpack.c.bf16 %v364_v0, %v364_v0  ;;  %v370_v4 = vpack.c.bf16 %v362_v1, %v362_v1  ;;  %v363_v5 = vld [vmem:[%s328_s29 + $0x8] sm:$0xff]  ;;  %v373_v6 = vpack.c.bf16 %v365_v2, %v365_v2  ;;  %v366_v9 = vld [vmem:[%s328_s29 + $0x20] sm:$0xff]  ;;  %v369_v12 = vld [vmem:[%s328_s29 + $0x38] sm:$0xff]  ;;  %s343_s27 = scalar_lea.vmem %s2411_s6, %s1895_s21 }
  0x13   : > { %v371_v7 = vpack.c.bf16 %v363_v5, %v363_v5  ;;  %v367_v8 = vld [vmem:[%s328_s29 + $0x28] sm:$0xff]  ;;  %v374_v11 = vpack.c.bf16 %v366_v9, %v366_v9  ;;  %v368_v13 = vld [vmem:[%s328_s29 + $0x30] sm:$0xff]  ;;  %v377_v14 = vpack.c.bf16 %v369_v12, %v369_v12  ;;  %v346_v58 = vld [vmem:[%s320_s8] sm:$0xff] }
  0x14   : > { %518 = vxpose.xlu1.c.b16.start.end [1/1] (short) (narrow) %v372_v3, 16  ;;  %486 = vxpose.xlu0.c.b16.start.end [1/1] (short) (narrow) %v370_v4, 16  ;;  %v375_v10 = vpack.c.bf16 %v367_v8, %v367_v8  ;;  %v376_v15 = vpack.c.bf16 %v368_v13, %v368_v13  ;;  %v347_v59 = vld [vmem:[%s320_s8 + $0x8] sm:$0xff]  ;;  %v348_v60 = vld [vmem:[%s320_s8 + $0x10] sm:$0xff]  ;;  %v349_v61 = vld [vmem:[%s320_s8 + $0x18] sm:$0xff] }
  0x15   : > { %v350_v62 = vld [vmem:[%s320_s8 + $0x20] sm:$0xff]  ;;  %v351_v63 = vld [vmem:[%s320_s8 + $0x28] sm:$0xff]  ;;  %v352_v0 = vld [vmem:[%s320_s8 + $0x30] sm:$0xff] }
  0x16   : > { %v353_v1 = vld [vmem:[%s320_s8 + $0x38] sm:$0xff]  ;;  %v1896_v2 = vpack.c.bf16 %v350_v62, %v346_v58  ;;  %v1897_v3 = vpack.c.bf16 %v352_v0, %v348_v60  ;;  %v1898_v4 = vpack.c.bf16 %v351_v63, %v347_v59 }
  0x17   : > { %v1899_v5 = vpack.c.bf16 %v353_v1, %v349_v61 }
  0x18   : > { %534 = vxpose.xlu1.c.b16.start.end [1/1] (short) (narrow) %v373_v6, 16  ;;  %502 = vxpose.xlu0.c.b16.start.end [1/1] (short) (narrow) %v371_v7, 16  ;;  %v2212_v7 = vrot.slane %v1896_v2, %v2190_v31  ;;  %v2215_v8 = vrot.slane %v1897_v3, %v2190_v31  ;;  %v2218_v9 = vrot.slane %v1898_v4, %v2190_v31 }
  0x1a   : > { %v410_v13 = vcombine.low %v2212_v7, %v2215_v8 }
  0x1c   : > { %566 = vxpose.xlu1.c.b16.start.end [1/1] (short) (narrow) %v375_v10, 16  ;;  %550 = vxpose.xlu0.c.b16.start.end [1/1] (short) (narrow) %v374_v11, 16  ;;  %v2221_v10 = vrot.slane %v1899_v5, %v2190_v31 }
  0x20   : > { %598 = vxpose.xlu1.c.b16.start.end [1/1] (short) (narrow) %v377_v14, 16  ;;  %582 = vxpose.xlu0.c.b16.start.end [1/1] (short) (narrow) %v376_v15, 16  ;;  %v444_v14 = vcombine.low %v2218_v9, %v2221_v10 }
  0x7a   : > { %v526_v16 = vpop.trf.xlu1  ;;  %v494_v17 = vpop.trf.xlu0 }
  0x7e   : > { %v542_v21 = vpop.trf.xlu1  ;;  %v510_v22 = vpop.trf.xlu0 }
  0x82   : > { %v574_v27 = vpop.trf.xlu1  ;;  %v558_v28 = vpop.trf.xlu0 }
  0x83   : > { %v639_v32 = vcombine.low %v510_v22, %v574_v27  ;;  %v614_v33 = vcombine.low %v494_v17, %v558_v28  ;;  %v452_v22 = vrot.slane %v444_v14, %v2192_v38 }
  0x85   : > { %v646_v39 = vrot.slane %v639_v32, %v2190_v31  ;;  %v621_v40 = vrot.slane %v614_v33, %v2190_v31  ;;  %v466_v30 = vshrl.u32 %v452_v22, 16 }
  0x86   : > { %v606_v34 = vpop.trf.xlu1  ;;  %v590_v35 = vpop.trf.xlu0 }
  0x87   : > { %v647_v36 = vcombine.low %v542_v21, %v606_v34  ;;  %v622_v37 = vcombine.low %v526_v16, %v590_v35  ;;  %v418_v21 = vrot.slane %v410_v13, %v2192_v38 }
  0x89   : > { %v654_v41 = vrot.slane %v647_v36, %v2190_v31  ;;  %v629_v42 = vrot.slane %v622_v37, %v2190_v31  ;;  %v465_v28 = vshrl.u32 %v418_v21, 16  ;;  %v464_v37 = vpack.i.b16 %v452_v22, %v418_v21 }
  0x8b   : > { %v655_v43 = vcombine.low %v646_v39, %v654_v41  ;;  %v630_v44 = vcombine.low %v621_v40, %v629_v42 }
  0x8d   : > { %v637_v45 = vrot.slane %v630_v44, %v2192_v38  ;;  %v662_v46 = vrot.slane %v655_v43, %v2192_v38  ;;  %v426_v44 = vcombine.high %v418_v21, %v2120_v50 }
  0x8f   : > { %v666_v47 = vpack.i.b16 %v662_v46, %v637_v45  ;;  %v668_v48 = vshrl.u32 %v637_v45, 16  ;;  %v669_v49 = vshrl.u32 %v662_v46, 16  ;;  %v638_v51 = vcombine.high %v637_v45, %v2120_v50 }
  0x90   : > { %v663_v52 = vcombine.high %v662_v46, %v2120_v50  ;;  %v460_v45 = vcombine.high %v452_v22, %v2120_v50 }
  0x91   : > { %680 = vxpose.xlu0.c.b16.start.end [1/1] (short) (narrow) %v666_v47, 16  ;;  %v670_v53 = vpack.i.b16 %v669_v49, %v668_v48  ;;  %v676_v54 = vshrl.u32 %v638_v51, 16  ;;  %v467_v48 = vpack.i.b16 %v466_v30, %v465_v28 }
  0x92   : > { %v677_v55 = vshrl.u32 %v663_v52, 16  ;;  %v674_v56 = vpack.i.b16 %v663_v52, %v638_v51  ;;  %v470_v59 = vpack.i.b16 %v460_v45, %v426_v44 }
  0x93   : > { %696 = vxpose.xlu1.c.b16.start.end [1/1] (short) (narrow) %v670_v53, 16  ;;  %v471_v53 = vshrl.u32 %v426_v44, 16 }
  0x94   : > { %v678_v57 = vpack.i.b16 %v677_v55, %v676_v54  ;;  %v472_v54 = vshrl.u32 %v460_v45, 16  ;;  %v411_v55 = vcombine.high %v2212_v7, %v2215_v8 }
  0x95   : > { %712 = vxpose.xlu0.c.b16.start.end [1/1] (short) (narrow) %v674_v56, 16  ;;  %v445_v56 = vcombine.high %v2218_v9, %v2221_v10 }
  0x96   : > { %v473_v62 = vpack.i.b16 %v472_v54, %v471_v53  ;;  %v425_v0 = vrot.slane %v411_v55, %v2192_v38 }
  0x97   : > { %728 = vxpose.xlu1.c.b16.start.end [1/1] (short) (narrow) %v678_v57, 16  ;;  %v459_v1 = vrot.slane %v445_v56, %v2192_v38 }
  0x98   : > { %v427_v14 = vcombine.high %v425_v0, %v2120_v50 }
  0x99   : > { %v478_v7 = vshrl.u32 %v459_v1, 16  ;;  %v476_v9 = vpack.i.b16 %v459_v1, %v425_v0 }
  0xf7   : > { %v688_v6 = vpop.trf.xlu0 }
  0xf8   : > { %v750_v15 = vrot.slane %v688_v6, %v2190_v31  ;;  %v477_v6 = vshrl.u32 %v425_v0, 16 }
  0xf9   : > { %v704_v11 = vpop.trf.xlu1 }
  0xfa   : > { %v782_v18 = vrot.slane %v704_v11, %v2190_v31 }
  0xfb   : > { %v720_v12 = vpop.trf.xlu0 }
  0xfc   : > { %v757_v16 = vrot.slane %v720_v12, %v2190_v31  ;;  %v479_v12 = vpack.i.b16 %v478_v7, %v477_v6 }
  0xfd   : > { %v736_v17 = vpop.trf.xlu1 }
  0xfe   : > { %v758_v19 = vcombine.low %v750_v15, %v757_v16  ;;  %v789_v20 = vrot.slane %v736_v17, %v2190_v31  ;;  %v759_v36 = vcombine.high %v750_v15, %v757_v16  ;;  %v461_v15 = vcombine.high %v459_v1, %v2120_v50 }
 0x100   : > { %v766_v23 = vrot.slane %v758_v19, %v2192_v38  ;;  %v790_v24 = vcombine.low %v782_v18, %v789_v20  ;;  %v791_v27 = vcombine.high %v782_v18, %v789_v20  ;;  %v773_v51 = vrot.slane %v759_v36, %v2192_v38 }
 0x101   : > { %v483_v18 = vshrl.u32 %v427_v14, 16  ;;  %v484_v19 = vshrl.u32 %v461_v15, 16  ;;  %v482_v20 = vpack.i.b16 %v461_v15, %v427_v14 }
 0x102   : > { %v798_v25 = vrot.slane %v790_v24, %v2192_v38  ;;  %v774_v26 = vcombine.high %v766_v23, %v2120_v50  ;;  %v811_v33 = vshrl.u32 %v766_v23, 16  ;;  %v805_v46 = vrot.slane %v791_v27, %v2192_v38  ;;  %v1210_v27 = vld [vmem:[%s2408_s3] sm:$0xff] }
 0x103   : > { %v823_v61 = vshrl.u32 %v773_v51, 16  ;;  %v775_v4 = vcombine.high %v773_v51, %v2120_v50  ;;  %v485_v21 = vpack.i.b16 %v484_v19, %v483_v18 }
 0x104   : > { %v810_v32 = vpack.i.b16 %v798_v25, %v766_v23  ;;  %v812_v34 = vshrl.u32 %v798_v25, 16  ;;  %v806_v35 = vcombine.high %v798_v25, %v2120_v50  ;;  %v817_v39 = vshrl.u32 %v774_v26, 16 }
 0x105   : > { %v824_v58 = vshrl.u32 %v805_v46, 16  ;;  %v822_v60 = vpack.i.b16 %v805_v46, %v773_v51  ;;  %v807_v2 = vcombine.high %v805_v46, %v2120_v50  ;;  %v829_v11 = vshrl.u32 %v775_v4, 16 }
 0x106   : > { %v838_v40 = vsel %vm836_vm1, %v810_v32, 0  ;;  %v813_v41 = vpack.i.b16 %v812_v34, %v811_v33  ;;  %v816_v42 = vpack.i.b16 %v806_v35, %v774_v26  ;;  %v818_v43 = vshrl.u32 %v806_v35, 16 }
 0x107   : > { %1949 = vmatpush3.bf16.msra.mxu0 %v838_v40  ;;  %v825_v63 = vpack.i.b16 %v824_v58, %v823_v61  ;;  %v1022_v3 = vsel %vm836_vm1, %v822_v60, 0  ;;  %v830_v8 = vshrl.u32 %v807_v2, 16  ;;  %v828_v10 = vpack.i.b16 %v807_v2, %v775_v4 }
 0x108   : > { %v884_v47 = vsel %vm836_vm1, %v813_v41, 0  ;;  %1960 = vmatprep.subr.bf16.mxu0 %v2118_v29  ;;  %v819_v49 = vpack.i.b16 %v818_v43, %v817_v39  ;;  %v930_v52 = vsel %vm836_vm1, %v816_v42, 0 }
 0x109   : > { %1955 = vmatpush3.bf16.msra.mxu1 %v884_v47  ;;  %v1068_v5 = vsel %vm836_vm1, %v825_v63, 0  ;;  %v831_v13 = vpack.i.b16 %v830_v8, %v829_v11  ;;  %v1114_v16 = vsel %vm836_vm1, %v828_v10, 0 }
 0x10a   : > { %1951 = vmatmul.mubr.msk.bf16.vlgmr.msra.gmra.mrb[0].mxu0 %vm832_vm2, %v464_v37  ;;  %1966 = vmatprep.subr.bf16.mxu1 %v2118_v29  ;;  %v976_v57 = vsel %vm836_vm1, %v819_v49, 0 }
 0x10b   : > { %1961 = vmatpush3.bf16.msra.mxu0 %v930_v52  ;;  %1962 = vmatprep.mubr.msk.bf16.mxu0 %vm2119_vm0, %v2118_v29  ;;  %v1160_v17 = vsel %vm836_vm1, %v831_v13, 0 }
 0x10c   : > { %1957 = vmatmul.mubr.msk.bf16.vlgmr.msra.gmra.mrb[0].mxu1 %vm832_vm2, %v467_v48  ;;  %1972 = vmatprep.subr.bf16.mxu0 %v2118_v29 }
 0x10d   : > { %1967 = vmatpush3.bf16.msra.mxu1 %v976_v57  ;;  %1968 = vmatprep.mubr.msk.bf16.mxu1 %vm2119_vm0, %v2118_v29 }
 0x10e   : > { %1978 = vmatprep.subr.bf16.mxu1 %v2118_v29 }
 0x112   : > { %1963 = vmatmul.mubr.msk.bf16.vlgmr.msra.gmra.mrb[4].mxu0 %vm832_vm2, %v470_v59 }
 0x113   : > { %1973 = vmatpush3.bf16.msra.mxu0 %v1022_v3  ;;  %1974 = vmatprep.mubr.msk.bf16.mxu0 %vm2119_vm0, %v2118_v29 }
 0x114   : > { %1969 = vmatmul.mubr.msk.bf16.vlgmr.msra.gmra.mrb[4].mxu1 %vm832_vm2, %v473_v62  ;;  %1984 = vmatprep.subr.bf16.mxu0 %v2118_v29 }
 0x115   : > { %1979 = vmatpush3.bf16.msra.mxu1 %v1068_v5  ;;  %1980 = vmatprep.mubr.msk.bf16.mxu1 %vm2119_vm0, %v2118_v29 }
 0x116   : > { %1990 = vmatprep.subr.bf16.mxu1 %v2118_v29 }
 0x11a   : > { %1975 = vmatmul.mubr.msk.bf16.vlgmr.msra.gmra.mrb[8].mxu0 %vm832_vm2, %v476_v9 }
 0x11b   : > { %1985 = vmatpush3.bf16.msra.mxu0 %v1114_v16  ;;  %1986 = vmatprep.mubr.msk.bf16.mxu0 %vm2119_vm0, %v2118_v29 }
 0x11c   : > { %1981 = vmatmul.mubr.msk.bf16.vlgmr.msra.gmra.mrb[8].mxu1 %vm832_vm2, %v479_v12  ;;  %1996 = vmatprep.subr.bf16.mxu0 %v2118_v29 }
 0x11d   : > { %1991 = vmatpush3.bf16.msra.mxu1 %v1160_v17  ;;  %1992 = vmatprep.mubr.msk.bf16.mxu1 %vm2119_vm0, %v2118_v29 }
 0x11e   : > { %2002 = vmatprep.subr.bf16.mxu1 %v2118_v29 }
 0x122   : > { %1987 = vmatmul.mubr.msk.bf16.vlgmr.msra.gmra.mrb[12].mxu0 %vm832_vm2, %v482_v20 }
 0x123   : > { %1998 = vmatprep.mubr.msk.bf16.mxu0 %vm2119_vm0, %v2118_v29 }
 0x124   : > { %1993 = vmatmul.mubr.msk.bf16.vlgmr.msra.gmra.mrb[12].mxu1 %vm832_vm2, %v485_v21 }
 0x125   : > { %2004 = vmatprep.mubr.msk.bf16.mxu1 %vm2119_vm0, %v2118_v29 }
 0x1dd   : > { %v874_v22 = vpop.f32.mrb[0].mxu0 }
 0x1de   : > { %v1202_v23 = vmul.f32 0.5, %v874_v22  ;;  %v1952_v24 = vpop.f32.mrb[1].mxu0 }
 0x1df   : > { %v920_v25 = vpop.f32.mrb[0].mxu1  ;;  %v877_v26 = vpop.f32.mrb[2].mxu0 }
 0x1e0   : > { %v1203_v28 = vmul.f32 0.5, %v920_v25  ;;  %v1958_v30 = vpop.f32.mrb[1].mxu1  ;;  %v1953_v32 = vpop.f32.mrb[3].mxu0  ;;  %v1211_v36 = vadd.f32 %v1210_v27, %v1202_v23 }
 0x1e1   : > { %v923_v33 = vpop.f32.mrb[2].mxu1 }
 0x1e2   : > { %v1959_v34 = vpop.f32.mrb[3].mxu1  ;;  %v1212_v35 = vadd.f32 %v1210_v27, %v1203_v28  ;;  %v1220_v40 = vsel %vm1219_vm3, %v1211_v36, -inf }
 0x1e4   : > { %v1223_v37 = vsel %vm1219_vm3, %v1212_v35, -inf }
 0x1e5   : > { %1224 = vmax.xlane.f32.xlu0 %v1223_v37  ;;  %v966_v39 = vpop.f32.mrb[4].mxu0 }
 0x1e6   : > { %v1204_v41 = vmul.f32 0.5, %v966_v39  ;;  %v1964_v42 = vpop.f32.mrb[5].mxu0 }
 0x1e7   : > { %v1012_v43 = vpop.f32.mrb[4].mxu1  ;;  %v969_v44 = vpop.f32.mrb[6].mxu0 }
 0x1e8   : > { %v1205_v45 = vmul.f32 0.5, %v1012_v43  ;;  %v1970_v46 = vpop.f32.mrb[5].mxu1  ;;  %v1965_v47 = vpop.f32.mrb[7].mxu0  ;;  %v1213_v52 = vadd.f32 %v1210_v27, %v1204_v41 }
 0x1e9   : > { %1221 = vmax.xlane.f32.xlu0 %v1220_v40  ;;  %v1015_v48 = vpop.f32.mrb[6].mxu1 }
 0x1ea   : > { %v1971_v49 = vpop.f32.mrb[7].mxu1  ;;  %v1214_v51 = vadd.f32 %v1210_v27, %v1205_v45  ;;  %v1226_v55 = vsel %vm1219_vm3, %v1213_v52, -inf }
 0x1ec   : > { %v1229_v53 = vsel %vm1219_vm3, %v1214_v51, -inf }
 0x1ed   : > { %1230 = vmax.xlane.f32.xlu1 %v1229_v53  ;;  %v1058_v54 = vpop.f32.mrb[8].mxu0 }
 0x1ee   : > { %v1206_v56 = vmul.f32 0.5, %v1058_v54  ;;  %v1976_v57 = vpop.f32.mrb[9].mxu0 }
 0x1ef   : > { %v1104_v58 = vpop.f32.mrb[8].mxu1  ;;  %v1061_v59 = vpop.f32.mrb[10].mxu0 }
 0x1f0   : > { %v1207_v60 = vmul.f32 0.5, %v1104_v58  ;;  %v1982_v61 = vpop.f32.mrb[9].mxu1  ;;  %v1977_v62 = vpop.f32.mrb[11].mxu0  ;;  %v1215_v2 = vadd.f32 %v1210_v27, %v1206_v56  ;;  %v378_v59 = vld [vmem:[%s336_s14] sm:$0xf] }
 0x1f1   : > { %v1107_v63 = vpop.f32.mrb[10].mxu1  ;;  %1227 = vmax.xlane.f32.xlu1 %v1226_v55  ;;  %v380_v61 = vld [vmem:[%s336_s14 + $0x8] sm:$0xf] }
 0x1f2   : > { %v1983_v0 = vpop.f32.mrb[11].mxu1  ;;  %v1216_v1 = vadd.f32 %v1210_v27, %v1207_v60  ;;  %v1232_v5 = vsel %vm1219_vm3, %v1215_v2, -inf  ;;  %v379_v60 = vld [vmem:[%s336_s14 + $0x4] sm:$0xf]  ;;  %v381_v63 = vld [vmem:[%s336_s14 + $0xc] sm:$0xf] }
 0x1f3   : > { %v382_v0 = vld [vmem:[%s336_s14 + $0x10] sm:$0xf] }
 0x1f4   : > { %v1235_v3 = vsel %vm1219_vm3, %v1216_v1, -inf }
 0x1f5   : > { %1236 = vmax.xlane.f32.xlu0 %v1235_v3  ;;  %v1150_v4 = vpop.f32.mrb[12].mxu0  ;;  %v384_v3 = vld [vmem:[%s336_s14 + $0x18] sm:$0xf] }
 0x1f6   : > { %v1208_v6 = vmul.f32 0.5, %v1150_v4  ;;  %v1988_v7 = vpop.f32.mrb[13].mxu0  ;;  %v385_v4 = vld [vmem:[%s336_s14 + $0x1c] sm:$0xf] }
 0x1f7   : > { %v1196_v8 = vpop.f32.mrb[12].mxu1  ;;  %v1153_v9 = vpop.f32.mrb[14].mxu0  ;;  %v1909_v7 = vpack.c.bf16 %v384_v3, %v380_v61 }
 0x1f8   : > { %v1209_v10 = vmul.f32 0.5, %v1196_v8  ;;  %v1994_v11 = vpop.f32.mrb[13].mxu1  ;;  %v1989_v12 = vpop.f32.mrb[15].mxu0  ;;  %v1217_v16 = vadd.f32 %v1210_v27, %v1208_v6  ;;  %v1911_v8 = vpack.c.bf16 %v385_v4, %v381_v63 }
 0x1f9   : > { %v1199_v13 = vpop.f32.mrb[14].mxu1  ;;  %1233 = vmax.xlane.f32.xlu0 %v1232_v5  ;;  %v1908_v5 = vpack.c.bf16 %v382_v0, %v378_v59  ;;  %v1336_v12 = vrot.slane %v1909_v7, %v2190_v31 }
 0x1fa   : > { %v1995_v14 = vpop.f32.mrb[15].mxu1  ;;  %v1218_v15 = vadd.f32 %v1210_v27, %v1209_v10  ;;  %v1238_v18 = vsel %vm1219_vm3, %v1217_v16, -inf  ;;  %v1361_v13 = vrot.slane %v1911_v8, %v2190_v31 }
 0x1fb   : > { %v1328_v9 = vrot.slane %v1908_v5, %v2190_v31 }
 0x1fc   : > { %v1241_v17 = vsel %vm1219_vm3, %v1218_v15, -inf }
 0x1fd   : > { %1242 = vmax.xlane.f32.xlu1 %v1241_v17 }
 0x201   : > { %1239 = vmax.xlane.f32.xlu1 %v1238_v18 }
 0x272   : > { %v1225_v19 = vpop.xlane.xlu0 %1224 }
 0x273   : > { %v1245_v20 = vsub.f32 %v1212_v35, %v1225_v19 }
 0x275   : > { %v1254_v21 = vmul.f32 1.442695, %v1245_v20 }
 0x276   : > { %v1222_v22 = vpop.xlane.xlu0 %1221 }
 0x277   : > { %2052 = vpow2.f32 %v1254_v21  ;;  %v1244_v23 = vsub.f32 %v1211_v36, %v1222_v22 }
 0x279   : > { %v1252_v24 = vmul.f32 1.442695, %v1244_v23 }
 0x27a   : > { %v1231_v25 = vpop.xlane.xlu1 %1230 }
 0x27b   : > { %2054 = vpow2.f32 %v1252_v24  ;;  %v1247_v26 = vsub.f32 %v1214_v51, %v1231_v25 }
 0x27d   : > { %v1258_v28 = vmul.f32 1.442695, %v1247_v26 }
 0x27e   : > { %v1228_v30 = vpop.xlane.xlu1 %1227 }
 0x27f   : > { %2056 = vpow2.f32 %v1258_v28  ;;  %v1246_v27 = vsub.f32 %v1213_v52, %v1228_v30 }
 0x281   : > { %v2302_v32 = vpop.eup %2052  ;;  %v1256_v33 = vmul.f32 1.442695, %v1246_v27 }
 0x282   : > { %v1237_v34 = vpop.xlane.xlu0 %1236  ;;  %v1271_v37 = vsel %vm1219_vm3, %v2302_v32, 0.0 }
 0x283   : > { %2058 = vpow2.f32 %v1256_v33  ;;  %v1249_v35 = vsub.f32 %v1216_v1, %v1237_v34  ;;  %1272 = vadd.xlane.f32.xlu0 %v1271_v37  ;;  %v383_v1 = vld [vmem:[%s336_s14 + $0x14] sm:$0xf] }
 0x284   : > { %v1910_v6 = vpack.c.bf16 %v383_v1, %v379_v60 }
 0x285   : > { %v2306_v39 = vpop.eup %2054  ;;  %v1262_v36 = vmul.f32 1.442695, %v1249_v35 }
 0x286   : > { %v1234_v40 = vpop.xlane.xlu0 %1233  ;;  %v1268_v41 = vsel %vm1219_vm3, %v2306_v39, 0.0  ;;  %v1353_v10 = vrot.slane %v1910_v6, %v2190_v31 }
 0x287   : > { %2060 = vpow2.f32 %v1262_v36  ;;  %v1248_v42 = vsub.f32 %v1215_v2, %v1234_v40  ;;  %1269 = vadd.xlane.f32.xlu0 %v1268_v41 }
 0x289   : > { %v2310_v43 = vpop.eup %2056  ;;  %v1260_v44 = vmul.f32 1.442695, %v1248_v42 }
 0x28a   : > { %v1243_v45 = vpop.xlane.xlu1 %1242  ;;  %v1277_v46 = vsel %vm1219_vm3, %v2310_v43, 0.0 }
 0x28b   : > { %2062 = vpow2.f32 %v1260_v44  ;;  %v1251_v47 = vsub.f32 %v1218_v15, %v1243_v45  ;;  %1278 = vadd.xlane.f32.xlu1 %v1277_v46  ;;  %v1337_v15 = vcombine.low %v1328_v9, %v1336_v12 }
 0x28d   : > { %v2314_v48 = vpop.eup %2058  ;;  %v1266_v49 = vmul.f32 1.442695, %v1251_v47  ;;  %v1344_v17 = vrot.slane %v1337_v15, %v2192_v38 }
 0x28e   : > { %v1240_v51 = vpop.xlane.xlu1 %1239  ;;  %v1274_v52 = vsel %vm1219_vm3, %v2314_v48, 0.0 }
 0x28f   : > { %2064 = vpow2.f32 %v1266_v49  ;;  %v1250_v53 = vsub.f32 %v1217_v16, %v1240_v51  ;;  %1275 = vadd.xlane.f32.xlu1 %v1274_v52  ;;  %v1362_v16 = vcombine.low %v1353_v10, %v1361_v13  ;;  %v1374_v21 = vshrl.u32 %v1344_v17, 16 }
 0x290   : > { %v1345_v25 = vcombine.high %v1344_v17, %v2120_v50 }
 0x291   : > { %v2318_v54 = vpop.eup %2060  ;;  %v1264_v55 = vmul.f32 1.442695, %v1250_v53  ;;  %v1369_v18 = vrot.slane %v1362_v16, %v2192_v38 }
 0x292   : > { %v1283_v56 = vsel %vm1219_vm3, %v2318_v54, 0.0  ;;  %v1380_v27 = vshrl.u32 %v1345_v25, 16 }
 0x293   : > { %2066 = vpow2.f32 %v1264_v55  ;;  %1284 = vadd.xlane.f32.xlu0 %v1283_v56  ;;  %v1373_v19 = vpack.i.b16 %v1369_v18, %v1344_v17  ;;  %v1375_v22 = vshrl.u32 %v1369_v18, 16  ;;  %v1370_v26 = vcombine.high %v1369_v18, %v2120_v50 }
 0x294   : > { %v1308_v50 = vstv %s345_s15 }
 0x295   : > { %v2323_v57 = vpop.eup %2062  ;;  %v1388_v20 = vsel %vm1386_vm4, %v1373_v19, 0  ;;  %v1376_v23 = vpack.i.b16 %v1375_v22, %v1374_v21  ;;  %v1379_v28 = vpack.i.b16 %v1370_v26, %v1345_v25  ;;  %v1381_v33 = vshrl.u32 %v1370_v26, 16 }
 0x296   : > { %v1280_v58 = vsel %vm1219_vm3, %v2323_v57, 0.0  ;;  %1997 = vmatpush3.bf16.msra.mxu0 %v1388_v20 }
 0x297   : > { %1281 = vadd.xlane.f32.xlu0 %v1280_v58  ;;  %2008 = vmatprep.subr.bf16.mxu0 %v2118_v29  ;;  %v1434_v24 = vsel %vm1386_vm4, %v1376_v23, 0  ;;  %v1480_v30 = vsel %vm1386_vm4, %v1379_v28, 0  ;;  %v1382_v34 = vpack.i.b16 %v1381_v33, %v1380_v27 }
 0x298   : > { %2003 = vmatpush3.bf16.msra.mxu1 %v1434_v24 }
 0x299   : > { %v2330_v62 = vpop.eup %2064  ;;  %2014 = vmatprep.subr.bf16.mxu1 %v2118_v29  ;;  %v1526_v37 = vsel %vm1386_vm4, %v1382_v34, 0 }
 0x29a   : > { %v1289_v2 = vsel %vm1219_vm3, %v2330_v62, 0.0 }
 0x29b   : > { %1290 = vadd.xlane.f32.xlu1 %v1289_v2 }
 0x29d   : > { %v2336_v11 = vpop.eup %2066 }
 0x29e   : > { %v1286_v14 = vsel %vm1219_vm3, %v2336_v11, 0.0 }
 0x29f   : > { %1287 = vadd.xlane.f32.xlu1 %v1286_v14 }
 0x310   : > { %v1273_v35 = vpop.xlane.xlu0 %1272 }
 0x311   : > { %2068 = vrcp.f32 %v1273_v35 }
 0x314   : > { %v1270_v36 = vpop.xlane.xlu0 %1269 }
 0x315   : > { %2070 = vrcp.f32 %v1270_v36 }
 0x318   : > { %v1279_v40 = vpop.xlane.xlu1 %1278 }
 0x319   : > { %2072 = vrcp.f32 %v1279_v40 }
 0x31b   : > { %v2069_v41 = vpop.eup %2068 }
 0x31c   : > { %v1295_v42 = vmul.f32 %v2069_v41, %v2302_v32  ;;  %v1276_v44 = vpop.xlane.xlu1 %1275 }
 0x31d   : > { %2074 = vrcp.f32 %v1276_v44 }
 0x31e   : > { %v1309_v46 = vmul.f32 %v1308_v50, %v1295_v42 }
 0x31f   : > { %v2071_v45 = vpop.eup %2070 }
 0x320   : > { %v1293_v47 = vmul.f32 %v2071_v45, %v2306_v39  ;;  %v1285_v49 = vpop.xlane.xlu0 %1284 }
 0x321   : > { %2076 = vrcp.f32 %v1285_v49 }
 0x322   : > { %v1313_v51 = vsub.f32 %v1293_v47, %v1309_v46 }
 0x323   : > { %v2073_v52 = vpop.eup %2072 }
 0x324   : > { %v1299_v53 = vmul.f32 %v2073_v52, %v2310_v43  ;;  %v1282_v55 = vpop.xlane.xlu0 %1281  ;;  %v1317_v56 = vpack.c.bf16 %v1313_v51, %v1313_v51 }
 0x325   : > { %2078 = vrcp.f32 %v1282_v55 }
 0x326   : > { %1999 = vmatmul.mubr.msk.bf16.vlgmr.msra.gmra.mrb[16].mxu0 %vm1219_vm3, %v1317_v56  ;;  %v1310_v32 = vmul.f32 %v1308_v50, %v1299_v53  ;;  %v1916_v53 = vld [vmem:[%s2409_s4] ss:$0 sm:$0xff] }
 0x327   : > { %v2075_v58 = vpop.eup %2074  ;;  %2009 = vmatpush3.bf16.msra.mxu0 %v1480_v30  ;;  %2010 = vmatprep.mubr.msk.bf16.mxu0 %vm2119_vm0, %v2118_v29 }
 0x328   : > { %v1297_v59 = vmul.f32 %v2075_v58, %v2314_v48  ;;  %v1291_v39 = vpop.xlane.xlu1 %1290 }
 0x329   : > { %2080 = vrcp.f32 %v1291_v39 }
 0x32a   : > { %v1314_v60 = vsub.f32 %v1297_v59, %v1310_v32 }
 0x32b   : > { %v2077_v61 = vpop.eup %2076 }
 0x32c   : > { %v1303_v63 = vmul.f32 %v2077_v61, %v2318_v54  ;;  %v1288_v43 = vpop.xlane.xlu1 %1287  ;;  %v1318_v0 = vpack.c.bf16 %v1314_v60, %v1314_v60 }
 0x32d   : > { %2082 = vrcp.f32 %v1288_v43 }
 0x32e   : > { %2005 = vmatmul.mubr.msk.bf16.vlgmr.msra.gmra.mrb[16].mxu1 %vm1219_vm3, %v1318_v0  ;;  %v1311_v2 = vmul.f32 %v1308_v50, %v1303_v63 }
 0x32f   : > { %v2079_v1 = vpop.eup %2078  ;;  %2015 = vmatpush3.bf16.msra.mxu1 %v1526_v37  ;;  %2016 = vmatprep.mubr.msk.bf16.mxu1 %vm2119_vm0, %v2118_v29 }
 0x330   : > { %v1301_v3 = vmul.f32 %v2079_v1, %v2323_v57 }
 0x332   : > { %v1315_v48 = vsub.f32 %v1301_v3, %v1311_v2 }
 0x333   : > { %v2081_v4 = vpop.eup %2080 }
 0x334   : > { %v1307_v5 = vmul.f32 %v2081_v4, %v2330_v62  ;;  %v1319_v6 = vpack.c.bf16 %v1315_v48, %v1315_v48 }
 0x336   : > { %2011 = vmatmul.mubr.msk.bf16.vlgmr.msra.gmra.mrb[20].mxu0 %vm1219_vm3, %v1319_v6  ;;  %v1312_v7 = vmul.f32 %v1308_v50, %v1307_v5 }
 0x337   : > { %v2083_v54 = vpop.eup %2082 }
 0x338   : > { %v1305_v8 = vmul.f32 %v2083_v54, %v2336_v11 }
 0x33a   : > { %v1316_v9 = vsub.f32 %v1305_v8, %v1312_v7 }
 0x33c   : > { %v1320_v10 = vpack.c.bf16 %v1316_v9, %v1316_v9 }
 0x33e   : > { %2017 = vmatmul.mubr.msk.bf16.vlgmr.msra.gmra.mrb[20].mxu1 %vm1219_vm3, %v1320_v10 }
 0x3f9   : > { %v1424_v12 = vpop.f32.mrb[16].mxu0 }
 0x3fa   : > { %v1568_v29 = vmul.f32 %v1424_v12, %v1424_v12  ;;  %v2000_v13 = vpop.f32.mrb[17].mxu0 }
 0x3fb   : > { %v1427_v14 = vpop.f32.mrb[18].mxu0 }
 0x3fc   : > { %v2001_v57 = vpop.f32.mrb[19].mxu0  ;;  %v1572_v15 = vsel %vm1219_vm3, %v1568_v29, 0.0 }
 0x3fd   : > { %1573 = vadd.xlane.f32.xlu0 %v1572_v15 }
 0x401   : > { %v1470_v62 = vpop.f32.mrb[16].mxu1 }
 0x402   : > { %v1569_v16 = vmul.f32 %v1470_v62, %v1470_v62  ;;  %v2006_v17 = vpop.f32.mrb[17].mxu1 }
 0x403   : > { %v1473_v18 = vpop.f32.mrb[18].mxu1 }
 0x404   : > { %v2007_v19 = vpop.f32.mrb[19].mxu1  ;;  %v1575_v20 = vsel %vm1219_vm3, %v1569_v16, 0.0 }
 0x405   : > { %1576 = vadd.xlane.f32.xlu1 %v1575_v20 }
 0x409   : > { %v1516_v11 = vpop.f32.mrb[20].mxu0 }
 0x40a   : > { %v1570_v21 = vmul.f32 %v1516_v11, %v1516_v11  ;;  %v2012_v22 = vpop.f32.mrb[21].mxu0 }
 0x40b   : > { %v1519_v23 = vpop.f32.mrb[22].mxu0 }
 0x40c   : > { %v2013_v24 = vpop.f32.mrb[23].mxu0  ;;  %v1578_v25 = vsel %vm1219_vm3, %v1570_v21, 0.0 }
 0x40d   : > { %1579 = vadd.xlane.f32.xlu0 %v1578_v25 }
 0x411   : > { %v1562_v26 = vpop.f32.mrb[20].mxu1 }
 0x412   : > { %v1571_v28 = vmul.f32 %v1562_v26, %v1562_v26  ;;  %v2018_v30 = vpop.f32.mrb[21].mxu1 }
 0x413   : > { %v1565_v27 = vpop.f32.mrb[22].mxu1 }
 0x414   : > { %v2019_v33 = vpop.f32.mrb[23].mxu1  ;;  %v1581_v34 = vsel %vm1219_vm3, %v1571_v28, 0.0 }
 0x415   : > { %1582 = vadd.xlane.f32.xlu1 %v1581_v34 }
 0x48a   : > { %v1574_v37 = vpop.xlane.xlu0 %1573 }
 0x48b   : > { %v1585_v35 = vmul.f32 0.125, %v1574_v37 }
 0x48d   : > { %v1589_v36 = vadd.f32 1e-05, %v1585_v35 }
 0x48f   : > { %2084 = vrsqrt.f32 %v1589_v36 }
 0x492   : > { %v1577_v40 = vpop.xlane.xlu1 %1576 }
 0x493   : > { %v1586_v41 = vmul.f32 0.125, %v1577_v40 }
 0x495   : > { %v1590_v50 = vadd.f32 1e-05, %v1586_v41 }
 0x499   : > { %v2085_v47 = vpop.eup %2084 }
 0x49a   : > { %v1580_v42 = vpop.xlane.xlu0 %1579  ;;  %v1597_v52 = vmul.f32 %v2085_v47, %v1424_v12 }
 0x49b   : > { %v1587_v44 = vmul.f32 0.125, %v1580_v42 }
 0x49c   : > { %v1608_v56 = vmul.f32 %v1916_v53, %v1597_v52 }
 0x49d   : > { %v1591_v45 = vadd.f32 1e-05, %v1587_v44 }
 0x49e   : > { %v1612_v39 = vmul.f32 0.8, %v1608_v56 }
 0x49f   : > { %2086 = vrsqrt.f32 %v1591_v45 }
 0x4a0   : > { %2088 = vrsqrt.f32 %v1590_v50 }
 0x4a2   : > { %v1583_v46 = vpop.xlane.xlu1 %1582 }
 0x4a3   : > { %v1588_v49 = vmul.f32 0.125, %v1583_v46 }
 0x4a5   : > { %v1592_v51 = vadd.f32 1e-05, %v1588_v49 }
 0x4a7   : > { %2090 = vrsqrt.f32 %v1592_v51 }
 0x4a9   : > { %v2087_v55 = vpop.eup %2086 }
 0x4aa   : > { %v1599_v58 = vmul.f32 %v2087_v55, %v1516_v11  ;;  %v2089_v32 = vpop.eup %2088 }
 0x4ab   : > { %v1598_v60 = vmul.f32 %v2089_v32, %v1470_v62 }
 0x4ac   : > { %v1610_v59 = vmul.f32 %v1916_v53, %v1599_v58 }
 0x4ad   : > { %v1609_v1 = vmul.f32 %v1916_v53, %v1598_v60 }
 0x4ae   : > { %v1614_v61 = vmul.f32 0.8, %v1610_v59 }
 0x4af   : > { %v1613_v48 = vmul.f32 0.8, %v1609_v1 }
 0x4b0   : > { %v1616_v63 = vcombine.low %v1612_v39, %v1614_v61  ;;  %v1617_v43 = vcombine.high %v1612_v39, %v1614_v61 }
 0x4b1   : > { %v2091_v0 = vpop.eup %2090 }
 0x4b2   : > { %v1600_v2 = vmul.f32 %v2091_v0, %v1562_v26  ;;  %v1624_v54 = vrot.slane %v1616_v63, %v2190_v31  ;;  %v1631_v7 = vrot.slane %v1617_v43, %v2190_v31 }
 0x4b4   : > { %v1611_v3 = vmul.f32 %v1916_v53, %v1600_v2 }
 0x4b6   : > { %v1615_v4 = vmul.f32 0.8, %v1611_v3 }
 0x4b8   : > { %v1632_v5 = vcombine.low %v1613_v48, %v1615_v4  ;;  %v1633_v6 = vcombine.high %v1613_v48, %v1615_v4 }
 0x4ba   : > { %v1640_v8 = vrot.slane %v1632_v5, %v2190_v31  ;;  %v1647_v9 = vrot.slane %v1633_v6, %v2190_v31 }
 0x4bc   : > { %v1648_v10 = vcombine.low %v1624_v54, %v1640_v8  ;;  %v1649_v12 = vcombine.high %v1624_v54, %v1640_v8  ;;  %v1664_v29 = vcombine.low %v1631_v7, %v1647_v9  ;;  %v1665_v13 = vcombine.high %v1631_v7, %v1647_v9 }
 0x4be   : > { %v1656_v14 = vrot.slane %v1648_v10, %v2192_v38  ;;  %v1663_v57 = vrot.slane %v1649_v12, %v2192_v38  ;;  %v1672_v15 = vrot.slane %v1664_v29, %v2192_v38  ;;  %v1679_v62 = vrot.slane %v1665_v13, %v2192_v38 }
 0x4c0   : > { %v1684_v16 = vcombine.low %v1656_v14, %v1663_v57  ;;  %v1917_v17 = vcombine.high %v1656_v14, %v1663_v57  ;;  %v1700_v18 = vcombine.low %v1672_v15, %v1679_v62  ;;  %v1918_v19 = vcombine.high %v1672_v15, %v1679_v62 }
 0x4c2   : > { %v1691_v20 = vrot.slane %v1684_v16, %v2190_v31  ;;  %v1699_v11 = vrot.slane %v1917_v17, %v2190_v31  ;;  %v1707_v21 = vrot.slane %v1700_v18, %v2190_v31  ;;  %v1715_v22 = vrot.slane %v1918_v19, %v2190_v31 }
 0x4c4   : > { %v1717_v23 = vcombine.high %v1691_v20, %v1699_v11  ;;  %v1733_v24 = vcombine.high %v1707_v21, %v1715_v22  ;;  %v1716_v25 = vcombine.low %v1691_v20, %v1699_v11  ;;  %v1732_v26 = vcombine.low %v1707_v21, %v1715_v22 }
 0x4c6   : > { %v1731_v28 = vrot.slane %v1717_v23, %v2192_v38  ;;  %v1747_v30 = vrot.slane %v1733_v24, %v2192_v38  ;;  %v1724_v27 = vrot.slane %v1716_v25, %v2192_v38  ;;  %v1740_v33 = vrot.slane %v1732_v26, %v2192_v38 }
 0x4c8   : > { %v1750_v34 = vcombine.low %v1731_v28, %v1747_v30  ;;  %v1749_v37 = vcombine.high %v1724_v27, %v1740_v33  ;;  %v1751_v35 = vcombine.high %v1731_v28, %v1747_v30  ;;  %v1748_v36 = vcombine.low %v1724_v27, %v1740_v33 }
 0x4ca   : > { %1757 = vrot.lane.b32.xlu1 %v1750_v34, %s2121_s18  ;;  %1753 = vrot.lane.b32.xlu0 %v1749_v37, %s2122_s19 }
 0x4ce   : > { %1761 = vrot.lane.b32.xlu1 %v1751_v35, %s2123_s20 }
 0x53c   : > { %v1758_v31 = vpop.permute.xlu1 %1757  ;;  %v1754_v40 = vpop.permute.xlu0 %1753 }
 0x53d   : > { %v1764_v41 = vsel %vm1219_vm3, %v1748_v36, %v1754_v40 }
 0x53e   : > { %v1766_v42 = vsel %vm1765_vm5, %v1764_v41, %v1758_v31 }
 0x540   : > { %v1762_v38 = vpop.permute.xlu1 %1761 }
 0x541   : > { %v1768_v44 = vsel %vm1767_vm6, %v1766_v42, %v1762_v38 }
 0x542   : > { %1770 = vst.msk [vmem:[%s343_s27] sm:$0xff] %vm1769_vm7, %v1768_v44 }
 0x543 PF: > { %s17_s25 = sadd.s32 1, %s2114_s25   ;;  %s2412_s23 = smov %s2110_s24 }
 0x544   : > { %p14_p5 = scmp.ge.s32.totalorder %s17_s25, 4   ;;  %s2413_s24 = smov %s2415_s5 }
 0x546   :  { %16 = sbr.rel (!%p14_p5) target bundleno = 2 (0x2), region = 80 }

// kernel: decoder_forward.25
= control target key start
LH: loop header
LB: loop body
LE: loop exit
PB: predicated region body
PF: predicated region fallthrough
CT: control target
= control target key end

     0   :  { %vm22_vm0 = vcmask 261120   ;;  %v124_v0 = vmov 0.0   ;;  %vm125_vm1 = vmmov 0   ;;  %s191_s1 = inlined_call_operand.vmem [shape: f32[32,32], index: 1, kind: input, shape index: {}]   ;;  %s192_s0 = inlined_call_operand.vmem [shape: f32[16,32], index: 0, kind: input, shape index: {}]   ;;  %s193_s2 = inlined_call_operand.vmem [shape: f32[1,32], index: 2, kind: input, shape index: {}]   ;;  %s194_s3 = inlined_call_operand.vmem [shape: f32[16,32], index: 3, kind: input, shape index: {}]   ;;  %s195_s4 = inlined_call_operand.vmem [shape: f32[16,32], index: 4, kind: output, shape index: {}]  }
   0x1   :  { %114 = vmatprep.subr.bf16.mxu0 %v124_v0  ;;  %v30_v1 = vld [vmem:[%s191_s1] sm:$0xff]  ;;  %v31_v2 = vld [vmem:[%s191_s1 + $0x8] sm:$0xff]  ;;  %v32_v3 = vld [vmem:[%s191_s1 + $0x10] sm:$0xff]  ;;  %118 = vmatprep.mubr.msk.bf16.mxu0 %vm125_vm1, %v124_v0  ;;  %23 = vst.msk [vmem:[#allocation2] sm:$0xff] %vm22_vm0, %v124_v0 }
   0x2   :  { %24 = vst.msk [vmem:[#allocation2 + $0x8] sm:$0xff] %vm22_vm0, %v124_v0  ;;  %v34_v4 = vpack.c.bf16 %v31_v2, %v30_v1  ;;  %v33_v5 = vld [vmem:[%s191_s1 + $0x18] sm:$0xff]  ;;  %v25_v7 = vld [vmem:[%s192_s0] sm:$0xff]  ;;  %v26_v8 = vld [vmem:[%s192_s0 + $0x8] sm:$0xff] }
   0x3   :  { %v35_v6 = vpack.c.bf16 %v33_v5, %v32_v3  ;;  %v29_v9 = vpack.c.bf16 %v26_v8, %v25_v7  ;;  %v110_v18 = vld [vmem:[%s193_s2] ss:$0 sm:$0xff]  ;;  %v100_v23 = vld [vmem:[%s194_s3 + $0x8] sm:$0xff] }
   0x4   :  { %115 = vmatpush3.bf16.msra.mxu0 %v34_v4  ;;  %v99_v20 = vld [vmem:[%s194_s3] sm:$0xff] }
   0x5   :  { %116 = vmatprep.subr.bf16.mxu0 %v124_v0 }
   0x8   :  { %117 = vmatpush3.bf16.msra.mxu0 %v35_v6  ;;  %v27_v10 = vld [vmem:[#allocation2] sm:$0xff] }
   0x9   :  { %v28_v12 = vld [vmem:[#allocation2 + $0x8] sm:$0xff] }
   0xb   :  { %119 = vmatmul.mubr.msk.bf16.vlgmr.msra.gmra.mrb[0].mxu0 %vm22_vm0, %v29_v9 }
  0xde   :  { %v74_v11 = vpop.f32.mrb[0].mxu0 }
  0xdf   :  { %v81_v13 = vadd.f32 %v74_v11, %v27_v10  ;;  %v120_v14 = vpop.f32.mrb[1].mxu0 }
  0xe0   :  { %v77_v15 = vpop.f32.mrb[2].mxu0 }
  0xe1   :  { %83 = vst.msk [vmem:[#allocation2] sm:$0xff] %vm22_vm0, %v81_v13  ;;  %v82_v16 = vadd.f32 %v77_v15, %v28_v12  ;;  %v121_v17 = vpop.f32.mrb[3].mxu0 }
  0xe3   :  { %84 = vst.msk [vmem:[#allocation2 + $0x8] sm:$0xff] %vm22_vm0, %v82_v16 }
  0xe8   :  { %v88_v19 = vld [vmem:[#allocation2] sm:$0xff] }
  0xe9   :  { %v97_v21 = vadd.f32 %v110_v18, %v88_v19 }
  0xea   :  { %v89_v22 = vld [vmem:[#allocation2 + $0x8] sm:$0xff] }
  0xeb   :  { %v101_v24 = vadd.f32 %v99_v20, %v97_v21  ;;  %v98_v25 = vadd.f32 %v110_v18, %v89_v22 }
  0xed   :  { %103 = vst.msk [vmem:[%s195_s4] sm:$0xff] %vm22_vm0, %v101_v24  ;;  %v102_v26 = vadd.f32 %v100_v23, %v98_v25 }
  0xef   :  { %104 = vst.msk [vmem:[%s195_s4 + $0x8] sm:$0xff] %vm22_vm0, %v102_v26 }

// kernel: decoder_forward.23
= control target key start
LH: loop header
LB: loop body
LE: loop exit
PB: predicated region body
PF: predicated region fallthrough
CT: control target
= control target key end

     0   :  { %vm19_vm0 = vcmask 523264   ;;  %v118_v0 = vmov 0.0   ;;  %vm119_vm1 = vmmov 0   ;;  %vm33_vm2 = vcmask 261120   ;;  %s173_s1 = inlined_call_operand.vmem [shape: f32[32,64], index: 1, kind: input, shape index: {}]   ;;  %s174_s0 = inlined_call_operand.vmem [shape: f32[16,32], index: 0, kind: input, shape index: {}]   ;;  %s175_s2 = inlined_call_operand.vmem [shape: f32[1,64], index: 2, kind: input, shape index: {}]   ;;  %s176_s3 = inlined_call_operand.vmem [shape: f32[16,64], index: 3, kind: output, shape index: {}]  }
   0x1   :  { %108 = vmatprep.subr.bf16.mxu0 %v118_v0  ;;  %v27_v1 = vld [vmem:[%s173_s1] sm:$0xff]  ;;  %v28_v2 = vld [vmem:[%s173_s1 + $0x8] sm:$0xff]  ;;  %v29_v3 = vld [vmem:[%s173_s1 + $0x10] sm:$0xff]  ;;  %112 = vmatprep.mubr.msk.bf16.mxu0 %vm119_vm1, %v118_v0  ;;  %20 = vst.msk [vmem:[#allocation2] sm:$0xff] %vm19_vm0, %v118_v0 }
   0x2   :  { %21 = vst.msk [vmem:[#allocation2 + $0x8] sm:$0xff] %vm19_vm0, %v118_v0  ;;  %v31_v4 = vpack.c.bf16 %v28_v2, %v27_v1  ;;  %v30_v5 = vld [vmem:[%s173_s1 + $0x18] sm:$0xff]  ;;  %v22_v7 = vld [vmem:[%s174_s0] sm:$0xff]  ;;  %v23_v8 = vld [vmem:[%s174_s0 + $0x8] sm:$0xff] }
   0x3   :  { %v32_v6 = vpack.c.bf16 %v30_v5, %v29_v3  ;;  %v26_v9 = vpack.c.bf16 %v23_v8, %v22_v7  ;;  %v104_v18 = vld [vmem:[%s175_s2] ss:$0 sm:$0xff] }
   0x4   :  { %109 = vmatpush3.bf16.msra.mxu0 %v31_v4 }
   0x5   :  { %110 = vmatprep.subr.bf16.mxu0 %v118_v0 }
   0x8   :  { %111 = vmatpush3.bf16.msra.mxu0 %v32_v6  ;;  %v24_v10 = vld [vmem:[#allocation2] sm:$0xff] }
   0x9   :  { %v25_v12 = vld [vmem:[#allocation2 + $0x8] sm:$0xff] }
   0xb   :  { %113 = vmatmul.mubr.msk.bf16.vlgmr.msra.gmra.mrb[0].mxu0 %vm33_vm2, %v26_v9 }
  0xde   :  { %v71_v11 = vpop.f32.mrb[0].mxu0 }
  0xdf   :  { %v78_v13 = vadd.f32 %v71_v11, %v24_v10  ;;  %v114_v14 = vpop.f32.mrb[1].mxu0 }
  0xe0   :  { %v74_v15 = vpop.f32.mrb[2].mxu0 }
  0xe1   :  { %81 = vst.msk [vmem:[#allocation2] sm:$0xff] %vm19_vm0, %v78_v13  ;;  %v79_v16 = vadd.f32 %v74_v15, %v25_v12  ;;  %v115_v17 = vpop.f32.mrb[3].mxu0 }
  0xe3   :  { %82 = vst.msk [vmem:[#allocation2 + $0x8] sm:$0xff] %vm19_vm0, %v79_v16 }
  0xe8   :  { %v86_v19 = vld [vmem:[#allocation2] sm:$0xff] }
  0xe9   :  { %v95_v20 = vadd.f32 %v104_v18, %v86_v19 }
  0xea   :  { %v87_v21 = vld [vmem:[#allocation2 + $0x8] sm:$0xff] }
  0xeb   :  { %97 = vst.msk [vmem:[%s176_s3] sm:$0xff] %vm19_vm0, %v95_v20  ;;  %v96_v22 = vadd.f32 %v104_v18, %v87_v21 }
  0xed   :  { %98 = vst.msk [vmem:[%s176_s3 + $0x8] sm:$0xff] %vm19_vm0, %v96_v22 }

// kernel: decoder_forward.24
= control target key start
LH: loop header
LB: loop body
LE: loop exit
PB: predicated region body
PF: predicated region fallthrough
CT: control target
= control target key end

     0   :  { %s1779_s15 = smov 0   ;;  %s1781_s16 = smov 0   ;;  %s1943_s0 = inlined_call_operand.vmem [shape: f32[2,8,4,8], index: 0, kind: input, shape index: {}]   ;;  %s1944_s1 = inlined_call_operand.vmem [shape: f32[2,8,4,8], index: 1, kind: input, shape index: {}]   ;;  %s1945_s2 = inlined_call_operand.vmem [shape: f32[2,8,4,8], index: 2, kind: input, shape index: {}]   ;;  %s1946_s3 = inlined_call_operand.vmem [shape: f32[8,8], index: 3, kind: input, shape index: {}]   ;;  %s1947_s4 = inlined_call_operand.vmem [shape: f32[2,8,32], index: 4, kind: output, shape index: {}]  }
   0x1   :  { %s1783_s17 = smov 0  }
   0x2 LB: > { %s26_s18 = sadd.s32 1, %s1740_s16  ;;  %p1579_p0 = scmp.ge.s32.totalorder %s1744_s17, 1  ;;  %s1744_s17 = sphi %s1783_s17, %s14_s17   ;;  %s1740_s16 = sphi %s1781_s16, %s1949_s16   ;;  %s1736_s15 = sphi %s1779_s15, %s1948_s15  }
   0x3   : > { %p28_p1 = scmp.ge.s32.totalorder %s26_s18, 2  ;;  %p211_p2 = scmp.lt.s32.totalorder %s1744_s17, 3 }
   0x5   : > { %s1951_s18 = smov (%p28_p1, %s26_s18), 0  ;;  %p212_p3 = pnand %p1579_p0, %p211_p2 }
   0x6   : > { %p258_p4 = scmp.lt.s32.totalorder (!%p212_p3), %s1736_s15, 1  ;;  %v1746_v18 = vmov (!%p212_p3), 1983009808   ;;  %v342_v20 = vlaneseq (!%p212_p3)  ;;  %v1747_v23 = vmov (!%p212_p3), 1934713408   ;;  %v1748_v50 = vmov (!%p212_p3), 0.0  }
   0x7   : > { %215 = sbr.rel (%p212_p3) target bundleno = 1169 (0x491), region = 36  ;;  %v340_v19 = vunpack.c.l.s4 (!%p212_p3), %v1746_v18  ;;  %v356_v24 = vunpack.c.l.s4 (!%p212_p3), %v1747_v23  ;;  %1626 = vmatprep.subr.bf16.mxu0 (!%p212_p3), %v1748_v50  ;;  %1632 = vmatprep.subr.bf16.mxu1 (!%p212_p3), %v1748_v50  ;;  %v1749_v57 = vmov (!%p212_p3), 0   ;;  %vm1750_vm0 = vmmov (!%p212_p3), 0   ;;  %s1751_s5 = smov (!%p212_p3), 16  }
   0x8   : > { %v343_v26 = vshrl.u32 (!%p212_p3), %v342_v20, 7  ;;  %1628 = vmatprep.mubr.msk.bf16.mxu0 (!%p212_p3), %vm1750_vm0, %v1748_v50  ;;  %1634 = vmatprep.mubr.msk.bf16.mxu1 (!%p212_p3), %vm1750_vm0, %v1748_v50  ;;  %vm822_vm1 = vcmask (!%p212_p3), 1043456   ;;  %vm818_vm2 = vcmask (!%p212_p3), 64512   ;;  %s1752_s6 = smov (!%p212_p3), 8   ;;  %s1753_s7 = smov (!%p212_p3), 24   ;;  %vm1456_vm3 = vcmask (!%p212_p3), 130048  }
   0x9   : > { %v341_v25 = vunpack.c.0.s8 (!%p212_p3), %v340_v19  ;;  %v357_v29 = vunpack.c.0.s8 (!%p212_p3), %v356_v24  ;;  %vm1458_vm4 = vcmask (!%p212_p3), 195584   ;;  %vm1460_vm5 = vcmask (!%p212_p3), 261120  }
   0xb   : > { %v1806_v30 = vsub.s32 (!%p212_p3), %v341_v25, %v343_v26  ;;  %v1808_v37 = vsub.s32 (!%p212_p3), %v357_v29, %v343_v26 }
   0xe   : > { %s1953_s15 = smov (!%p258_p4, %s1736_s15), 1 }
   0xf   : > { %s1800_s19 = sshll.u32 %s1953_s15, 5  ;;  %s1586_s8 = sshll.u32 %s1953_s15, 3 }
  0x10   : > { %s273_s22 = scalar_lea.vmem %s1944_s1, %s1800_s19  ;;  %s265_s25 = scalar_lea.vmem %s1943_s0, %s1800_s19 }
  0x11   : > { %v308_v0 = vld [vmem:[%s273_s22 + $0x8] sm:$0xf]  ;;  %v306_v1 = vld [vmem:[%s273_s22] sm:$0xf]  ;;  %v309_v2 = vld [vmem:[%s273_s22 + $0xc] sm:$0xf]  ;;  %s281_s30 = scalar_lea.vmem %s1945_s2, %s1800_s19  ;;  %s288_s11 = scalar_lea.vmem %s1947_s4, %s1586_s8 }
  0x12   : > { %v316_v3 = vpack.c.bf16 %v308_v0, %v308_v0  ;;  %v314_v4 = vpack.c.bf16 %v306_v1, %v306_v1  ;;  %v307_v5 = vld [vmem:[%s273_s22 + $0x4] sm:$0xf]  ;;  %v317_v6 = vpack.c.bf16 %v309_v2, %v309_v2  ;;  %v311_v8 = vld [vmem:[%s273_s22 + $0x14] sm:$0xf]  ;;  %v310_v9 = vld [vmem:[%s273_s22 + $0x10] sm:$0xf] }
  0x13   : > { %v315_v7 = vpack.c.bf16 %v307_v5, %v307_v5  ;;  %v319_v10 = vpack.c.bf16 %v311_v8, %v311_v8  ;;  %v318_v11 = vpack.c.bf16 %v310_v9, %v310_v9  ;;  %v313_v12 = vld [vmem:[%s273_s22 + $0x1c] sm:$0xf]  ;;  %v312_v13 = vld [vmem:[%s273_s22 + $0x18] sm:$0xf]  ;;  %v290_v9 = vld [vmem:[%s265_s25] sm:$0xf] }
  0x14   : > { %432 = vxpose.xlu1.c.b16.start.end [1/1] (short) (narrow) %v316_v3, 16  ;;  %400 = vxpose.xlu0.c.b16.start.end [1/1] (short) (narrow) %v314_v4, 16  ;;  %v321_v14 = vpack.c.bf16 %v313_v12, %v313_v12  ;;  %v320_v15 = vpack.c.bf16 %v312_v13, %v312_v13  ;;  %v292_v12 = vld [vmem:[%s265_s25 + $0x8] sm:$0xf]  ;;  %v293_v13 = vld [vmem:[%s265_s25 + $0xc] sm:$0xf] }
  0x18   : > { %448 = vxpose.xlu1.c.b16.start.end [1/1] (short) (narrow) %v317_v6, 16  ;;  %416 = vxpose.xlu0.c.b16.start.end [1/1] (short) (narrow) %v315_v7, 16 }
  0x1c   : > { %480 = vxpose.xlu1.c.b16.start.end [1/1] (short) (narrow) %v319_v10, 16  ;;  %464 = vxpose.xlu0.c.b16.start.end [1/1] (short) (narrow) %v318_v11, 16  ;;  %v291_v10 = vld [vmem:[%s265_s25 + $0x4] sm:$0xf] }
  0x20   : > { %512 = vxpose.xlu1.c.b16.start.end [1/1] (short) (narrow) %v321_v14, 16  ;;  %496 = vxpose.xlu0.c.b16.start.end [1/1] (short) (narrow) %v320_v15, 16  ;;  %v294_v14 = vld [vmem:[%s265_s25 + $0x10] sm:$0xf]  ;;  %v295_v15 = vld [vmem:[%s265_s25 + $0x14] sm:$0xf] }
  0x21   : > { %v1587_v20 = vpack.c.bf16 %v294_v14, %v290_v9 }
  0x23   : > { %v345_v26 = vrot.slane %v1587_v20, %v1806_v30 }
  0x7a   : > { %v440_v16 = vpop.trf.xlu1  ;;  %v408_v17 = vpop.trf.xlu0 }
  0x7e   : > { %v456_v21 = vpop.trf.xlu1  ;;  %v424_v22 = vpop.trf.xlu0 }
  0x82   : > { %v488_v27 = vpop.trf.xlu1  ;;  %v472_v28 = vpop.trf.xlu0 }
  0x83   : > { %v562_v31 = vcombine.low %v424_v22, %v488_v27  ;;  %v528_v32 = vcombine.low %v408_v17, %v472_v28  ;;  %v297_v17 = vld [vmem:[%s265_s25 + $0x1c] sm:$0xf]  ;;  %v1589_v22 = vpack.c.bf16 %v295_v15, %v291_v10 }
  0x84   : > { %v1590_v23 = vpack.c.bf16 %v297_v17, %v293_v13  ;;  %v1008_v13 = vld [vmem:[%s1946_s3] sm:$0xff] }
  0x85   : > { %v569_v38 = vrot.slane %v562_v31, %v1806_v30  ;;  %v535_v39 = vrot.slane %v528_v32, %v1806_v30  ;;  %v370_v28 = vrot.slane %v1589_v22, %v1806_v30 }
  0x86   : > { %v520_v33 = vpop.trf.xlu1  ;;  %v504_v34 = vpop.trf.xlu0  ;;  %v378_v29 = vrot.slane %v1590_v23, %v1806_v30 }
  0x87   : > { %v570_v35 = vcombine.low %v456_v21, %v520_v33  ;;  %v536_v36 = vcombine.low %v440_v16, %v504_v34  ;;  %v296_v16 = vld [vmem:[%s265_s25 + $0x18] sm:$0xf] }
  0x88   : > { %v1588_v21 = vpack.c.bf16 %v296_v16, %v292_v12 }
  0x89   : > { %v577_v40 = vrot.slane %v570_v35, %v1806_v30  ;;  %v543_v41 = vrot.slane %v536_v36, %v1806_v30 }
  0x8a   : > { %v353_v27 = vrot.slane %v1588_v21, %v1806_v30 }
  0x8b   : > { %v578_v42 = vcombine.low %v569_v38, %v577_v40  ;;  %v579_v43 = vcombine.high %v569_v38, %v577_v40  ;;  %v544_v44 = vcombine.low %v535_v39, %v543_v41  ;;  %v545_v45 = vcombine.high %v535_v39, %v543_v41 }
  0x8c   : > { %v354_v36 = vcombine.low %v345_v26, %v353_v27  ;;  %v379_v38 = vcombine.low %v370_v28, %v378_v29 }
  0x8d   : > { %v552_v46 = vrot.slane %v544_v44, %v1808_v37  ;;  %v586_v47 = vrot.slane %v578_v42, %v1808_v37  ;;  %v559_v48 = vrot.slane %v545_v45, %v1808_v37  ;;  %v593_v49 = vrot.slane %v579_v43, %v1808_v37 }
  0x8e   : > { %v361_v45 = vrot.slane %v354_v36, %v1808_v37 }
  0x8f   : > { %v598_v51 = vpack.i.b16 %v586_v47, %v552_v46  ;;  %v600_v52 = vshrl.u32 %v552_v46, 16  ;;  %v601_v53 = vshrl.u32 %v586_v47, 16  ;;  %v616_v54 = vshrl.u32 %v559_v48, 16 }
  0x90   : > { %v617_v55 = vshrl.u32 %v593_v49, 16  ;;  %v560_v58 = vcombine.high %v552_v46, %v1749_v57  ;;  %v594_v59 = vcombine.high %v586_v47, %v1749_v57  ;;  %v614_v60 = vpack.i.b16 %v593_v49, %v559_v48 }
  0x91   : > { %628 = vxpose.xlu0.c.b16.start.end [1/1] (short) (narrow) %v598_v51, 16  ;;  %v602_v56 = vpack.i.b16 %v601_v53, %v600_v52  ;;  %v561_v61 = vcombine.high %v559_v48, %v1749_v57  ;;  %v595_v1 = vcombine.high %v593_v49, %v1749_v57  ;;  %v386_v46 = vrot.slane %v379_v38, %v1808_v37 }
  0x92   : > { %v618_v62 = vpack.i.b16 %v617_v55, %v616_v54  ;;  %v608_v63 = vshrl.u32 %v560_v58, 16  ;;  %v609_v0 = vshrl.u32 %v594_v59, 16  ;;  %v606_v2 = vpack.i.b16 %v594_v59, %v560_v58 }
  0x93   : > { %644 = vxpose.xlu1.c.b16.start.end [1/1] (short) (narrow) %v602_v56, 16  ;;  %v624_v4 = vshrl.u32 %v561_v61, 16  ;;  %v625_v5 = vshrl.u32 %v595_v1, 16  ;;  %v622_v6 = vpack.i.b16 %v595_v1, %v561_v61  ;;  %v391_v52 = vshrl.u32 %v361_v45, 16 }
  0x94   : > { %v610_v3 = vpack.i.b16 %v609_v0, %v608_v63  ;;  %v392_v53 = vshrl.u32 %v386_v46, 16  ;;  %v390_v59 = vpack.i.b16 %v386_v46, %v361_v45  ;;  %v362_v1 = vcombine.high %v361_v45, %v1749_v57 }
  0x95   : > { %692 = vxpose.xlu0.c.b16.start.end [1/1] (short) (narrow) %v614_v60, 16  ;;  %v626_v7 = vpack.i.b16 %v625_v5, %v624_v4  ;;  %v387_v5 = vcombine.high %v386_v46, %v1749_v57 }
  0x97   : > { %708 = vxpose.xlu1.c.b16.start.end [1/1] (short) (narrow) %v618_v62, 16  ;;  %v398_v9 = vshrl.u32 %v387_v5, 16  ;;  %v396_v10 = vpack.i.b16 %v387_v5, %v362_v1  ;;  %v326_v5 = vld [vmem:[%s281_s30 + $0x10] sm:$0xf] }
  0x99   : > { %660 = vxpose.xlu0.c.b16.start.end [1/1] (short) (narrow) %v606_v2, 16 }
  0x9b   : > { %676 = vxpose.xlu1.c.b16.start.end [1/1] (short) (narrow) %v610_v3, 16  ;;  %v393_v3 = vpack.i.b16 %v392_v53, %v391_v52 }
  0x9d   : > { %724 = vxpose.xlu0.c.b16.start.end [1/1] (short) (narrow) %v622_v6, 16 }
  0x9f   : > { %740 = vxpose.xlu1.c.b16.start.end [1/1] (short) (narrow) %v626_v7, 16 }
  0xf7   : > { %v636_v8 = vpop.trf.xlu0 }
  0xf9   : > { %v652_v11 = vpop.trf.xlu1 }
  0xfb   : > { %v700_v18 = vpop.trf.xlu0 }
  0xfc   : > { %v756_v31 = vcombine.low %v636_v8, %v700_v18  ;;  %v397_v8 = vshrl.u32 %v362_v1, 16  ;;  %v322_v1 = vld [vmem:[%s281_s30] sm:$0xf] }
  0xfd   : > { %v716_v19 = vpop.trf.xlu1 }
  0xfe   : > { %v781_v33 = vcombine.low %v652_v11, %v716_v19  ;;  %v763_v39 = vrot.slane %v756_v31, %v1806_v30  ;;  %v399_v11 = vpack.i.b16 %v398_v9, %v397_v8  ;;  %v329_v8 = vld [vmem:[%s281_s30 + $0x1c] sm:$0xf]  ;;  %v1595_v9 = vpack.c.bf16 %v326_v5, %v322_v1 }
  0xff   : > { %v668_v24 = vpop.trf.xlu0 }
 0x100   : > { %v788_v42 = vrot.slane %v781_v33, %v1806_v30 }
 0x101   : > { %v684_v25 = vpop.trf.xlu1 }
 0x103   : > { %v732_v32 = vpop.trf.xlu0 }
 0x104   : > { %v764_v34 = vcombine.low %v668_v24, %v732_v32 }
 0x105   : > { %v748_v35 = vpop.trf.xlu1 }
 0x106   : > { %v771_v40 = vrot.slane %v764_v34, %v1806_v30  ;;  %v789_v41 = vcombine.low %v684_v25, %v748_v35 }
 0x108   : > { %v772_v43 = vcombine.low %v763_v39, %v771_v40  ;;  %v796_v44 = vrot.slane %v789_v41, %v1806_v30 }
 0x10a   : > { %v779_v47 = vrot.slane %v772_v43, %v1808_v37  ;;  %v797_v48 = vcombine.low %v788_v42, %v796_v44 }
 0x10c   : > { %v804_v49 = vrot.slane %v797_v48, %v1808_v37  ;;  %v780_v51 = vcombine.high %v779_v47, %v1749_v57  ;;  %v809_v55 = vshrl.u32 %v779_v47, 16 }
 0x10e   : > { %v808_v54 = vpack.i.b16 %v804_v49, %v779_v47  ;;  %v810_v56 = vshrl.u32 %v804_v49, 16  ;;  %v805_v58 = vcombine.high %v804_v49, %v1749_v57  ;;  %v815_v60 = vshrl.u32 %v780_v51, 16 }
 0x110   : > { %v824_v61 = vsel %vm822_vm1, %v808_v54, 0  ;;  %v811_v62 = vpack.i.b16 %v810_v56, %v809_v55  ;;  %v814_v63 = vpack.i.b16 %v805_v58, %v780_v51  ;;  %v816_v0 = vshrl.u32 %v805_v58, 16 }
 0x111   : > { %1627 = vmatpush3.bf16.msra.mxu0 %v824_v61 }
 0x112   : > { %v870_v2 = vsel %vm822_vm1, %v811_v62, 0  ;;  %1638 = vmatprep.subr.bf16.mxu0 %v1748_v50  ;;  %v817_v4 = vpack.i.b16 %v816_v0, %v815_v60  ;;  %v916_v6 = vsel %vm822_vm1, %v814_v63, 0 }
 0x113   : > { %1633 = vmatpush3.bf16.msra.mxu1 %v870_v2  ;;  %v323_v2 = vld [vmem:[%s281_s30 + $0x4] sm:$0xf] }
 0x114   : > { %1629 = vmatmul.mubr.msk.bf16.vlgmr.msra.gmra.mrb[0].mxu0 %vm818_vm2, %v390_v59  ;;  %1644 = vmatprep.subr.bf16.mxu1 %v1748_v50  ;;  %v962_v7 = vsel %vm822_vm1, %v817_v4, 0  ;;  %v325_v4 = vld [vmem:[%s281_s30 + $0xc] sm:$0xf] }
 0x115   : > { %1639 = vmatpush3.bf16.msra.mxu0 %v916_v6  ;;  %1640 = vmatprep.mubr.msk.bf16.mxu0 %vm1750_vm0, %v1748_v50  ;;  %v327_v6 = vld [vmem:[%s281_s30 + $0x14] sm:$0xf] }
 0x116   : > { %1635 = vmatmul.mubr.msk.bf16.vlgmr.msra.gmra.mrb[0].mxu1 %vm818_vm2, %v393_v3  ;;  %1650 = vmatprep.subr.bf16.mxu0 %v1748_v50  ;;  %v324_v3 = vld [vmem:[%s281_s30 + $0x8] sm:$0xf] }
 0x117   : > { %1645 = vmatpush3.bf16.msra.mxu1 %v962_v7  ;;  %1646 = vmatprep.mubr.msk.bf16.mxu1 %vm1750_vm0, %v1748_v50  ;;  %v328_v7 = vld [vmem:[%s281_s30 + $0x18] sm:$0xf] }
 0x118   : > { %1656 = vmatprep.subr.bf16.mxu1 %v1748_v50 }
 0x11c   : > { %1641 = vmatmul.mubr.msk.bf16.vlgmr.msra.gmra.mrb[4].mxu0 %vm818_vm2, %v396_v10  ;;  %v1597_v10 = vpack.c.bf16 %v327_v6, %v323_v2 }
 0x11d   : > { %1652 = vmatprep.mubr.msk.bf16.mxu0 %vm1750_vm0, %v1748_v50 }
 0x11e   : > { %1647 = vmatmul.mubr.msk.bf16.vlgmr.msra.gmra.mrb[4].mxu1 %vm818_vm2, %v399_v11  ;;  %v1596_v11 = vpack.c.bf16 %v328_v7, %v324_v3 }
 0x11f   : > { %1658 = vmatprep.mubr.msk.bf16.mxu1 %vm1750_vm0, %v1748_v50 }
 0x1e7   : > { %v860_v12 = vpop.f32.mrb[0].mxu0 }
 0x1e8   : > { %v1004_v14 = vmul.f32 0.35355338, %v860_v12  ;;  %v1630_v15 = vpop.f32.mrb[1].mxu0  ;;  %v1598_v12 = vpack.c.bf16 %v329_v8, %v325_v4 }
 0x1e9   : > { %v863_v16 = vpop.f32.mrb[2].mxu0  ;;  %v906_v17 = vpop.f32.mrb[0].mxu1  ;;  %v1076_v15 = vrot.slane %v1596_v11, %v1806_v30 }
 0x1ea   : > { %v1005_v18 = vmul.f32 0.35355338, %v906_v17  ;;  %v1631_v19 = vpop.f32.mrb[3].mxu0  ;;  %v1636_v20 = vpop.f32.mrb[1].mxu1  ;;  %v1009_v21 = vadd.f32 %v1008_v13, %v1004_v14  ;;  %v1093_v14 = vrot.slane %v1597_v10, %v1806_v30  ;;  %v1101_v16 = vrot.slane %v1598_v12, %v1806_v30 }
 0x1eb   : > { %v909_v22 = vpop.f32.mrb[2].mxu1 }
 0x1ec   : > { %v1637_v23 = vpop.f32.mrb[3].mxu1  ;;  %v1013_v24 = vsel %vm818_vm2, %v1009_v21, -inf  ;;  %v1010_v25 = vadd.f32 %v1008_v13, %v1005_v18  ;;  %v1102_v18 = vcombine.low %v1093_v14, %v1101_v16 }
 0x1ed   : > { %1014 = vmax.xlane.f32.xlu0 %v1013_v24 }
 0x1ee   : > { %v1016_v26 = vsel %vm818_vm2, %v1010_v25, -inf  ;;  %v1109_v20 = vrot.slane %v1102_v18, %v1808_v37 }
 0x1ef   : > { %1017 = vmax.xlane.f32.xlu1 %v1016_v26  ;;  %v952_v27 = vpop.f32.mrb[4].mxu0 }
 0x1f0   : > { %v1006_v28 = vmul.f32 0.35355338, %v952_v27  ;;  %v1642_v29 = vpop.f32.mrb[5].mxu0  ;;  %v1115_v23 = vshrl.u32 %v1109_v20, 16 }
 0x1f1   : > { %v955_v31 = vpop.f32.mrb[6].mxu0  ;;  %v998_v32 = vpop.f32.mrb[4].mxu1 }
 0x1f2   : > { %v1007_v33 = vmul.f32 0.35355338, %v998_v32  ;;  %v1643_v34 = vpop.f32.mrb[7].mxu0  ;;  %v1648_v35 = vpop.f32.mrb[5].mxu1  ;;  %v1011_v36 = vadd.f32 %v1008_v13, %v1006_v28  ;;  %v1110_v28 = vcombine.high %v1109_v20, %v1749_v57 }
 0x1f3   : > { %v1001_v38 = vpop.f32.mrb[6].mxu1 }
 0x1f4   : > { %v1649_v39 = vpop.f32.mrb[7].mxu1  ;;  %v1019_v40 = vsel %vm818_vm2, %v1011_v36, -inf  ;;  %v1012_v41 = vadd.f32 %v1008_v13, %v1007_v33  ;;  %v1068_v13 = vrot.slane %v1595_v9, %v1806_v30  ;;  %v1121_v32 = vshrl.u32 %v1110_v28, 16 }
 0x1f5   : > { %1020 = vmax.xlane.f32.xlu0 %v1019_v40 }
 0x1f6   : > { %v1022_v42 = vsel %vm818_vm2, %v1012_v41, -inf  ;;  %v1077_v17 = vcombine.low %v1068_v13, %v1076_v15 }
 0x1f7   : > { %1023 = vmax.xlane.f32.xlu1 %v1022_v42 }
 0x1f8   : > { %v1084_v19 = vrot.slane %v1077_v17, %v1808_v37 }
 0x1fa   : > { %v1114_v22 = vshrl.u32 %v1084_v19, 16  ;;  %v1085_v27 = vcombine.high %v1084_v19, %v1749_v57 }
 0x1fc   : > { %v1119_v29 = vpack.i.b16 %v1110_v28, %v1085_v27  ;;  %v1120_v31 = vshrl.u32 %v1085_v27, 16 }
 0x1fe   : > { %v1122_v33 = vpack.i.b16 %v1121_v32, %v1120_v31 }
 0x27a   : > { %v1015_v43 = vpop.xlane.xlu0 %1014 }
 0x27b   : > { %v1025_v44 = vsub.f32 %v1009_v21, %v1015_v43  ;;  %v1113_v21 = vpack.i.b16 %v1109_v20, %v1084_v19  ;;  %v1219_v43 = vsel %vm822_vm1, %v1119_v29, 0 }
 0x27c   : > { %v1018_v45 = vpop.xlane.xlu1 %1017 }
 0x27d   : > { %v1029_v46 = vmul.f32 1.442695, %v1025_v44  ;;  %v1026_v47 = vsub.f32 %v1010_v25, %v1018_v45  ;;  %v1127_v24 = vsel %vm822_vm1, %v1113_v21, 0  ;;  %v1116_v25 = vpack.i.b16 %v1115_v23, %v1114_v22 }
 0x27e   : > { %1651 = vmatpush3.bf16.msra.mxu0 %v1127_v24  ;;  %v1265_v45 = vsel %vm822_vm1, %v1122_v33, 0 }
 0x27f   : > { %1706 = vpow2.f32 %v1029_v46  ;;  %v1031_v48 = vmul.f32 1.442695, %v1026_v47  ;;  %v1173_v26 = vsel %vm822_vm1, %v1116_v25, 0  ;;  %1662 = vmatprep.subr.bf16.mxu0 %v1748_v50 }
 0x280   : > { %1657 = vmatpush3.bf16.msra.mxu1 %v1173_v26 }
 0x281   : > { %1708 = vpow2.f32 %v1031_v48  ;;  %1668 = vmatprep.subr.bf16.mxu1 %v1748_v50 }
 0x282   : > { %v1021_v49 = vpop.xlane.xlu0 %1020 }
 0x283   : > { %v1027_v51 = vsub.f32 %v1011_v36, %v1021_v49 }
 0x284   : > { %v1024_v52 = vpop.xlane.xlu1 %1023 }
 0x285   : > { %v1033_v53 = vmul.f32 1.442695, %v1027_v51  ;;  %v1028_v54 = vsub.f32 %v1012_v41, %v1024_v52 }
 0x287   : > { %1710 = vpow2.f32 %v1033_v53  ;;  %v1035_v55 = vmul.f32 1.442695, %v1028_v54 }
 0x289   : > { %v1707_v56 = vpop.eup %1706  ;;  %1712 = vpow2.f32 %v1035_v55 }
 0x28a   : > { %v1037_v58 = vsel %vm818_vm2, %v1707_v56, 0.0 }
 0x28b   : > { %v1709_v59 = vpop.eup %1708  ;;  %1038 = vadd.xlane.f32.xlu0 %v1037_v58 }
 0x28c   : > { %v1040_v60 = vsel %vm818_vm2, %v1709_v59, 0.0 }
 0x28d   : > { %1041 = vadd.xlane.f32.xlu1 %v1040_v60 }
 0x291   : > { %v1877_v61 = vpop.eup %1710 }
 0x292   : > { %v1043_v62 = vsel %vm818_vm2, %v1877_v61, 0.0 }
 0x293   : > { %v1881_v63 = vpop.eup %1712  ;;  %1044 = vadd.xlane.f32.xlu0 %v1043_v62 }
 0x294   : > { %v1046_v0 = vsel %vm818_vm2, %v1881_v63, 0.0 }
 0x295   : > { %1047 = vadd.xlane.f32.xlu1 %v1046_v0 }
 0x318   : > { %v1039_v34 = vpop.xlane.xlu0 %1038 }
 0x319   : > { %1714 = vrcp.f32 %v1039_v34 }
 0x31a   : > { %v1042_v35 = vpop.xlane.xlu1 %1041 }
 0x31b   : > { %1716 = vrcp.f32 %v1042_v35 }
 0x320   : > { %v1045_v36 = vpop.xlane.xlu0 %1044 }
 0x321   : > { %1718 = vrcp.f32 %v1045_v36 }
 0x322   : > { %v1048_v38 = vpop.xlane.xlu1 %1047 }
 0x323   : > { %v1715_v39 = vpop.eup %1714  ;;  %1720 = vrcp.f32 %v1048_v38 }
 0x324   : > { %v1053_v40 = vmul.f32 %v1715_v39, %v1707_v56 }
 0x325   : > { %v1717_v41 = vpop.eup %1716 }
 0x326   : > { %v1054_v42 = vmul.f32 %v1717_v41, %v1709_v59  ;;  %v1057_v57 = vpack.c.bf16 %v1053_v40, %v1053_v40 }
 0x328   : > { %1653 = vmatmul.mubr.msk.bf16.vlgmr.msra.gmra.mrb[8].mxu0 %vm818_vm2, %v1057_v57  ;;  %v1058_v44 = vpack.c.bf16 %v1054_v42, %v1054_v42 }
 0x329   : > { %1663 = vmatpush3.bf16.msra.mxu0 %v1219_v43  ;;  %1664 = vmatprep.mubr.msk.bf16.mxu0 %vm1750_vm0, %v1748_v50 }
 0x32a   : > { %1659 = vmatmul.mubr.msk.bf16.vlgmr.msra.gmra.mrb[8].mxu1 %vm818_vm2, %v1058_v44 }
 0x32b   : > { %v1719_v46 = vpop.eup %1718  ;;  %1669 = vmatpush3.bf16.msra.mxu1 %v1265_v45  ;;  %1670 = vmatprep.mubr.msk.bf16.mxu1 %vm1750_vm0, %v1748_v50 }
 0x32c   : > { %v1055_v47 = vmul.f32 %v1719_v46, %v1877_v61 }
 0x32d   : > { %v1721_v48 = vpop.eup %1720 }
 0x32e   : > { %v1056_v49 = vmul.f32 %v1721_v48, %v1881_v63  ;;  %v1059_v51 = vpack.c.bf16 %v1055_v47, %v1055_v47 }
 0x330   : > { %1665 = vmatmul.mubr.msk.bf16.vlgmr.msra.gmra.mrb[12].mxu0 %vm818_vm2, %v1059_v51  ;;  %v1060_v52 = vpack.c.bf16 %v1056_v49, %v1056_v49 }
 0x332   : > { %1671 = vmatmul.mubr.msk.bf16.vlgmr.msra.gmra.mrb[12].mxu1 %vm818_vm2, %v1060_v52 }
 0x3fb   : > { %v1163_v53 = vpop.f32.mrb[8].mxu0 }
 0x3fc   : > { %v1654_v54 = vpop.f32.mrb[9].mxu0 }
 0x3fd   : > { %v1166_v55 = vpop.f32.mrb[10].mxu0  ;;  %v1209_v56 = vpop.f32.mrb[8].mxu1 }
 0x3fe   : > { %v1655_v58 = vpop.f32.mrb[11].mxu0  ;;  %v1660_v59 = vpop.f32.mrb[9].mxu1 }
 0x3ff   : > { %v1212_v60 = vpop.f32.mrb[10].mxu1 }
 0x400   : > { %v1661_v62 = vpop.f32.mrb[11].mxu1 }
 0x403   : > { %v1255_v50 = vpop.f32.mrb[12].mxu0 }
 0x404   : > { %v1307_v0 = vcombine.low %v1163_v53, %v1255_v50  ;;  %v1308_v61 = vcombine.high %v1163_v53, %v1255_v50  ;;  %v1666_v1 = vpop.f32.mrb[13].mxu0 }
 0x405   : > { %v1258_v2 = vpop.f32.mrb[14].mxu0  ;;  %v1301_v63 = vpop.f32.mrb[12].mxu1 }
 0x406   : > { %v1323_v3 = vcombine.low %v1209_v56, %v1301_v63  ;;  %v1324_v4 = vcombine.high %v1209_v56, %v1301_v63  ;;  %v1667_v5 = vpop.f32.mrb[15].mxu0  ;;  %v1672_v6 = vpop.f32.mrb[13].mxu1  ;;  %v1315_v8 = vrot.slane %v1307_v0, %v1806_v30  ;;  %v1322_v9 = vrot.slane %v1308_v61, %v1806_v30 }
 0x407   : > { %v1304_v7 = vpop.f32.mrb[14].mxu1 }
 0x408   : > { %v1331_v10 = vrot.slane %v1323_v3, %v1806_v30  ;;  %v1338_v11 = vrot.slane %v1324_v4, %v1806_v30  ;;  %v1673_v12 = vpop.f32.mrb[15].mxu1 }
 0x40a   : > { %v1339_v13 = vcombine.low %v1315_v8, %v1331_v10  ;;  %v1340_v14 = vcombine.high %v1315_v8, %v1331_v10  ;;  %v1355_v15 = vcombine.low %v1322_v9, %v1338_v11  ;;  %v1356_v16 = vcombine.high %v1322_v9, %v1338_v11 }
 0x40c   : > { %v1347_v17 = vrot.slane %v1339_v13, %v1808_v37  ;;  %v1354_v18 = vrot.slane %v1340_v14, %v1808_v37  ;;  %v1363_v19 = vrot.slane %v1355_v15, %v1808_v37  ;;  %v1370_v20 = vrot.slane %v1356_v16, %v1808_v37 }
 0x40e   : > { %v1375_v21 = vcombine.low %v1347_v17, %v1354_v18  ;;  %v1603_v22 = vcombine.high %v1347_v17, %v1354_v18  ;;  %v1391_v23 = vcombine.low %v1363_v19, %v1370_v20  ;;  %v1604_v24 = vcombine.high %v1363_v19, %v1370_v20 }
 0x410   : > { %v1382_v25 = vrot.slane %v1375_v21, %v1806_v30  ;;  %v1390_v26 = vrot.slane %v1603_v22, %v1806_v30  ;;  %v1398_v27 = vrot.slane %v1391_v23, %v1806_v30  ;;  %v1406_v28 = vrot.slane %v1604_v24, %v1806_v30 }
 0x412   : > { %v1408_v29 = vcombine.high %v1382_v25, %v1390_v26  ;;  %v1424_v31 = vcombine.high %v1398_v27, %v1406_v28  ;;  %v1407_v32 = vcombine.low %v1382_v25, %v1390_v26  ;;  %v1423_v33 = vcombine.low %v1398_v27, %v1406_v28 }
 0x414   : > { %v1422_v34 = vrot.slane %v1408_v29, %v1808_v37  ;;  %v1438_v35 = vrot.slane %v1424_v31, %v1808_v37  ;;  %v1415_v36 = vrot.slane %v1407_v32, %v1808_v37  ;;  %v1431_v38 = vrot.slane %v1423_v33, %v1808_v37 }
 0x416   : > { %v1441_v39 = vcombine.low %v1422_v34, %v1438_v35  ;;  %v1440_v40 = vcombine.high %v1415_v36, %v1431_v38  ;;  %v1442_v41 = vcombine.high %v1422_v34, %v1438_v35  ;;  %v1439_v42 = vcombine.low %v1415_v36, %v1431_v38 }
 0x418   : > { %1448 = vrot.lane.b32.xlu1 %v1441_v39, %s1751_s5  ;;  %1444 = vrot.lane.b32.xlu0 %v1440_v40, %s1752_s6 }
 0x41c   : > { %1452 = vrot.lane.b32.xlu1 %v1442_v41, %s1753_s7 }
 0x48a   : > { %v1449_v30 = vpop.permute.xlu1 %1448  ;;  %v1445_v57 = vpop.permute.xlu0 %1444 }
 0x48b   : > { %v1455_v43 = vsel %vm818_vm2, %v1439_v42, %v1445_v57 }
 0x48c   : > { %v1457_v44 = vsel %vm1456_vm3, %v1455_v43, %v1449_v30 }
 0x48e   : > { %v1453_v37 = vpop.permute.xlu1 %1452 }
 0x48f   : > { %v1459_v45 = vsel %vm1458_vm4, %v1457_v44, %v1453_v37 }
 0x490   : > { %1461 = vst.msk [vmem:[%s288_s11] sm:$0xff] %vm1460_vm5, %v1459_v45 }
 0x491 PF: > { %s14_s17 = sadd.s32 1, %s1744_s17   ;;  %s1948_s15 = smov %s1740_s16 }
 0x492   : > { %p11_p5 = scmp.ge.s32.totalorder %s14_s17, 4   ;;  %s1949_s16 = smov %s1951_s18 }
 0x494   :  { %13 = sbr.rel (!%p11_p5) target bundleno = 2 (0x2), region = 72 }

// kernel: decoder_forward.26
= control target key start
LH: loop header
LB: loop body
LE: loop exit
PB: predicated region body
PF: predicated region fallthrough
CT: control target
= control target key end

     0   :  { %vm30_vm0 = vcmask 261120   ;;  %v177_v17 = vmov 0.0   ;;  %vm178_vm1 = vmmov 0   ;;  %vm25_vm2 = vcmask 523264   ;;  %s253_s0 = inlined_call_operand.vmem [shape: f32[16,32], index: 0, kind: input, shape index: {}]   ;;  %s254_s1 = inlined_call_operand.vmem [shape: f32[32,64], index: 1, kind: input, shape index: {}]   ;;  %s255_s2 = inlined_call_operand.vmem [shape: f32[1,32], index: 2, kind: input, shape index: {}]   ;;  %s256_s3 = inlined_call_operand.vmem [shape: f32[1,32], index: 3, kind: input, shape index: {}]   ;;  %s257_s4 = inlined_call_operand.vmem [shape: f32[1,64], index: 4, kind: input, shape index: {}]   ;;  %s258_s5 = inlined_call_operand.vmem [shape: f32[16,64], index: 5, kind: output, shape index: {}]  }
   0x1   :  { %v28_v0 = vld [vmem:[%s253_s0] sm:$0xff]  ;;  %v29_v1 = vld [vmem:[%s253_s0 + $0x8] sm:$0xff]  ;;  %163 = vmatprep.subr.bf16.mxu0 %v177_v17  ;;  %v81_v18 = vld [vmem:[%s254_s1 + $0x10] sm:$0xff]  ;;  %167 = vmatprep.mubr.msk.bf16.mxu0 %vm178_vm1, %v177_v17  ;;  %26 = vst.msk [vmem:[#allocation2] sm:$0xff] %vm25_vm2, %v177_v17 }
   0x2   :  { %v31_v2 = vsel %vm30_vm0, %v28_v0, 0.0  ;;  %v34_v3 = vsel %vm30_vm0, %v29_v1, 0.0  ;;  %v79_v14 = vld [vmem:[%s254_s1] sm:$0xff]  ;;  %v80_v15 = vld [vmem:[%s254_s1 + $0x8] sm:$0xff]  ;;  %v82_v19 = vld [vmem:[%s254_s1 + $0x18] sm:$0xff]  ;;  %27 = vst.msk [vmem:[#allocation2 + $0x8] sm:$0xff] %vm25_vm2, %v177_v17 }
   0x3   :  { %32 = vadd.xlane.f32.xlu0 %v31_v2  ;;  %v83_v16 = vpack.c.bf16 %v80_v15, %v79_v14  ;;  %v84_v20 = vpack.c.bf16 %v82_v19, %v81_v18  ;;  %v156_v29 = vld [vmem:[%s255_s2] ss:$0 sm:$0xff] }
   0x4   :  { %v157_v33 = vld [vmem:[%s256_s3] ss:$0 sm:$0xff] }
   0x5   :  { %164 = vmatpush3.bf16.msra.mxu0 %v83_v16  ;;  %v159_v46 = vld [vmem:[%s257_s4] ss:$0 sm:$0xff] }
   0x6   :  { %165 = vmatprep.subr.bf16.mxu0 %v177_v17 }
   0x7   :  { %35 = vadd.xlane.f32.xlu0 %v34_v3 }
   0x8   :  { %v76_v38 = vld [vmem:[#allocation2] sm:$0xff] }
   0x9   :  { %166 = vmatpush3.bf16.msra.mxu0 %v84_v20  ;;  %v77_v40 = vld [vmem:[#allocation2 + $0x8] sm:$0xff] }
  0x90   :  { %v33_v4 = vpop.xlane.xlu0 %32 }
  0x91   :  { %v38_v5 = vmul.f32 0.03125, %v33_v4 }
  0x93   :  { %v40_v6 = vsub.f32 %v28_v0, %v38_v5 }
  0x94   :  { %v36_v7 = vpop.xlane.xlu0 %35 }
  0x95   :  { %v39_v8 = vmul.f32 0.03125, %v36_v7  ;;  %v42_v9 = vmul.f32 %v40_v6, %v40_v6 }
  0x97   :  { %v41_v10 = vsub.f32 %v29_v1, %v39_v8  ;;  %v44_v11 = vsel %vm30_vm0, %v42_v9, 0.0 }
  0x98   :  { %45 = vadd.xlane.f32.xlu1 %v44_v11 }
  0x99   :  { %v43_v12 = vmul.f32 %v41_v10, %v41_v10 }
  0x9b   :  { %v47_v13 = vsel %vm30_vm0, %v43_v12, 0.0 }
  0x9c   :  { %48 = vadd.xlane.f32.xlu1 %v47_v13 }
 0x125   :  { %v46_v21 = vpop.xlane.xlu1 %45 }
 0x126   :  { %v50_v22 = vmul.f32 0.03125, %v46_v21 }
 0x128   :  { %v52_v23 = vadd.f32 1e-05, %v50_v22 }
 0x129   :  { %v49_v24 = vpop.xlane.xlu1 %48 }
 0x12a   :  { %173 = vrsqrt.f32 %v52_v23  ;;  %v51_v25 = vmul.f32 0.03125, %v49_v24 }
 0x12c   :  { %v53_v26 = vadd.f32 1e-05, %v51_v25 }
 0x12e   :  { %175 = vrsqrt.f32 %v53_v26 }
 0x134   :  { %v174_v27 = vpop.eup %173 }
 0x135   :  { %v56_v28 = vmul.f32 %v174_v27, %v40_v6 }
 0x137   :  { %v65_v32 = vmul.f32 %v156_v29, %v56_v28 }
 0x138   :  { %v176_v30 = vpop.eup %175 }
 0x139   :  { %v57_v31 = vmul.f32 %v176_v30, %v41_v10  ;;  %v74_v35 = vadd.f32 %v157_v33, %v65_v32 }
 0x13b   :  { %v66_v34 = vmul.f32 %v156_v29, %v57_v31 }
 0x13d   :  { %v75_v36 = vadd.f32 %v157_v33, %v66_v34 }
 0x13f   :  { %v78_v37 = vpack.c.bf16 %v75_v36, %v74_v35 }
 0x141   :  { %168 = vmatmul.mubr.msk.bf16.vlgmr.msra.gmra.mrb[0].mxu0 %vm30_vm0, %v78_v37 }
 0x214   :  { %v122_v39 = vpop.f32.mrb[0].mxu0 }
 0x215   :  { %v129_v41 = vadd.f32 %v122_v39, %v76_v38  ;;  %v169_v42 = vpop.f32.mrb[1].mxu0 }
 0x216   :  { %v125_v43 = vpop.f32.mrb[2].mxu0 }
 0x217   :  { %132 = vst.msk [vmem:[#allocation2] sm:$0xff] %vm25_vm2, %v129_v41  ;;  %v130_v44 = vadd.f32 %v125_v43, %v77_v40  ;;  %v170_v45 = vpop.f32.mrb[3].mxu0 }
 0x219   :  { %133 = vst.msk [vmem:[#allocation2 + $0x8] sm:$0xff] %vm25_vm2, %v130_v44 }
 0x21e   :  { %v137_v47 = vld [vmem:[#allocation2] sm:$0xff] }
 0x21f   :  { %v146_v48 = vadd.f32 %v159_v46, %v137_v47 }
 0x220   :  { %v138_v49 = vld [vmem:[#allocation2 + $0x8] sm:$0xff] }
 0x221   :  { %v148_v50 = vmax.f32 %v146_v48, 0.0  ;;  %v147_v51 = vadd.f32 %v159_v46, %v138_v49 }
 0x223   :  { %150 = vst.msk [vmem:[%s258_s5] sm:$0xff] %vm25_vm2, %v148_v50  ;;  %v149_v52 = vmax.f32 %v147_v51, 0.0 }
 0x225   :  { %151 = vst.msk [vmem:[%s258_s5 + $0x8] sm:$0xff] %vm25_vm2, %v149_v52 }

// kernel: decoder_forward.27
= control target key start
LH: loop header
LB: loop body
LE: loop exit
PB: predicated region body
PF: predicated region fallthrough
CT: control target
= control target key end

     0   :  { %vm22_vm0 = vcmask 261120   ;;  %v137_v0 = vmov 0.0   ;;  %vm138_vm1 = vmmov 0   ;;  %vm42_vm2 = vcmask 523264   ;;  %s215_s1 = inlined_call_operand.vmem [shape: f32[64,32], index: 1, kind: input, shape index: {}]   ;;  %s216_s0 = inlined_call_operand.vmem [shape: f32[16,64], index: 0, kind: input, shape index: {}]   ;;  %s217_s2 = inlined_call_operand.vmem [shape: f32[1,32], index: 2, kind: input, shape index: {}]   ;;  %s218_s3 = inlined_call_operand.vmem [shape: f32[16,32], index: 3, kind: input, shape index: {}]   ;;  %s219_s4 = inlined_call_operand.vmem [shape: f32[16,32], index: 4, kind: output, shape index: {}]  }
   0x1   :  { %123 = vmatprep.subr.bf16.mxu0 %v137_v0  ;;  %v30_v1 = vld [vmem:[%s215_s1] sm:$0xff]  ;;  %v31_v2 = vld [vmem:[%s215_s1 + $0x8] sm:$0xff]  ;;  %v32_v3 = vld [vmem:[%s215_s1 + $0x10] sm:$0xff]  ;;  %131 = vmatprep.mubr.msk.bf16.mxu0 %vm138_vm1, %v137_v0  ;;  %23 = vst.msk [vmem:[#allocation2] sm:$0xff] %vm22_vm0, %v137_v0 }
   0x2   :  { %24 = vst.msk [vmem:[#allocation2 + $0x8] sm:$0xff] %vm22_vm0, %v137_v0  ;;  %v38_v4 = vpack.c.bf16 %v31_v2, %v30_v1  ;;  %v33_v5 = vld [vmem:[%s215_s1 + $0x18] sm:$0xff]  ;;  %v34_v7 = vld [vmem:[%s215_s1 + $0x20] sm:$0xff]  ;;  %v35_v8 = vld [vmem:[%s215_s1 + $0x28] sm:$0xff] }
   0x3   :  { %v39_v6 = vpack.c.bf16 %v33_v5, %v32_v3  ;;  %v40_v9 = vpack.c.bf16 %v35_v8, %v34_v7  ;;  %v36_v10 = vld [vmem:[%s215_s1 + $0x30] sm:$0xff]  ;;  %v37_v11 = vld [vmem:[%s215_s1 + $0x38] sm:$0xff]  ;;  %v25_v13 = vld [vmem:[%s216_s0] sm:$0xff] }
   0x4   :  { %124 = vmatpush3.bf16.msra.mxu0 %v38_v4  ;;  %v41_v12 = vpack.c.bf16 %v37_v11, %v36_v10  ;;  %v26_v14 = vld [vmem:[%s216_s0 + $0x8] sm:$0xff]  ;;  %v117_v24 = vld [vmem:[%s217_s2] ss:$0 sm:$0xff] }
   0x5   :  { %125 = vmatprep.subr.bf16.mxu0 %v137_v0  ;;  %v29_v15 = vpack.c.bf16 %v26_v14, %v25_v13  ;;  %v106_v26 = vld [vmem:[%s218_s3] sm:$0xff]  ;;  %v107_v28 = vld [vmem:[%s218_s3 + $0x8] sm:$0xff] }
   0x8   :  { %126 = vmatpush3.bf16.msra.mxu0 %v39_v6  ;;  %v27_v16 = vld [vmem:[#allocation2] sm:$0xff] }
   0x9   :  { %127 = vmatprep.subr.bf16.mxu0 %v137_v0  ;;  %v28_v18 = vld [vmem:[#allocation2 + $0x8] sm:$0xff] }
   0xc   :  { %128 = vmatpush3.bf16.msra.mxu0 %v40_v9 }
   0xd   :  { %129 = vmatprep.subr.bf16.mxu0 %v137_v0 }
  0x10   :  { %130 = vmatpush3.bf16.msra.mxu0 %v41_v12 }
  0x13   :  { %132 = vmatmul.mubr.msk.bf16.vlgmr.msra.gmra.mrb[0].mxu0 %vm42_vm2, %v29_v15 }
  0xe6   :  { %v80_v17 = vpop.f32.mrb[0].mxu0 }
  0xe7   :  { %v87_v19 = vadd.f32 %v80_v17, %v27_v16  ;;  %v133_v20 = vpop.f32.mrb[1].mxu0 }
  0xe8   :  { %v83_v21 = vpop.f32.mrb[2].mxu0 }
  0xe9   :  { %90 = vst.msk [vmem:[#allocation2] sm:$0xff] %vm22_vm0, %v87_v19  ;;  %v88_v22 = vadd.f32 %v83_v21, %v28_v18  ;;  %v134_v23 = vpop.f32.mrb[3].mxu0 }
  0xeb   :  { %91 = vst.msk [vmem:[#allocation2 + $0x8] sm:$0xff] %vm22_vm0, %v88_v22 }
  0xf0   :  { %v95_v25 = vld [vmem:[#allocation2] sm:$0xff] }
  0xf1   :  { %v104_v27 = vadd.f32 %v117_v24, %v95_v25 }
  0xf2   :  { %v96_v29 = vld [vmem:[#allocation2 + $0x8] sm:$0xff] }
  0xf3   :  { %v108_v30 = vadd.f32 %v106_v26, %v104_v27  ;;  %v105_v31 = vadd.f32 %v117_v24, %v96_v29 }
  0xf5   :  { %110 = vst.msk [vmem:[%s219_s4] sm:$0xff] %vm22_vm0, %v108_v30  ;;  %v109_v32 = vadd.f32 %v107_v28, %v105_v31 }
  0xf7   :  { %111 = vst.msk [vmem:[%s219_s4 + $0x8] sm:$0xff] %vm22_vm0, %v109_v32 }

// kernel: decoder_forward.37
= control target key start
LH: loop header
LB: loop body
LE: loop exit
PB: predicated region body
PF: predicated region fallthrough
CT: control target
= control target key end

     0   :  { %vm31_vm0 = vcmask 261120   ;;  %s300_s0 = inlined_call_operand.vmem [shape: f32[16,32], index: 0, kind: input, shape index: {}]   ;;  %s301_s1 = inlined_call_operand.vmem [shape: f32[32,50], index: 1, kind: input, shape index: {}]   ;;  %s302_s2 = inlined_call_operand.vmem [shape: f32[1,32], index: 2, kind: input, shape index: {}]   ;;  %s303_s3 = inlined_call_operand.vmem [shape: f32[1,32], index: 3, kind: input, shape index: {}]   ;;  %s304_s4 = inlined_call_operand.vmem [shape: f32[1,50], index: 4, kind: input, shape index: {}]   ;;  %s305_s5 = inlined_call_operand.hbm [shape: f32[16,50], index: 5, kind: output, shape index: {}]  }
   0x1   :  { %v29_v0 = vld [vmem:[%s300_s0] sm:$0xff]  ;;  %v30_v1 = vld [vmem:[%s300_s0 + $0x8] sm:$0xff] }
   0x2   :  { %10 = vsyncpa [#allocation4], 0  ;;  %v32_v2 = vsel %vm31_vm0, %v29_v0, 0.0  ;;  %v35_v3 = vsel %vm31_vm0, %v30_v1, 0.0  ;;  %v80_v14 = vld [vmem:[%s301_s1] sm:$0xff]  ;;  %v81_v15 = vld [vmem:[%s301_s1 + $0x8] sm:$0xff] }
   0x3   :  { %33 = vadd.xlane.f32.xlu0 %v32_v2  ;;  %v84_v16 = vpack.c.bf16 %v81_v15, %v80_v14  ;;  %v215_v17 = vmov 0.0   ;;  %v82_v18 = vld [vmem:[%s301_s1 + $0x10] sm:$0xff]  ;;  %v83_v19 = vld [vmem:[%s301_s1 + $0x18] sm:$0xff]  ;;  %vm216_vm1 = vmmov 0   ;;  %vm26_vm2 = vcmask 408576   ;;  %s217_s7 = smov [#allocation3]  }
   0x4   :  { %174 = vmatprep.subr.bf16.mxu0 %v215_v17  ;;  %v85_v20 = vpack.c.bf16 %v83_v19, %v82_v18  ;;  %178 = vmatprep.mubr.msk.bf16.mxu0 %vm216_vm1, %v215_v17  ;;  %27 = vst.msk [vmem:[#allocation2] sm:$0xff] %vm26_vm2, %v215_v17  ;;  %28 = vst.msk [vmem:[#allocation2 + $0x8] sm:$0xff] %vm26_vm2, %v215_v17  ;;  %v167_v29 = vld [vmem:[%s302_s2] ss:$0 sm:$0xff]  ;;  %s156_s8 = sshll.u32 %s217_s7, 4  ;;  %s157_s8 = int_to_ptr.vmem [resolvable:$true] %s156_s8 }
   0x5   :  { %175 = vmatpush3.bf16.msra.mxu0 %v84_v16  ;;  %v168_v33 = vld [vmem:[%s303_s3] ss:$0 sm:$0xff]  ;;  %s191_s9 = scalar_lea.vmem %s157_s8, 256  ;;  %p196_p1 = scmp.lt.s32.totalorder %s157_s8, %s157_s8 }
   0x6   :  { %176 = vmatprep.subr.bf16.mxu0 %v215_v17  ;;  %v170_v46 = vld [vmem:[%s304_s4] ss:$0 sm:$0xff]  ;;  %p192_p0 = scmp.ne.s32.totalorder %s157_s8, %s191_s9  ;;  %p197_p2 = scmp.lt.s32.totalorder %s191_s9, %s191_s9 }
   0x7   :  { %36 = vadd.xlane.f32.xlu0 %v35_v3 }
   0x8   :  { %p198_p3 = por %p197_p2, %p196_p1 }
   0x9   :  { %177 = vmatpush3.bf16.msra.mxu0 %v85_v20 }
   0xa   :  { %p199_p4 = pnand %p198_p3, %p192_p0 }
   0xb   :  { %v77_v38 = vld [vmem:[#allocation2] sm:$0xff]  ;;  %v78_v40 = vld [vmem:[#allocation2 + $0x8] sm:$0xff] }
  0x90   :  { %v34_v4 = vpop.xlane.xlu0 %33 }
  0x91   :  { %v39_v5 = vmul.f32 0.03125, %v34_v4 }
  0x93   :  { %v41_v6 = vsub.f32 %v29_v0, %v39_v5 }
  0x94   :  { %v37_v7 = vpop.xlane.xlu0 %36 }
  0x95   :  { %v40_v8 = vmul.f32 0.03125, %v37_v7  ;;  %v43_v9 = vmul.f32 %v41_v6, %v41_v6 }
  0x97   :  { %v42_v10 = vsub.f32 %v30_v1, %v40_v8  ;;  %v45_v11 = vsel %vm31_vm0, %v43_v9, 0.0 }
  0x98   :  { %46 = vadd.xlane.f32.xlu1 %v45_v11 }
  0x99   :  { %v44_v12 = vmul.f32 %v42_v10, %v42_v10 }
  0x9b   :  { %v48_v13 = vsel %vm31_vm0, %v44_v12, 0.0 }
  0x9c   :  { %49 = vadd.xlane.f32.xlu1 %v48_v13 }
 0x125   :  { %v47_v21 = vpop.xlane.xlu1 %46 }
 0x126   :  { %v51_v22 = vmul.f32 0.03125, %v47_v21 }
 0x128   :  { %v53_v23 = vadd.f32 1e-05, %v51_v22 }
 0x129   :  { %v50_v24 = vpop.xlane.xlu1 %49 }
 0x12a   :  { %187 = vrsqrt.f32 %v53_v23  ;;  %v52_v25 = vmul.f32 0.03125, %v50_v24 }
 0x12c   :  { %v54_v26 = vadd.f32 1e-05, %v52_v25 }
 0x12e   :  { %189 = vrsqrt.f32 %v54_v26 }
 0x134   :  { %v188_v27 = vpop.eup %187 }
 0x135   :  { %v57_v28 = vmul.f32 %v188_v27, %v41_v6 }
 0x137   :  { %v66_v32 = vmul.f32 %v167_v29, %v57_v28 }
 0x138   :  { %v190_v30 = vpop.eup %189 }
 0x139   :  { %v58_v31 = vmul.f32 %v190_v30, %v42_v10  ;;  %v75_v35 = vadd.f32 %v168_v33, %v66_v32 }
 0x13b   :  { %v67_v34 = vmul.f32 %v167_v29, %v58_v31 }
 0x13d   :  { %v76_v36 = vadd.f32 %v168_v33, %v67_v34 }
 0x13f   :  { %v79_v37 = vpack.c.bf16 %v76_v36, %v75_v35 }
 0x141   :  { %179 = vmatmul.mubr.msk.bf16.vlgmr.msra.gmra.mrb[0].mxu0 %vm31_vm0, %v79_v37 }
 0x214   :  { %v123_v39 = vpop.f32.mrb[0].mxu0 }
 0x215   :  { %v130_v41 = vadd.f32 %v123_v39, %v77_v38  ;;  %v180_v42 = vpop.f32.mrb[1].mxu0 }
 0x216   :  { %v126_v43 = vpop.f32.mrb[2].mxu0 }
 0x217   :  { %133 = vst.msk [vmem:[#allocation2] sm:$0xff] %vm26_vm2, %v130_v41  ;;  %v131_v44 = vadd.f32 %v126_v43, %v78_v40  ;;  %v181_v45 = vpop.f32.mrb[3].mxu0 }
 0x219   :  { %134 = vst.msk [vmem:[#allocation2 + $0x8] sm:$0xff] %vm26_vm2, %v131_v44 }
 0x21e   :  { %v138_v47 = vld [vmem:[#allocation2] sm:$0xff] }
 0x21f   :  { %v147_v48 = vadd.f32 %v170_v46, %v138_v47 }
 0x220   :  { %v139_v49 = vld [vmem:[#allocation2 + $0x8] sm:$0xff] }
 0x221   :  { %v148_v50 = vadd.f32 %v170_v46, %v139_v49  ;;  %149 = vst.msk [vmem:[#allocation3] sm:$0xff] %vm26_vm2, %v147_v48 }
 0x223   :  { %150 = vst.msk [vmem:[#allocation3 + $0x8] sm:$0xff] %vm26_vm2, %v148_v50 }
 0x224   :  { %202 = shalt.err (!%p199_p4)
}
 0x225   :  { %s203_s11 = scalar_lea.hbm %s305_s5, 256 }
 0x226   :  { %p204_p5 = scmp.ne.s32.totalorder %s305_s5, %s203_s11  ;;  %p207_p6 = scmp.lt.u32.totalorder %s203_s11, %s305_s5 }
 0x228   :  { %p209_p7 = pnand %p207_p6, %p204_p5 }
 0x22a   :  { %212 = shalt.err (!%p209_p7)
}
 0x22b   :  { %s218_s16 = smov 128   ;;  %s219_s17 = smov 8  }
 0x22c   :  { %162 = dma.vmem_to_hbm [thread:$0]  %s157_s8, 256, %s305_s5, [#allocation4], %s218_s16, %s218_s16, %s219_s17  }
 0x22d   :  { %213 = dma.done.wait [#allocation4], 256  }
 0x22e   :  { %214 = vsyncadd [#allocation4], 4294967040 }
 0x22f   :  { %166 = vsyncpa [#allocation4], 1 }

// kernel: decoder_forward.29
= control target key start
LH: loop header
LB: loop body
LE: loop exit
PB: predicated region body
PF: predicated region fallthrough
CT: control target
= control target key end

     0   :  { %s2162_s23 = smov 0   ;;  %s2164_s24 = smov 0   ;;  %s2405_s0 = inlined_call_operand.vmem [shape: f32[2,8,8,4], index: 0, kind: input, shape index: {}]   ;;  %s2406_s1 = inlined_call_operand.vmem [shape: f32[2,8,8,4], index: 1, kind: input, shape index: {}]   ;;  %s2407_s2 = inlined_call_operand.vmem [shape: f32[2,8,4,8], index: 2, kind: input, shape index: {}]   ;;  %s2408_s3 = inlined_call_operand.vmem [shape: f32[8,8], index: 3, kind: input, shape index: {}]   ;;  %s2409_s4 = inlined_call_operand.vmem [shape: f32[1,8], index: 4, kind: input, shape index: {}]   ;;  %s2410_s5 = inlined_call_operand.<no memory space> [shape: f32[1,1], index: 5, kind: input, shape index: {}]   ;;  %s2411_s6 = inlined_call_operand.vmem [shape: f32[2,8,32], index: 6, kind: output, shape index: {}]  }
   0x1   :  { %11 = sst [smem:[#allocation2]] %s2410_s5  ;;  %s2166_s25 = smov 0  }
   0x2 LB: > { %s29_s5 = sadd.s32 1, %s2110_s24  ;;  %p1888_p0 = scmp.ge.s32.totalorder %s2114_s25, 1  ;;  %s2114_s25 = sphi %s2166_s25, %s17_s25   ;;  %s2110_s24 = sphi %s2164_s24, %s2413_s24   ;;  %s2106_s23 = sphi %s2162_s23, %s2412_s23  }
   0x3   : > { %p31_p1 = scmp.ge.s32.totalorder %s29_s5, 2  ;;  %p262_p2 = scmp.lt.s32.totalorder %s2114_s25, 3 }
   0x5   : > { %s2415_s5 = smov (%p31_p1, %s29_s5), 0  ;;  %p263_p3 = pnand %p1888_p0, %p262_p2 }
   0x6   : > { %p313_p4 = scmp.lt.s32.totalorder (!%p263_p3), %s2106_s23, 1  ;;  %v2116_v18 = vmov (!%p263_p3), 1983009808   ;;  %v398_v20 = vlaneseq (!%p263_p3)  ;;  %v2117_v23 = vmov (!%p263_p3), 1934713408   ;;  %v2118_v29 = vmov (!%p263_p3), 0.0  }
   0x7   : > { %266 = sbr.rel (%p263_p3) target bundleno = 1347 (0x543), region = 44  ;;  %v396_v19 = vunpack.c.l.s4 (!%p263_p3), %v2116_v18  ;;  %v413_v24 = vunpack.c.l.s4 (!%p263_p3), %v2117_v23  ;;  %1948 = vmatprep.subr.bf16.mxu0 (!%p263_p3), %v2118_v29  ;;  %1954 = vmatprep.subr.bf16.mxu1 (!%p263_p3), %v2118_v29  ;;  %vm2119_vm0 = vmmov (!%p263_p3), 0   ;;  %v2120_v50 = vmov (!%p263_p3), 0   ;;  %s345_s15 = sld [smem:[#allocation2]] (!%p263_p3) }
   0x8   : > { %v399_v26 = vshrl.u32 (!%p263_p3), %v398_v20, 7  ;;  %1950 = vmatprep.mubr.msk.bf16.mxu0 (!%p263_p3), %vm2119_vm0, %v2118_v29  ;;  %1956 = vmatprep.mubr.msk.bf16.mxu1 (!%p263_p3), %vm2119_vm0, %v2118_v29  ;;  %vm836_vm1 = vcmask (!%p263_p3), 1041408   ;;  %vm832_vm2 = vcmask (!%p263_p3), 31744   ;;  %vm1219_vm3 = vcmask (!%p263_p3), 64512   ;;  %s2121_s18 = smov (!%p263_p3), 16   ;;  %s2122_s19 = smov (!%p263_p3), 8  }
   0x9   : > { %v397_v25 = vunpack.c.0.s8 (!%p263_p3), %v396_v19  ;;  %v414_v30 = vunpack.c.0.s8 (!%p263_p3), %v413_v24  ;;  %vm1386_vm4 = vcmask (!%p263_p3), 1043456   ;;  %s2123_s20 = smov (!%p263_p3), 24   ;;  %vm1765_vm5 = vcmask (!%p263_p3), 130048  }
   0xa   : > { %vm1767_vm6 = vcmask (!%p263_p3), 195584   ;;  %vm1769_vm7 = vcmask (!%p263_p3), 261120  }
   0xb   : > { %v2190_v31 = vsub.s32 (!%p263_p3), %v397_v25, %v399_v26  ;;  %v2192_v38 = vsub.s32 (!%p263_p3), %v414_v30, %v399_v26 }
   0xe   : > { %s2417_s23 = smov (!%p313_p4, %s2106_s23), 1 }
   0xf   : > { %s1921_s26 = sshll.u32 %s2417_s23, 6  ;;  %s1923_s11 = sshll.u32 %s2417_s23, 5 }
  0x10   : > { %s328_s29 = scalar_lea.vmem %s2406_s1, %s1921_s26  ;;  %s320_s8 = scalar_lea.vmem %s2405_s0, %s1921_s26 }
  0x11   : > { %v364_v0 = vld [vmem:[%s328_s29 + $0x10] sm:$0xff]  ;;  %v362_v1 = vld [vmem:[%s328_s29] sm:$0xff]  ;;  %v365_v2 = vld [vmem:[%s328_s29 + $0x18] sm:$0xff]  ;;  %s336_s14 = scalar_lea.vmem %s2407_s2, %s1923_s11  ;;  %s1895_s21 = sshll.u32 %s2417_s23, 3 }
  0x12   : > { %v372_v3 = vpack.c.bf16 %v364_v0, %v364_v0  ;;  %v370_v4 = vpack.c.bf16 %v362_v1, %v362_v1  ;;  %v363_v5 = vld [vmem:[%s328_s29 + $0x8] sm:$0xff]  ;;  %v373_v6 = vpack.c.bf16 %v365_v2, %v365_v2  ;;  %v366_v9 = vld [vmem:[%s328_s29 + $0x20] sm:$0xff]  ;;  %v369_v12 = vld [vmem:[%s328_s29 + $0x38] sm:$0xff]  ;;  %s343_s27 = scalar_lea.vmem %s2411_s6, %s1895_s21 }
  0x13   : > { %v371_v7 = vpack.c.bf16 %v363_v5, %v363_v5  ;;  %v367_v8 = vld [vmem:[%s328_s29 + $0x28] sm:$0xff]  ;;  %v374_v11 = vpack.c.bf16 %v366_v9, %v366_v9  ;;  %v368_v13 = vld [vmem:[%s328_s29 + $0x30] sm:$0xff]  ;;  %v377_v14 = vpack.c.bf16 %v369_v12, %v369_v12  ;;  %v346_v58 = vld [vmem:[%s320_s8] sm:$0xff] }
  0x14   : > { %518 = vxpose.xlu1.c.b16.start.end [1/1] (short) (narrow) %v372_v3, 16  ;;  %486 = vxpose.xlu0.c.b16.start.end [1/1] (short) (narrow) %v370_v4, 16  ;;  %v375_v10 = vpack.c.bf16 %v367_v8, %v367_v8  ;;  %v376_v15 = vpack.c.bf16 %v368_v13, %v368_v13  ;;  %v347_v59 = vld [vmem:[%s320_s8 + $0x8] sm:$0xff]  ;;  %v348_v60 = vld [vmem:[%s320_s8 + $0x10] sm:$0xff]  ;;  %v349_v61 = vld [vmem:[%s320_s8 + $0x18] sm:$0xff] }
  0x15   : > { %v350_v62 = vld [vmem:[%s320_s8 + $0x20] sm:$0xff]  ;;  %v351_v63 = vld [vmem:[%s320_s8 + $0x28] sm:$0xff]  ;;  %v352_v0 = vld [vmem:[%s320_s8 + $0x30] sm:$0xff] }
  0x16   : > { %v353_v1 = vld [vmem:[%s320_s8 + $0x38] sm:$0xff]  ;;  %v1896_v2 = vpack.c.bf16 %v350_v62, %v346_v58  ;;  %v1897_v3 = vpack.c.bf16 %v352_v0, %v348_v60  ;;  %v1898_v4 = vpack.c.bf16 %v351_v63, %v347_v59 }
  0x17   : > { %v1899_v5 = vpack.c.bf16 %v353_v1, %v349_v61 }
  0x18   : > { %534 = vxpose.xlu1.c.b16.start.end [1/1] (short) (narrow) %v373_v6, 16  ;;  %502 = vxpose.xlu0.c.b16.start.end [1/1] (short) (narrow) %v371_v7, 16  ;;  %v2212_v7 = vrot.slane %v1896_v2, %v2190_v31  ;;  %v2215_v8 = vrot.slane %v1897_v3, %v2190_v31  ;;  %v2218_v9 = vrot.slane %v1898_v4, %v2190_v31 }
  0x1a   : > { %v410_v13 = vcombine.low %v2212_v7, %v2215_v8 }
  0x1c   : > { %566 = vxpose.xlu1.c.b16.start.end [1/1] (short) (narrow) %v375_v10, 16  ;;  %550 = vxpose.xlu0.c.b16.start.end [1/1] (short) (narrow) %v374_v11, 16  ;;  %v2221_v10 = vrot.slane %v1899_v5, %v2190_v31 }
  0x20   : > { %598 = vxpose.xlu1.c.b16.start.end [1/1] (short) (narrow) %v377_v14, 16  ;;  %582 = vxpose.xlu0.c.b16.start.end [1/1] (short) (narrow) %v376_v15, 16  ;;  %v444_v14 = vcombine.low %v2218_v9, %v2221_v10 }
  0x7a   : > { %v526_v16 = vpop.trf.xlu1  ;;  %v494_v17 = vpop.trf.xlu0 }
  0x7e   : > { %v542_v21 = vpop.trf.xlu1  ;;  %v510_v22 = vpop.trf.xlu0 }
  0x82   : > { %v574_v27 = vpop.trf.xlu1  ;;  %v558_v28 = vpop.trf.xlu0 }
  0x83   : > { %v639_v32 = vcombine.low %v510_v22, %v574_v27  ;;  %v614_v33 = vcombine.low %v494_v17, %v558_v28  ;;  %v452_v22 = vrot.slane %v444_v14, %v2192_v38 }
  0x85   : > { %v646_v39 = vrot.slane %v639_v32, %v2190_v31  ;;  %v621_v40 = vrot.slane %v614_v33, %v2190_v31  ;;  %v466_v30 = vshrl.u32 %v452_v22, 16 }
  0x86   : > { %v606_v34 = vpop.trf.xlu1  ;;  %v590_v35 = vpop.trf.xlu0 }
  0x87   : > { %v647_v36 = vcombine.low %v542_v21, %v606_v34  ;;  %v622_v37 = vcombine.low %v526_v16, %v590_v35  ;;  %v418_v21 = vrot.slane %v410_v13, %v2192_v38 }
  0x89   : > { %v654_v41 = vrot.slane %v647_v36, %v2190_v31  ;;  %v629_v42 = vrot.slane %v622_v37, %v2190_v31  ;;  %v465_v28 = vshrl.u32 %v418_v21, 16  ;;  %v464_v37 = vpack.i.b16 %v452_v22, %v418_v21 }
  0x8b   : > { %v655_v43 = vcombine.low %v646_v39, %v654_v41  ;;  %v630_v44 = vcombine.low %v621_v40, %v629_v42 }
  0x8d   : > { %v637_v45 = vrot.slane %v630_v44, %v2192_v38  ;;  %v662_v46 = vrot.slane %v655_v43, %v2192_v38  ;;  %v426_v44 = vcombine.high %v418_v21, %v2120_v50 }
  0x8f   : > { %v666_v47 = vpack.i.b16 %v662_v46, %v637_v45  ;;  %v668_v48 = vshrl.u32 %v637_v45, 16  ;;  %v669_v49 = vshrl.u32 %v662_v46, 16  ;;  %v638_v51 = vcombine.high %v637_v45, %v2120_v50 }
  0x90   : > { %v663_v52 = vcombine.high %v662_v46, %v2120_v50  ;;  %v460_v45 = vcombine.high %v452_v22, %v2120_v50 }
  0x91   : > { %680 = vxpose.xlu0.c.b16.start.end [1/1] (short) (narrow) %v666_v47, 16  ;;  %v670_v53 = vpack.i.b16 %v669_v49, %v668_v48  ;;  %v676_v54 = vshrl.u32 %v638_v51, 16  ;;  %v467_v48 = vpack.i.b16 %v466_v30, %v465_v28 }
  0x92   : > { %v677_v55 = vshrl.u32 %v663_v52, 16  ;;  %v674_v56 = vpack.i.b16 %v663_v52, %v638_v51  ;;  %v470_v59 = vpack.i.b16 %v460_v45, %v426_v44 }
  0x93   : > { %696 = vxpose.xlu1.c.b16.start.end [1/1] (short) (narrow) %v670_v53, 16  ;;  %v471_v53 = vshrl.u32 %v426_v44, 16 }
  0x94   : > { %v678_v57 = vpack.i.b16 %v677_v55, %v676_v54  ;;  %v472_v54 = vshrl.u32 %v460_v45, 16  ;;  %v411_v55 = vcombine.high %v2212_v7, %v2215_v8 }
  0x95   : > { %712 = vxpose.xlu0.c.b16.start.end [1/1] (short) (narrow) %v674_v56, 16  ;;  %v445_v56 = vcombine.high %v2218_v9, %v2221_v10 }
  0x96   : > { %v473_v62 = vpack.i.b16 %v472_v54, %v471_v53  ;;  %v425_v0 = vrot.slane %v411_v55, %v2192_v38 }
  0x97   : > { %728 = vxpose.xlu1.c.b16.start.end [1/1] (short) (narrow) %v678_v57, 16  ;;  %v459_v1 = vrot.slane %v445_v56, %v2192_v38 }
  0x98   : > { %v427_v14 = vcombine.high %v425_v0, %v2120_v50 }
  0x99   : > { %v478_v7 = vshrl.u32 %v459_v1, 16  ;;  %v476_v9 = vpack.i.b16 %v459_v1, %v425_v0 }
  0xf7   : > { %v688_v6 = vpop.trf.xlu0 }
  0xf8   : > { %v750_v15 = vrot.slane %v688_v6, %v2190_v31  ;;  %v477_v6 = vshrl.u32 %v425_v0, 16 }
  0xf9   : > { %v704_v11 = vpop.trf.xlu1 }
  0xfa   : > { %v782_v18 = vrot.slane %v704_v11, %v2190_v31 }
  0xfb   : > { %v720_v12 = vpop.trf.xlu0 }
  0xfc   : > { %v757_v16 = vrot.slane %v720_v12, %v2190_v31  ;;  %v479_v12 = vpack.i.b16 %v478_v7, %v477_v6 }
  0xfd   : > { %v736_v17 = vpop.trf.xlu1 }
  0xfe   : > { %v758_v19 = vcombine.low %v750_v15, %v757_v16  ;;  %v789_v20 = vrot.slane %v736_v17, %v2190_v31  ;;  %v759_v36 = vcombine.high %v750_v15, %v757_v16  ;;  %v461_v15 = vcombine.high %v459_v1, %v2120_v50 }
 0x100   : > { %v766_v23 = vrot.slane %v758_v19, %v2192_v38  ;;  %v790_v24 = vcombine.low %v782_v18, %v789_v20  ;;  %v791_v27 = vcombine.high %v782_v18, %v789_v20  ;;  %v773_v51 = vrot.slane %v759_v36, %v2192_v38 }
 0x101   : > { %v483_v18 = vshrl.u32 %v427_v14, 16  ;;  %v484_v19 = vshrl.u32 %v461_v15, 16  ;;  %v482_v20 = vpack.i.b16 %v461_v15, %v427_v14 }
 0x102   : > { %v798_v25 = vrot.slane %v790_v24, %v2192_v38  ;;  %v774_v26 = vcombine.high %v766_v23, %v2120_v50  ;;  %v811_v33 = vshrl.u32 %v766_v23, 16  ;;  %v805_v46 = vrot.slane %v791_v27, %v2192_v38  ;;  %v1210_v27 = vld [vmem:[%s2408_s3] sm:$0xff] }
 0x103   : > { %v823_v61 = vshrl.u32 %v773_v51, 16  ;;  %v775_v4 = vcombine.high %v773_v51, %v2120_v50  ;;  %v485_v21 = vpack.i.b16 %v484_v19, %v483_v18 }
 0x104   : > { %v810_v32 = vpack.i.b16 %v798_v25, %v766_v23  ;;  %v812_v34 = vshrl.u32 %v798_v25, 16  ;;  %v806_v35 = vcombine.high %v798_v25, %v2120_v50  ;;  %v817_v39 = vshrl.u32 %v774_v26, 16 }
 0x105   : > { %v824_v58 = vshrl.u32 %v805_v46, 16  ;;  %v822_v60 = vpack.i.b16 %v805_v46, %v773_v51  ;;  %v807_v2 = vcombine.high %v805_v46, %v2120_v50  ;;  %v829_v11 = vshrl.u32 %v775_v4, 16 }
 0x106   : > { %v838_v40 = vsel %vm836_vm1, %v810_v32, 0  ;;  %v813_v41 = vpack.i.b16 %v812_v34, %v811_v33  ;;  %v816_v42 = vpack.i.b16 %v806_v35, %v774_v26  ;;  %v818_v43 = vshrl.u32 %v806_v35, 16 }
 0x107   : > { %1949 = vmatpush3.bf16.msra.mxu0 %v838_v40  ;;  %v825_v63 = vpack.i.b16 %v824_v58, %v823_v61  ;;  %v1022_v3 = vsel %vm836_vm1, %v822_v60, 0  ;;  %v830_v8 = vshrl.u32 %v807_v2, 16  ;;  %v828_v10 = vpack.i.b16 %v807_v2, %v775_v4 }
 0x108   : > { %v884_v47 = vsel %vm836_vm1, %v813_v41, 0  ;;  %1960 = vmatprep.subr.bf16.mxu0 %v2118_v29  ;;  %v819_v49 = vpack.i.b16 %v818_v43, %v817_v39  ;;  %v930_v52 = vsel %vm836_vm1, %v816_v42, 0 }
 0x109   : > { %1955 = vmatpush3.bf16.msra.mxu1 %v884_v47  ;;  %v1068_v5 = vsel %vm836_vm1, %v825_v63, 0  ;;  %v831_v13 = vpack.i.b16 %v830_v8, %v829_v11  ;;  %v1114_v16 = vsel %vm836_vm1, %v828_v10, 0 }
 0x10a   : > { %1951 = vmatmul.mubr.msk.bf16.vlgmr.msra.gmra.mrb[0].mxu0 %vm832_vm2, %v464_v37  ;;  %1966 = vmatprep.subr.bf16.mxu1 %v2118_v29  ;;  %v976_v57 = vsel %vm836_vm1, %v819_v49, 0 }
 0x10b   : > { %1961 = vmatpush3.bf16.msra.mxu0 %v930_v52  ;;  %1962 = vmatprep.mubr.msk.bf16.mxu0 %vm2119_vm0, %v2118_v29  ;;  %v1160_v17 = vsel %vm836_vm1, %v831_v13, 0 }
 0x10c   : > { %1957 = vmatmul.mubr.msk.bf16.vlgmr.msra.gmra.mrb[0].mxu1 %vm832_vm2, %v467_v48  ;;  %1972 = vmatprep.subr.bf16.mxu0 %v2118_v29 }
 0x10d   : > { %1967 = vmatpush3.bf16.msra.mxu1 %v976_v57  ;;  %1968 = vmatprep.mubr.msk.bf16.mxu1 %vm2119_vm0, %v2118_v29 }
 0x10e   : > { %1978 = vmatprep.subr.bf16.mxu1 %v2118_v29 }
 0x112   : > { %1963 = vmatmul.mubr.msk.bf16.vlgmr.msra.gmra.mrb[4].mxu0 %vm832_vm2, %v470_v59 }
 0x113   : > { %1973 = vmatpush3.bf16.msra.mxu0 %v1022_v3  ;;  %1974 = vmatprep.mubr.msk.bf16.mxu0 %vm2119_vm0, %v2118_v29 }
 0x114   : > { %1969 = vmatmul.mubr.msk.bf16.vlgmr.msra.gmra.mrb[4].mxu1 %vm832_vm2, %v473_v62  ;;  %1984 = vmatprep.subr.bf16.mxu0 %v2118_v29 }
 0x115   : > { %1979 = vmatpush3.bf16.msra.mxu1 %v1068_v5  ;;  %1980 = vmatprep.mubr.msk.bf16.mxu1 %vm2119_vm0, %v2118_v29 }
 0x116   : > { %1990 = vmatprep.subr.bf16.mxu1 %v2118_v29 }
 0x11a   : > { %1975 = vmatmul.mubr.msk.bf16.vlgmr.msra.gmra.mrb[8].mxu0 %vm832_vm2, %v476_v9 }
 0x11b   : > { %1985 = vmatpush3.bf16.msra.mxu0 %v1114_v16  ;;  %1986 = vmatprep.mubr.msk.bf16.mxu0 %vm2119_vm0, %v2118_v29 }
 0x11c   : > { %1981 = vmatmul.mubr.msk.bf16.vlgmr.msra.gmra.mrb[8].mxu1 %vm832_vm2, %v479_v12  ;;  %1996 = vmatprep.subr.bf16.mxu0 %v2118_v29 }
 0x11d   : > { %1991 = vmatpush3.bf16.msra.mxu1 %v1160_v17  ;;  %1992 = vmatprep.mubr.msk.bf16.mxu1 %vm2119_vm0, %v2118_v29 }
 0x11e   : > { %2002 = vmatprep.subr.bf16.mxu1 %v2118_v29 }
 0x122   : > { %1987 = vmatmul.mubr.msk.bf16.vlgmr.msra.gmra.mrb[12].mxu0 %vm832_vm2, %v482_v20 }
 0x123   : > { %1998 = vmatprep.mubr.msk.bf16.mxu0 %vm2119_vm0, %v2118_v29 }
 0x124   : > { %1993 = vmatmul.mubr.msk.bf16.vlgmr.msra.gmra.mrb[12].mxu1 %vm832_vm2, %v485_v21 }
 0x125   : > { %2004 = vmatprep.mubr.msk.bf16.mxu1 %vm2119_vm0, %v2118_v29 }
 0x1dd   : > { %v874_v22 = vpop.f32.mrb[0].mxu0 }
 0x1de   : > { %v1202_v23 = vmul.f32 0.5, %v874_v22  ;;  %v1952_v24 = vpop.f32.mrb[1].mxu0 }
 0x1df   : > { %v920_v25 = vpop.f32.mrb[0].mxu1  ;;  %v877_v26 = vpop.f32.mrb[2].mxu0 }
 0x1e0   : > { %v1203_v28 = vmul.f32 0.5, %v920_v25  ;;  %v1958_v30 = vpop.f32.mrb[1].mxu1  ;;  %v1953_v32 = vpop.f32.mrb[3].mxu0  ;;  %v1211_v36 = vadd.f32 %v1210_v27, %v1202_v23 }
 0x1e1   : > { %v923_v33 = vpop.f32.mrb[2].mxu1 }
 0x1e2   : > { %v1959_v34 = vpop.f32.mrb[3].mxu1  ;;  %v1212_v35 = vadd.f32 %v1210_v27, %v1203_v28  ;;  %v1220_v40 = vsel %vm1219_vm3, %v1211_v36, -inf }
 0x1e4   : > { %v1223_v37 = vsel %vm1219_vm3, %v1212_v35, -inf }
 0x1e5   : > { %1224 = vmax.xlane.f32.xlu0 %v1223_v37  ;;  %v966_v39 = vpop.f32.mrb[4].mxu0 }
 0x1e6   : > { %v1204_v41 = vmul.f32 0.5, %v966_v39  ;;  %v1964_v42 = vpop.f32.mrb[5].mxu0 }
 0x1e7   : > { %v1012_v43 = vpop.f32.mrb[4].mxu1  ;;  %v969_v44 = vpop.f32.mrb[6].mxu0 }
 0x1e8   : > { %v1205_v45 = vmul.f32 0.5, %v1012_v43  ;;  %v1970_v46 = vpop.f32.mrb[5].mxu1  ;;  %v1965_v47 = vpop.f32.mrb[7].mxu0  ;;  %v1213_v52 = vadd.f32 %v1210_v27, %v1204_v41 }
 0x1e9   : > { %1221 = vmax.xlane.f32.xlu0 %v1220_v40  ;;  %v1015_v48 = vpop.f32.mrb[6].mxu1 }
 0x1ea   : > { %v1971_v49 = vpop.f32.mrb[7].mxu1  ;;  %v1214_v51 = vadd.f32 %v1210_v27, %v1205_v45  ;;  %v1226_v55 = vsel %vm1219_vm3, %v1213_v52, -inf }
 0x1ec   : > { %v1229_v53 = vsel %vm1219_vm3, %v1214_v51, -inf }
 0x1ed   : > { %1230 = vmax.xlane.f32.xlu1 %v1229_v53  ;;  %v1058_v54 = vpop.f32.mrb[8].mxu0 }
 0x1ee   : > { %v1206_v56 = vmul.f32 0.5, %v1058_v54  ;;  %v1976_v57 = vpop.f32.mrb[9].mxu0 }
 0x1ef   : > { %v1104_v58 = vpop.f32.mrb[8].mxu1  ;;  %v1061_v59 = vpop.f32.mrb[10].mxu0 }
 0x1f0   : > { %v1207_v60 = vmul.f32 0.5, %v1104_v58  ;;  %v1982_v61 = vpop.f32.mrb[9].mxu1  ;;  %v1977_v62 = vpop.f32.mrb[11].mxu0  ;;  %v1215_v2 = vadd.f32 %v1210_v27, %v1206_v56  ;;  %v378_v59 = vld [vmem:[%s336_s14] sm:$0xf] }
 0x1f1   : > { %v1107_v63 = vpop.f32.mrb[10].mxu1  ;;  %1227 = vmax.xlane.f32.xlu1 %v1226_v55  ;;  %v380_v61 = vld [vmem:[%s336_s14 + $0x8] sm:$0xf] }
 0x1f2   : > { %v1983_v0 = vpop.f32.mrb[11].mxu1  ;;  %v1216_v1 = vadd.f32 %v1210_v27, %v1207_v60  ;;  %v1232_v5 = vsel %vm1219_vm3, %v1215_v2, -inf  ;;  %v379_v60 = vld [vmem:[%s336_s14 + $0x4] sm:$0xf]  ;;  %v381_v63 = vld [vmem:[%s336_s14 + $0xc] sm:$0xf] }
 0x1f3   : > { %v382_v0 = vld [vmem:[%s336_s14 + $0x10] sm:$0xf] }
 0x1f4   : > { %v1235_v3 = vsel %vm1219_vm3, %v1216_v1, -inf }
 0x1f5   : > { %1236 = vmax.xlane.f32.xlu0 %v1235_v3  ;;  %v1150_v4 = vpop.f32.mrb[12].mxu0  ;;  %v384_v3 = vld [vmem:[%s336_s14 + $0x18] sm:$0xf] }
 0x1f6   : > { %v1208_v6 = vmul.f32 0.5, %v1150_v4  ;;  %v1988_v7 = vpop.f32.mrb[13].mxu0  ;;  %v385_v4 = vld [vmem:[%s336_s14 + $0x1c] sm:$0xf] }
 0x1f7   : > { %v1196_v8 = vpop.f32.mrb[12].mxu1  ;;  %v1153_v9 = vpop.f32.mrb[14].mxu0  ;;  %v1909_v7 = vpack.c.bf16 %v384_v3, %v380_v61 }
 0x1f8   : > { %v1209_v10 = vmul.f32 0.5, %v1196_v8  ;;  %v1994_v11 = vpop.f32.mrb[13].mxu1  ;;  %v1989_v12 = vpop.f32.mrb[15].mxu0  ;;  %v1217_v16 = vadd.f32 %v1210_v27, %v1208_v6  ;;  %v1911_v8 = vpack.c.bf16 %v385_v4, %v381_v63 }
 0x1f9   : > { %v1199_v13 = vpop.f32.mrb[14].mxu1  ;;  %1233 = vmax.xlane.f32.xlu0 %v1232_v5  ;;  %v1908_v5 = vpack.c.bf16 %v382_v0, %v378_v59  ;;  %v1336_v12 = vrot.slane %v1909_v7, %v2190_v31 }
 0x1fa   : > { %v1995_v14 = vpop.f32.mrb[15].mxu1  ;;  %v1218_v15 = vadd.f32 %v1210_v27, %v1209_v10  ;;  %v1238_v18 = vsel %vm1219_vm3, %v1217_v16, -inf  ;;  %v1361_v13 = vrot.slane %v1911_v8, %v2190_v31 }
 0x1fb   : > { %v1328_v9 = vrot.slane %v1908_v5, %v2190_v31 }
 0x1fc   : > { %v1241_v17 = vsel %vm1219_vm3, %v1218_v15, -inf }
 0x1fd   : > { %1242 = vmax.xlane.f32.xlu1 %v1241_v17 }
 0x201   : > { %1239 = vmax.xlane.f32.xlu1 %v1238_v18 }
 0x272   : > { %v1225_v19 = vpop.xlane.xlu0 %1224 }
 0x273   : > { %v1245_v20 = vsub.f32 %v1212_v35, %v1225_v19 }
 0x275   : > { %v1254_v21 = vmul.f32 1.442695, %v1245_v20 }
 0x276   : > { %v1222_v22 = vpop.xlane.xlu0 %1221 }
 0x277   : > { %2052 = vpow2.f32 %v1254_v21  ;;  %v1244_v23 = vsub.f32 %v1211_v36, %v1222_v22 }
 0x279   : > { %v1252_v24 = vmul.f32 1.442695, %v1244_v23 }
 0x27a   : > { %v1231_v25 = vpop.xlane.xlu1 %1230 }
 0x27b   : > { %2054 = vpow2.f32 %v1252_v24  ;;  %v1247_v26 = vsub.f32 %v1214_v51, %v1231_v25 }
 0x27d   : > { %v1258_v28 = vmul.f32 1.442695, %v1247_v26 }
 0x27e   : > { %v1228_v30 = vpop.xlane.xlu1 %1227 }
 0x27f   : > { %2056 = vpow2.f32 %v1258_v28  ;;  %v1246_v27 = vsub.f32 %v1213_v52, %v1228_v30 }
 0x281   : > { %v2302_v32 = vpop.eup %2052  ;;  %v1256_v33 = vmul.f32 1.442695, %v1246_v27 }
 0x282   : > { %v1237_v34 = vpop.xlane.xlu0 %1236  ;;  %v1271_v37 = vsel %vm1219_vm3, %v2302_v32, 0.0 }
 0x283   : > { %2058 = vpow2.f32 %v1256_v33  ;;  %v1249_v35 = vsub.f32 %v1216_v1, %v1237_v34  ;;  %1272 = vadd.xlane.f32.xlu0 %v1271_v37  ;;  %v383_v1 = vld [vmem:[%s336_s14 + $0x14] sm:$0xf] }
 0x284   : > { %v1910_v6 = vpack.c.bf16 %v383_v1, %v379_v60 }
 0x285   : > { %v2306_v39 = vpop.eup %2054  ;;  %v1262_v36 = vmul.f32 1.442695, %v1249_v35 }
 0x286   : > { %v1234_v40 = vpop.xlane.xlu0 %1233  ;;  %v1268_v41 = vsel %vm1219_vm3, %v2306_v39, 0.0  ;;  %v1353_v10 = vrot.slane %v1910_v6, %v2190_v31 }
 0x287   : > { %2060 = vpow2.f32 %v1262_v36  ;;  %v1248_v42 = vsub.f32 %v1215_v2, %v1234_v40  ;;  %1269 = vadd.xlane.f32.xlu0 %v1268_v41 }
 0x289   : > { %v2310_v43 = vpop.eup %2056  ;;  %v1260_v44 = vmul.f32 1.442695, %v1248_v42 }
 0x28a   : > { %v1243_v45 = vpop.xlane.xlu1 %1242  ;;  %v1277_v46 = vsel %vm1219_vm3, %v2310_v43, 0.0 }
 0x28b   : > { %2062 = vpow2.f32 %v1260_v44  ;;  %v1251_v47 = vsub.f32 %v1218_v15, %v1243_v45  ;;  %1278 = vadd.xlane.f32.xlu1 %v1277_v46  ;;  %v1337_v15 = vcombine.low %v1328_v9, %v1336_v12 }
 0x28d   : > { %v2314_v48 = vpop.eup %2058  ;;  %v1266_v49 = vmul.f32 1.442695, %v1251_v47  ;;  %v1344_v17 = vrot.slane %v1337_v15, %v2192_v38 }
 0x28e   : > { %v1240_v51 = vpop.xlane.xlu1 %1239  ;;  %v1274_v52 = vsel %vm1219_vm3, %v2314_v48, 0.0 }
 0x28f   : > { %2064 = vpow2.f32 %v1266_v49  ;;  %v1250_v53 = vsub.f32 %v1217_v16, %v1240_v51  ;;  %1275 = vadd.xlane.f32.xlu1 %v1274_v52  ;;  %v1362_v16 = vcombine.low %v1353_v10, %v1361_v13  ;;  %v1374_v21 = vshrl.u32 %v1344_v17, 16 }
 0x290   : > { %v1345_v25 = vcombine.high %v1344_v17, %v2120_v50 }
 0x291   : > { %v2318_v54 = vpop.eup %2060  ;;  %v1264_v55 = vmul.f32 1.442695, %v1250_v53  ;;  %v1369_v18 = vrot.slane %v1362_v16, %v2192_v38 }
 0x292   : > { %v1283_v56 = vsel %vm1219_vm3, %v2318_v54, 0.0  ;;  %v1380_v27 = vshrl.u32 %v1345_v25, 16 }
 0x293   : > { %2066 = vpow2.f32 %v1264_v55  ;;  %1284 = vadd.xlane.f32.xlu0 %v1283_v56  ;;  %v1373_v19 = vpack.i.b16 %v1369_v18, %v1344_v17  ;;  %v1375_v22 = vshrl.u32 %v1369_v18, 16  ;;  %v1370_v26 = vcombine.high %v1369_v18, %v2120_v50 }
 0x294   : > { %v1308_v50 = vstv %s345_s15 }
 0x295   : > { %v2323_v57 = vpop.eup %2062  ;;  %v1388_v20 = vsel %vm1386_vm4, %v1373_v19, 0  ;;  %v1376_v23 = vpack.i.b16 %v1375_v22, %v1374_v21  ;;  %v1379_v28 = vpack.i.b16 %v1370_v26, %v1345_v25  ;;  %v1381_v33 = vshrl.u32 %v1370_v26, 16 }
 0x296   : > { %v1280_v58 = vsel %vm1219_vm3, %v2323_v57, 0.0  ;;  %1997 = vmatpush3.bf16.msra.mxu0 %v1388_v20 }
 0x297   : > { %1281 = vadd.xlane.f32.xlu0 %v1280_v58  ;;  %2008 = vmatprep.subr.bf16.mxu0 %v2118_v29  ;;  %v1434_v24 = vsel %vm1386_vm4, %v1376_v23, 0  ;;  %v1480_v30 = vsel %vm1386_vm4, %v1379_v28, 0  ;;  %v1382_v34 = vpack.i.b16 %v1381_v33, %v1380_v27 }
 0x298   : > { %2003 = vmatpush3.bf16.msra.mxu1 %v1434_v24 }
 0x299   : > { %v2330_v62 = vpop.eup %2064  ;;  %2014 = vmatprep.subr.bf16.mxu1 %v2118_v29  ;;  %v1526_v37 = vsel %vm1386_vm4, %v1382_v34, 0 }
 0x29a   : > { %v1289_v2 = vsel %vm1219_vm3, %v2330_v62, 0.0 }
 0x29b   : > { %1290 = vadd.xlane.f32.xlu1 %v1289_v2 }
 0x29d   : > { %v2336_v11 = vpop.eup %2066 }
 0x29e   : > { %v1286_v14 = vsel %vm1219_vm3, %v2336_v11, 0.0 }
 0x29f   : > { %1287 = vadd.xlane.f32.xlu1 %v1286_v14 }
 0x310   : > { %v1273_v35 = vpop.xlane.xlu0 %1272 }
 0x311   : > { %2068 = vrcp.f32 %v1273_v35 }
 0x314   : > { %v1270_v36 = vpop.xlane.xlu0 %1269 }
 0x315   : > { %2070 = vrcp.f32 %v1270_v36 }
 0x318   : > { %v1279_v40 = vpop.xlane.xlu1 %1278 }
 0x319   : > { %2072 = vrcp.f32 %v1279_v40 }
 0x31b   : > { %v2069_v41 = vpop.eup %2068 }
 0x31c   : > { %v1295_v42 = vmul.f32 %v2069_v41, %v2302_v32  ;;  %v1276_v44 = vpop.xlane.xlu1 %1275 }
 0x31d   : > { %2074 = vrcp.f32 %v1276_v44 }
 0x31e   : > { %v1309_v46 = vmul.f32 %v1308_v50, %v1295_v42 }
 0x31f   : > { %v2071_v45 = vpop.eup %2070 }
 0x320   : > { %v1293_v47 = vmul.f32 %v2071_v45, %v2306_v39  ;;  %v1285_v49 = vpop.xlane.xlu0 %1284 }
 0x321   : > { %2076 = vrcp.f32 %v1285_v49 }
 0x322   : > { %v1313_v51 = vsub.f32 %v1293_v47, %v1309_v46 }
 0x323   : > { %v2073_v52 = vpop.eup %2072 }
 0x324   : > { %v1299_v53 = vmul.f32 %v2073_v52, %v2310_v43  ;;  %v1282_v55 = vpop.xlane.xlu0 %1281  ;;  %v1317_v56 = vpack.c.bf16 %v1313_v51, %v1313_v51 }
 0x325   : > { %2078 = vrcp.f32 %v1282_v55 }
 0x326   : > { %1999 = vmatmul.mubr.msk.bf16.vlgmr.msra.gmra.mrb[16].mxu0 %vm1219_vm3, %v1317_v56  ;;  %v1310_v32 = vmul.f32 %v1308_v50, %v1299_v53  ;;  %v1916_v53 = vld [vmem:[%s2409_s4] ss:$0 sm:$0xff] }
 0x327   : > { %v2075_v58 = vpop.eup %2074  ;;  %2009 = vmatpush3.bf16.msra.mxu0 %v1480_v30  ;;  %2010 = vmatprep.mubr.msk.bf16.mxu0 %vm2119_vm0, %v2118_v29 }
 0x328   : > { %v1297_v59 = vmul.f32 %v2075_v58, %v2314_v48  ;;  %v1291_v39 = vpop.xlane.xlu1 %1290 }
 0x329   : > { %2080 = vrcp.f32 %v1291_v39 }
 0x32a   : > { %v1314_v60 = vsub.f32 %v1297_v59, %v1310_v32 }
 0x32b   : > { %v2077_v61 = vpop.eup %2076 }
 0x32c   : > { %v1303_v63 = vmul.f32 %v2077_v61, %v2318_v54  ;;  %v1288_v43 = vpop.xlane.xlu1 %1287  ;;  %v1318_v0 = vpack.c.bf16 %v1314_v60, %v1314_v60 }
 0x32d   : > { %2082 = vrcp.f32 %v1288_v43 }
 0x32e   : > { %2005 = vmatmul.mubr.msk.bf16.vlgmr.msra.gmra.mrb[16].mxu1 %vm1219_vm3, %v1318_v0  ;;  %v1311_v2 = vmul.f32 %v1308_v50, %v1303_v63 }
 0x32f   : > { %v2079_v1 = vpop.eup %2078  ;;  %2015 = vmatpush3.bf16.msra.mxu1 %v1526_v37  ;;  %2016 = vmatprep.mubr.msk.bf16.mxu1 %vm2119_vm0, %v2118_v29 }
 0x330   : > { %v1301_v3 = vmul.f32 %v2079_v1, %v2323_v57 }
 0x332   : > { %v1315_v48 = vsub.f32 %v1301_v3, %v1311_v2 }
 0x333   : > { %v2081_v4 = vpop.eup %2080 }
 0x334   : > { %v1307_v5 = vmul.f32 %v2081_v4, %v2330_v62  ;;  %v1319_v6 = vpack.c.bf16 %v1315_v48, %v1315_v48 }
 0x336   : > { %2011 = vmatmul.mubr.msk.bf16.vlgmr.msra.gmra.mrb[20].mxu0 %vm1219_vm3, %v1319_v6  ;;  %v1312_v7 = vmul.f32 %v1308_v50, %v1307_v5 }
 0x337   : > { %v2083_v54 = vpop.eup %2082 }
 0x338   : > { %v1305_v8 = vmul.f32 %v2083_v54, %v2336_v11 }
 0x33a   : > { %v1316_v9 = vsub.f32 %v1305_v8, %v1312_v7 }
 0x33c   : > { %v1320_v10 = vpack.c.bf16 %v1316_v9, %v1316_v9 }
 0x33e   : > { %2017 = vmatmul.mubr.msk.bf16.vlgmr.msra.gmra.mrb[20].mxu1 %vm1219_vm3, %v1320_v10 }
 0x3f9   : > { %v1424_v12 = vpop.f32.mrb[16].mxu0 }
 0x3fa   : > { %v1568_v29 = vmul.f32 %v1424_v12, %v1424_v12  ;;  %v2000_v13 = vpop.f32.mrb[17].mxu0 }
 0x3fb   : > { %v1427_v14 = vpop.f32.mrb[18].mxu0 }
 0x3fc   : > { %v2001_v57 = vpop.f32.mrb[19].mxu0  ;;  %v1572_v15 = vsel %vm1219_vm3, %v1568_v29, 0.0 }
 0x3fd   : > { %1573 = vadd.xlane.f32.xlu0 %v1572_v15 }
 0x401   : > { %v1470_v62 = vpop.f32.mrb[16].mxu1 }
 0x402   : > { %v1569_v16 = vmul.f32 %v1470_v62, %v1470_v62  ;;  %v2006_v17 = vpop.f32.mrb[17].mxu1 }
 0x403   : > { %v1473_v18 = vpop.f32.mrb[18].mxu1 }
 0x404   : > { %v2007_v19 = vpop.f32.mrb[19].mxu1  ;;  %v1575_v20 = vsel %vm1219_vm3, %v1569_v16, 0.0 }
 0x405   : > { %1576 = vadd.xlane.f32.xlu1 %v1575_v20 }
 0x409   : > { %v1516_v11 = vpop.f32.mrb[20].mxu0 }
 0x40a   : > { %v1570_v21 = vmul.f32 %v1516_v11, %v1516_v11  ;;  %v2012_v22 = vpop.f32.mrb[21].mxu0 }
 0x40b   : > { %v1519_v23 = vpop.f32.mrb[22].mxu0 }
 0x40c   : > { %v2013_v24 = vpop.f32.mrb[23].mxu0  ;;  %v1578_v25 = vsel %vm1219_vm3, %v1570_v21, 0.0 }
 0x40d   : > { %1579 = vadd.xlane.f32.xlu0 %v1578_v25 }
 0x411   : > { %v1562_v26 = vpop.f32.mrb[20].mxu1 }
 0x412   : > { %v1571_v28 = vmul.f32 %v1562_v26, %v1562_v26  ;;  %v2018_v30 = vpop.f32.mrb[21].mxu1 }
 0x413   : > { %v1565_v27 = vpop.f32.mrb[22].mxu1 }
 0x414   : > { %v2019_v33 = vpop.f32.mrb[23].mxu1  ;;  %v1581_v34 = vsel %vm1219_vm3, %v1571_v28, 0.0 }
 0x415   : > { %1582 = vadd.xlane.f32.xlu1 %v1581_v34 }
 0x48a   : > { %v1574_v37 = vpop.xlane.xlu0 %1573 }
 0x48b   : > { %v1585_v35 = vmul.f32 0.125, %v1574_v37 }
 0x48d   : > { %v1589_v36 = vadd.f32 1e-05, %v1585_v35 }
 0x48f   : > { %2084 = vrsqrt.f32 %v1589_v36 }
 0x492   : > { %v1577_v40 = vpop.xlane.xlu1 %1576 }
 0x493   : > { %v1586_v41 = vmul.f32 0.125, %v1577_v40 }
 0x495   : > { %v1590_v50 = vadd.f32 1e-05, %v1586_v41 }
 0x499   : > { %v2085_v47 = vpop.eup %2084 }
 0x49a   : > { %v1580_v42 = vpop.xlane.xlu0 %1579  ;;  %v1597_v52 = vmul.f32 %v2085_v47, %v1424_v12 }
 0x49b   : > { %v1587_v44 = vmul.f32 0.125, %v1580_v42 }
 0x49c   : > { %v1608_v56 = vmul.f32 %v1916_v53, %v1597_v52 }
 0x49d   : > { %v1591_v45 = vadd.f32 1e-05, %v1587_v44 }
 0x49e   : > { %v1612_v39 = vmul.f32 0.64449096, %v1608_v56 }
 0x49f   : > { %2086 = vrsqrt.f32 %v1591_v45 }
 0x4a0   : > { %2088 = vrsqrt.f32 %v1590_v50 }
 0x4a2   : > { %v1583_v46 = vpop.xlane.xlu1 %1582 }
 0x4a3   : > { %v1588_v49 = vmul.f32 0.125, %v1583_v46 }
 0x4a5   : > { %v1592_v51 = vadd.f32 1e-05, %v1588_v49 }
 0x4a7   : > { %2090 = vrsqrt.f32 %v1592_v51 }
 0x4a9   : > { %v2087_v55 = vpop.eup %2086 }
 0x4aa   : > { %v1599_v58 = vmul.f32 %v2087_v55, %v1516_v11  ;;  %v2089_v32 = vpop.eup %2088 }
 0x4ab   : > { %v1598_v60 = vmul.f32 %v2089_v32, %v1470_v62 }
 0x4ac   : > { %v1610_v59 = vmul.f32 %v1916_v53, %v1599_v58 }
 0x4ad   : > { %v1609_v1 = vmul.f32 %v1916_v53, %v1598_v60 }
 0x4ae   : > { %v1614_v61 = vmul.f32 0.64449096, %v1610_v59 }
 0x4af   : > { %v1613_v48 = vmul.f32 0.64449096, %v1609_v1 }
 0x4b0   : > { %v1616_v63 = vcombine.low %v1612_v39, %v1614_v61  ;;  %v1617_v43 = vcombine.high %v1612_v39, %v1614_v61 }
 0x4b1   : > { %v2091_v0 = vpop.eup %2090 }
 0x4b2   : > { %v1600_v2 = vmul.f32 %v2091_v0, %v1562_v26  ;;  %v1624_v54 = vrot.slane %v1616_v63, %v2190_v31  ;;  %v1631_v7 = vrot.slane %v1617_v43, %v2190_v31 }
 0x4b4   : > { %v1611_v3 = vmul.f32 %v1916_v53, %v1600_v2 }
 0x4b6   : > { %v1615_v4 = vmul.f32 0.64449096, %v1611_v3 }
 0x4b8   : > { %v1632_v5 = vcombine.low %v1613_v48, %v1615_v4  ;;  %v1633_v6 = vcombine.high %v1613_v48, %v1615_v4 }
 0x4ba   : > { %v1640_v8 = vrot.slane %v1632_v5, %v2190_v31  ;;  %v1647_v9 = vrot.slane %v1633_v6, %v2190_v31 }
 0x4bc   : > { %v1648_v10 = vcombine.low %v1624_v54, %v1640_v8  ;;  %v1649_v12 = vcombine.high %v1624_v54, %v1640_v8  ;;  %v1664_v29 = vcombine.low %v1631_v7, %v1647_v9  ;;  %v1665_v13 = vcombine.high %v1631_v7, %v1647_v9 }
 0x4be   : > { %v1656_v14 = vrot.slane %v1648_v10, %v2192_v38  ;;  %v1663_v57 = vrot.slane %v1649_v12, %v2192_v38  ;;  %v1672_v15 = vrot.slane %v1664_v29, %v2192_v38  ;;  %v1679_v62 = vrot.slane %v1665_v13, %v2192_v38 }
 0x4c0   : > { %v1684_v16 = vcombine.low %v1656_v14, %v1663_v57  ;;  %v1917_v17 = vcombine.high %v1656_v14, %v1663_v57  ;;  %v1700_v18 = vcombine.low %v1672_v15, %v1679_v62  ;;  %v1918_v19 = vcombine.high %v1672_v15, %v1679_v62 }
 0x4c2   : > { %v1691_v20 = vrot.slane %v1684_v16, %v2190_v31  ;;  %v1699_v11 = vrot.slane %v1917_v17, %v2190_v31  ;;  %v1707_v21 = vrot.slane %v1700_v18, %v2190_v31  ;;  %v1715_v22 = vrot.slane %v1918_v19, %v2190_v31 }
 0x4c4   : > { %v1717_v23 = vcombine.high %v1691_v20, %v1699_v11  ;;  %v1733_v24 = vcombine.high %v1707_v21, %v1715_v22  ;;  %v1716_v25 = vcombine.low %v1691_v20, %v1699_v11  ;;  %v1732_v26 = vcombine.low %v1707_v21, %v1715_v22 }
 0x4c6   : > { %v1731_v28 = vrot.slane %v1717_v23, %v2192_v38  ;;  %v1747_v30 = vrot.slane %v1733_v24, %v2192_v38  ;;  %v1724_v27 = vrot.slane %v1716_v25, %v2192_v38  ;;  %v1740_v33 = vrot.slane %v1732_v26, %v2192_v38 }
 0x4c8   : > { %v1750_v34 = vcombine.low %v1731_v28, %v1747_v30  ;;  %v1749_v37 = vcombine.high %v1724_v27, %v1740_v33  ;;  %v1751_v35 = vcombine.high %v1731_v28, %v1747_v30  ;;  %v1748_v36 = vcombine.low %v1724_v27, %v1740_v33 }
 0x4ca   : > { %1757 = vrot.lane.b32.xlu1 %v1750_v34, %s2121_s18  ;;  %1753 = vrot.lane.b32.xlu0 %v1749_v37, %s2122_s19 }
 0x4ce   : > { %1761 = vrot.lane.b32.xlu1 %v1751_v35, %s2123_s20 }
 0x53c   : > { %v1758_v31 = vpop.permute.xlu1 %1757  ;;  %v1754_v40 = vpop.permute.xlu0 %1753 }
 0x53d   : > { %v1764_v41 = vsel %vm1219_vm3, %v1748_v36, %v1754_v40 }
 0x53e   : > { %v1766_v42 = vsel %vm1765_vm5, %v1764_v41, %v1758_v31 }
 0x540   : > { %v1762_v38 = vpop.permute.xlu1 %1761 }
 0x541   : > { %v1768_v44 = vsel %vm1767_vm6, %v1766_v42, %v1762_v38 }
 0x542   : > { %1770 = vst.msk [vmem:[%s343_s27] sm:$0xff] %vm1769_vm7, %v1768_v44 }
 0x543 PF: > { %s17_s25 = sadd.s32 1, %s2114_s25   ;;  %s2412_s23 = smov %s2110_s24 }
 0x544   : > { %p14_p5 = scmp.ge.s32.totalorder %s17_s25, 4   ;;  %s2413_s24 = smov %s2415_s5 }
 0x546   :  { %16 = sbr.rel (!%p14_p5) target bundleno = 2 (0x2), region = 80 }

</bundles_post_ra>
